<compile_context>
chip_gen: v7x
topology: tpu7x:2x2x1
jax: 0.10.0
libtpu: 0.0.40
codegen_flags: <defaults>
</compile_context>

<pallas_src>
import functools

import jax
import jax.numpy as jnp
from jax import lax
from jax.experimental import pallas as pl
from jax.experimental.pallas import tpu as pltpu


# ----------------------------------------------------------------------------
# Kernel: one CLIPEncoderLayer step.  grid = (B, L); hidden state carried in
# a persistent VMEM scratch across the L axis.
# ----------------------------------------------------------------------------
def clip_layer_kernel(
    x_ref,                       # (S, E)  encoder input for this batch elem (read at l==0)
    mask_ref,                    # (S, S)  additive attention mask (attn + causal)
    ln1w_ref, ln1b_ref,          # (1, E)  f32
    wq_ref, bq_ref,              # (E, E) bf16, (1, E) f32   (weights pre-transposed)
    wk_ref, bk_ref,
    wv_ref, bv_ref,
    wo_ref, bo_ref,
    ln2w_ref, ln2b_ref,          # (1, E)  f32
    w1_ref, b1_ref,              # (E, I) bf16, (1, I) f32
    w2_ref, b2_ref,              # (I, E) bf16, (1, E) f32
    o_ref,                       # (S, E)  output hidden states (resident across L)
    h_sc,                        # (S, E)  f32  carried hidden state
    q_sc, k_sc, v_sc,            # (S, E)  bf16 projections
    ctx_sc,                      # (S, E)  bf16 attention context (pre out-proj)
    mlp_sc,                      # (S, E)  f32  MLP accumulator
    *, num_heads, head_dim, scale, eps, mlp_chunk, heads_per_iter,
):
    f32 = jnp.float32
    bf16 = jnp.bfloat16

    layer = pl.program_id(1)

    # Seed the carried residual stream from the encoder input at layer 0.
    @pl.when(layer == 0)
    def _():
        h_sc[...] = x_ref[...].astype(f32)

    x = h_sc[...]                                            # (S, E) f32

    def layer_norm(v, w_ref_, b_ref_):
        mu = jnp.mean(v, axis=-1, keepdims=True)
        var = jnp.mean(jnp.square(v - mu), axis=-1, keepdims=True)
        return (v - mu) * lax.rsqrt(var + eps) * w_ref_[...] + b_ref_[...]

    # ---- LayerNorm 1 (f32) + q/k/v projections (bf16 MXU, f32 accum) --------
    xn_b = layer_norm(x, ln1w_ref, ln1b_ref).astype(bf16)

    q_sc[...] = ((jnp.dot(xn_b, wq_ref[...], preferred_element_type=f32)
                  + bq_ref[...]) * scale).astype(bf16)       # q pre-scaled (torch semantics)
    k_sc[...] = (jnp.dot(xn_b, wk_ref[...], preferred_element_type=f32)
                 + bk_ref[...]).astype(bf16)
    v_sc[...] = (jnp.dot(xn_b, wv_ref[...], preferred_element_type=f32)
                 + bv_ref[...]).astype(bf16)

    mask = mask_ref[...].astype(f32)                         # (S, S)
    slab = heads_per_iter * head_dim                         # 128 lanes for head_dim=64

    # ---- per-head-pair attention; contexts written into ctx_sc --------------
    def attn_body(p_idx, carry):
        start = pl.multiple_of(p_idx * slab, slab)
        qp = q_sc[:, pl.ds(start, slab)]                     # (S, slab) bf16
        kp = k_sc[:, pl.ds(start, slab)]
        vp = v_sc[:, pl.ds(start, slab)]
        outs = []
        for s in range(heads_per_iter):                      # static split of the slab
            qh = qp[:, s * head_dim:(s + 1) * head_dim]
            kh = kp[:, s * head_dim:(s + 1) * head_dim]
            vh = vp[:, s * head_dim:(s + 1) * head_dim]
            sc = lax.dot_general(qh, kh, (((1,), (1,)), ((), ())),
                                 preferred_element_type=f32) + mask     # (S, S)
            sc = sc - jnp.max(sc, axis=-1, keepdims=True)
            pw = jnp.exp(sc)
            pw = pw * pl.reciprocal(jnp.sum(pw, axis=-1, keepdims=True),
                                    approx=True)
            outs.append(jnp.dot(pw.astype(bf16), vh,
                                preferred_element_type=f32).astype(bf16))
        ctx_sc[:, pl.ds(start, slab)] = jnp.concatenate(outs, axis=-1)
        return carry

    lax.fori_loop(0, num_heads // heads_per_iter, attn_body, 0)

    # ---- out-projection with full K=E contraction + residual ---------------
    attn_out = (jnp.dot(ctx_sc[...], wo_ref[...], preferred_element_type=f32)
                + bo_ref[...])
    h1 = x + attn_out                                        # residual 1 (f32)

    # ---- LayerNorm 2 (f32) ---------------------------------------------------
    hn_b = layer_norm(h1, ln2w_ref, ln2b_ref).astype(bf16)

    # ---- MLP: fc1 -> quick_gelu -> fc2, chunked over intermediate dim ------
    I = w1_ref.shape[1]
    n_chunks = I // mlp_chunk
    mlp_sc[...] = jnp.zeros_like(mlp_sc)

    def mlp_body(c_idx, carry):
        i0 = pl.multiple_of(c_idx * mlp_chunk, mlp_chunk)
        m = (jnp.dot(hn_b, w1_ref[:, pl.ds(i0, mlp_chunk)],
                     preferred_element_type=f32)
             + b1_ref[:, pl.ds(i0, mlp_chunk)])              # (S, chunk) f32
        m = m * jax.nn.sigmoid(1.702 * m)                    # quick_gelu (CLIP)
        mlp_sc[...] += jnp.dot(m.astype(bf16),
                               w2_ref[pl.ds(i0, mlp_chunk), :],
                               preferred_element_type=f32)
        return carry

    lax.fori_loop(0, n_chunks, mlp_body, 0)

    h_new = h1 + mlp_sc[...] + b2_ref[...]                   # residual 2 (f32)
    h_sc[...] = h_new                                        # carry to next layer
    o_ref[...] = h_new.astype(o_ref.dtype)                   # last write wins (l = L-1)


# ----------------------------------------------------------------------------
# VMEM sizing helpers
# ----------------------------------------------------------------------------
def _vmem_capacity_bytes():
    try:
        return int(pltpu.get_tpu_info().vmem_capacity_bytes)
    except Exception:
        return 128 * 1024 * 1024          # conservative fallback (v5e/v6e)


def _pick_mlp_chunk(I, vmem_cap):
    # Bigger chunks on 128 MiB-VMEM chips (v5e/v6e); <=512 on v7x (64 MiB).
    target = 2048 if vmem_cap >= 96 * (1 << 20) else 512
    if I <= target:
        return I
    for c in (2048, 1024, 512, 384, 256, 128):
        if c <= target and I % c == 0:
            return c
    return I


# ----------------------------------------------------------------------------
# Wrapper: full CLIPEncoder forward (all layers fused into one pallas_call)
# ----------------------------------------------------------------------------
def clip_encoder(x, mask, params, *, num_heads, eps=1e-5, mlp_chunk=None):
    """x: (B, S, E) f32.  mask: (1|B, S, S) additive mask.
    params: dict of layer-stacked arrays (leading L axis); matmul weights bf16."""
    B, S, E = x.shape
    L = params["wq"].shape[0]
    I = params["w1"].shape[2]
    head_dim = E // num_heads
    scale = head_dim ** -0.5
    heads_per_iter = 2 if num_heads % 2 == 0 else 1

    vmem_cap = _vmem_capacity_bytes()
    chunk = mlp_chunk if mlp_chunk is not None else _pick_mlp_chunk(I, vmem_cap)
    if I % chunk != 0:
        chunk = I
    vmem_limit = int(vmem_cap * 0.85)     # ~15% headroom for compiler scratch

    kernel = functools.partial(
        clip_layer_kernel, num_heads=num_heads, head_dim=head_dim,
        scale=scale, eps=eps, mlp_chunk=chunk, heads_per_iter=heads_per_iter)

    def per_layer(shape):
        nd = len(shape)
        return pl.BlockSpec((None,) + shape,
                            lambda b, l, _nd=nd: (l,) + (0,) * _nd)

    Bm = mask.shape[0]
    mask_spec = (pl.BlockSpec((None, S, S), lambda b, l: (0, 0, 0)) if Bm == 1
                 else pl.BlockSpec((None, S, S), lambda b, l: (b, 0, 0)))

    in_specs = [
        pl.BlockSpec((None, S, E), lambda b, l: (b, 0, 0)),   # x
        mask_spec,                                            # combined mask
        per_layer((1, E)), per_layer((1, E)),                 # ln1 w, b
        per_layer((E, E)), per_layer((1, E)),                 # q
        per_layer((E, E)), per_layer((1, E)),                 # k
        per_layer((E, E)), per_layer((1, E)),                 # v
        per_layer((E, E)), per_layer((1, E)),                 # out proj
        per_layer((1, E)), per_layer((1, E)),                 # ln2 w, b
        per_layer((E, I)), per_layer((1, I)),                 # fc1
        per_layer((I, E)), per_layer((1, E)),                 # fc2
    ]
    out_spec = pl.BlockSpec((None, S, E), lambda b, l: (b, 0, 0))

    f32, bf16 = jnp.float32, jnp.bfloat16
    scratch_shapes = [
        pltpu.VMEM((S, E), f32),   # h_sc  (carried residual stream)
        pltpu.VMEM((S, E), bf16),  # q_sc
        pltpu.VMEM((S, E), bf16),  # k_sc
        pltpu.VMEM((S, E), bf16),  # v_sc
        pltpu.VMEM((S, E), bf16),  # ctx_sc
        pltpu.VMEM((S, E), f32),   # mlp_sc
    ]

    return pl.pallas_call(
        kernel,
        out_shape=jax.ShapeDtypeStruct((B, S, E), x.dtype),
        grid_spec=pltpu.PrefetchScalarGridSpec(
            num_scalar_prefetch=0,
            grid=(B, L),                       # batch parallel, layers sequential
            in_specs=in_specs,
            out_specs=out_spec,
            scratch_shapes=scratch_shapes,
        ),
        compiler_params=pltpu.CompilerParams(
            dimension_semantics=("parallel", "arbitrary"),
            vmem_limit_bytes=vmem_limit,
        ),
    )(x, mask,
      params["ln1w"], params["ln1b"],
      params["wq"], params["bq"], params["wk"], params["bk"],
      params["wv"], params["bv"], params["wo"], params["bo"],
      params["ln2w"], params["ln2b"],
      params["w1"], params["b1"], params["w2"], params["b2"])


# ----------------------------------------------------------------------------
# Parameter setup: stack per-layer params along L, cast matmul weights to bf16
# ONCE (setup time), keep LayerNorm / biases in f32.
# ----------------------------------------------------------------------------
def stack_layer_params(layer_params):
    bf16 = jnp.bfloat16

    def stack(name, dtype=None):
        a = jnp.stack([p[name] for p in layer_params], axis=0)
        return a.astype(dtype) if dtype is not None else a

    return {
        "ln1w": stack("ln1w"), "ln1b": stack("ln1b"),
        "wq": stack("wqt", bf16), "bq": stack("bq"),
        "wk": stack("wkt", bf16), "bk": stack("bk"),
        "wv": stack("wvt", bf16), "bv": stack("bv"),
        "wo": stack("wot", bf16), "bo": stack("bo"),
        "ln2w": stack("ln2w"), "ln2b": stack("ln2b"),
        "w1": stack("w1t", bf16), "b1": stack("b1"),
        "w2": stack("w2t", bf16), "b2": stack("b2"),
    }


# ----------------------------------------------------------------------------
# Pure-JAX reference (mirrors the PyTorch eager path; consumes the same
# bf16-rounded weights, upcast to f32, so the comparison isolates kernel error)
# ----------------------------------------------------------------------------
def ref_layer(x, mask, p, num_heads, eps):
    f32 = jnp.float32
    B, S, E = x.shape
    hd = E // num_heads
    scale = hd ** -0.5

    def ln(v, w, b):
        mu = v.mean(-1, keepdims=True)
        var = ((v - mu) ** 2).mean(-1, keepdims=True)
        return (v - mu) * lax.rsqrt(var + eps) * w + b

    wq, wk, wv = p["wq"].astype(f32), p["wk"].astype(f32), p["wv"].astype(f32)
    wo, w1, w2 = p["wo"].astype(f32), p["w1"].astype(f32), p["w2"].astype(f32)

    xn = ln(x, p["ln1w"][0], p["ln1b"][0])
    q = (xn @ wq + p["bq"][0]) * scale
    k = xn @ wk + p["bk"][0]
    v = xn @ wv + p["bv"][0]
    q = q.reshape(B, S, num_heads, hd).transpose(0, 2, 1, 3)
    k = k.reshape(B, S, num_heads, hd).transpose(0, 2, 1, 3)
    v = v.reshape(B, S, num_heads, hd).transpose(0, 2, 1, 3)
    s = jnp.einsum("bhqd,bhkd->bhqk", q, k) + mask[:, None]
    pw = jax.nn.softmax(s, axis=-1)
    ao = jnp.einsum("bhqk,bhkd->bhqd", pw, v).transpose(0, 2, 1, 3).reshape(B, S, E)
    ao = ao @ wo + p["bo"][0]
    h1 = x + ao
    hn = ln(h1, p["ln2w"][0], p["ln2b"][0])
    m = hn @ w1 + p["b1"][0]
    m = m * jax.nn.sigmoid(1.702 * m)
    m = m @ w2 + p["b2"][0]
    return h1 + m


def ref_encoder(x, mask, params, num_heads, eps=1e-5):
    L = params["wq"].shape[0]
    h = x
    for l in range(L):
        p_l = jax.tree_util.tree_map(lambda a: a[l], params)
        h = ref_layer(h, mask, p_l, num_heads, eps)
    return h


# ----------------------------------------------------------------------------
# Deterministic parameter construction (weights stored transposed: y = x @ W^T)
# ----------------------------------------------------------------------------
def make_layer_params(key, E, I):
    ks = jax.random.split(key, 6)
    std = 0.02
    return {
        "ln1w": jnp.ones((1, E), jnp.float32),
        "ln1b": jnp.zeros((1, E), jnp.float32),
        "wqt": jax.random.normal(ks[0], (E, E), jnp.float32) * std,
        "bq": jnp.zeros((1, E), jnp.float32),
        "wkt": jax.random.normal(ks[1], (E, E), jnp.float32) * std,
        "bk": jnp.zeros((1, E), jnp.float32),
        "wvt": jax.random.normal(ks[2], (E, E), jnp.float32) * std,
        "bv": jnp.zeros((1, E), jnp.float32),
        "wot": jax.random.normal(ks[3], (E, E), jnp.float32) * std,
        "bo": jnp.zeros((1, E), jnp.float32),
        "ln2w": jnp.ones((1, E), jnp.float32),
        "ln2b": jnp.zeros((1, E), jnp.float32),
        "w1t": jax.random.normal(ks[4], (E, I), jnp.float32) * std,
        "b1": jnp.zeros((1, I), jnp.float32),
        "w2t": jax.random.normal(ks[5], (I, E), jnp.float32) * std,
        "b2": jnp.zeros((1, E), jnp.float32),
    }


if __name__ == "__main__":
    # Small CLIP-like config (head_dim = 64 so head-pair slabs are 128 lanes)
    B, S, E = 2, 16, 256        # batch (even -> megacore-friendly), seq, hidden
    H = 4                       # num_attention_heads  (head_dim = 64)
    I = 1024                    # intermediate_size
    L = 2                       # num_hidden_layers
    EPS = 1e-5

    root = jax.random.PRNGKey(0)
    kx, *kl = jax.random.split(root, 1 + L)

    x = jax.random.normal(kx, (B, S, E), jnp.float32)

    # Combined additive mask (attention_mask + causal_attention_mask), shared
    # across the batch -> shape (1, S, S) with large negatives on masked slots.
    neg = jnp.float32(-1e9)
    causal = jnp.where(jnp.tril(jnp.ones((S, S), jnp.bool_)), 0.0, neg)
    mask = causal[None]                                  # (1, S, S)

    layer_params = [make_layer_params(k, E, I) for k in kl]
    params = stack_layer_params(layer_params)            # one-time bf16 cast + L-stack

    # mlp_chunk=512 exercises the chunked MLP fori_loop (I=1024 -> 2 chunks)
    out = clip_encoder(x, mask, params, num_heads=H, eps=EPS, mlp_chunk=512)
    out = jax.block_until_ready(out)

    ref = ref_encoder(x, mask, params, num_heads=H, eps=EPS)
    assert out.shape == (B, S, E)
    max_diff = jnp.max(jnp.abs(out - ref))
    # bf16 activation matmuls + approx reciprocal vs. f32 reference (same
    # bf16-rounded weights) -> relaxed tolerance.
    assert jnp.allclose(out, ref, atol=2e-2, rtol=2e-2), (
        f"max abs diff {max_diff}")

    print("KERNEL_OK")
</pallas_src>

<mosaic_0001>
module attributes {stable_mosaic.version = 11 : i64} {
  func.func @clip_layer_kernel(%arg0: i32, %arg1: i32, %arg2: memref<1x16x256xf32, #tpu.memory_space<vmem>>, %arg3: memref<1x16x16xf32, #tpu.memory_space<vmem>>, %arg4: memref<1x1x256xf32, #tpu.memory_space<vmem>>, %arg5: memref<1x1x256xf32, #tpu.memory_space<vmem>>, %arg6: memref<1x256x256xbf16, #tpu.memory_space<vmem>>, %arg7: memref<1x1x256xf32, #tpu.memory_space<vmem>>, %arg8: memref<1x256x256xbf16, #tpu.memory_space<vmem>>, %arg9: memref<1x1x256xf32, #tpu.memory_space<vmem>>, %arg10: memref<1x256x256xbf16, #tpu.memory_space<vmem>>, %arg11: memref<1x1x256xf32, #tpu.memory_space<vmem>>, %arg12: memref<1x256x256xbf16, #tpu.memory_space<vmem>>, %arg13: memref<1x1x256xf32, #tpu.memory_space<vmem>>, %arg14: memref<1x1x256xf32, #tpu.memory_space<vmem>>, %arg15: memref<1x1x256xf32, #tpu.memory_space<vmem>>, %arg16: memref<1x256x1024xbf16, #tpu.memory_space<vmem>>, %arg17: memref<1x1x1024xf32, #tpu.memory_space<vmem>>, %arg18: memref<1x1024x256xbf16, #tpu.memory_space<vmem>>, %arg19: memref<1x1x256xf32, #tpu.memory_space<vmem>>, %arg20: memref<1x16x256xf32, #tpu.memory_space<vmem>>, %arg21: memref<16x256xf32, #tpu.memory_space<vmem>>, %arg22: memref<16x256xbf16, #tpu.memory_space<vmem>>, %arg23: memref<16x256xbf16, #tpu.memory_space<vmem>>, %arg24: memref<16x256xbf16, #tpu.memory_space<vmem>>, %arg25: memref<16x256xbf16, #tpu.memory_space<vmem>>, %arg26: memref<16x256xf32, #tpu.memory_space<vmem>>) attributes {dimension_semantics = [#tpu.dimension_semantics<parallel>, #tpu.dimension_semantics<arbitrary>], iteration_bounds = array<i64: 2, 2>, scalar_prefetch = 0 : i64, scratch_operands = 6 : i64, tpu.core_type = #tpu.core_type<tc>, window_params = [{transform_indices = @transform_0, window_bounds = array<i64: 1, 16, 256>}, {pipeline_mode = #tpu.pipeline_mode<synchronous>, transform_indices = @transform_1, window_bounds = array<i64: 1, 16, 16>}, {transform_indices = @transform_2, window_bounds = array<i64: 1, 1, 256>}, {transform_indices = @transform_3, window_bounds = array<i64: 1, 1, 256>}, {transform_indices = @transform_4, window_bounds = array<i64: 1, 256, 256>}, {transform_indices = @transform_5, window_bounds = array<i64: 1, 1, 256>}, {transform_indices = @transform_6, window_bounds = array<i64: 1, 256, 256>}, {transform_indices = @transform_7, window_bounds = array<i64: 1, 1, 256>}, {transform_indices = @transform_8, window_bounds = array<i64: 1, 256, 256>}, {transform_indices = @transform_9, window_bounds = array<i64: 1, 1, 256>}, {transform_indices = @transform_10, window_bounds = array<i64: 1, 256, 256>}, {transform_indices = @transform_11, window_bounds = array<i64: 1, 1, 256>}, {transform_indices = @transform_12, window_bounds = array<i64: 1, 1, 256>}, {transform_indices = @transform_13, window_bounds = array<i64: 1, 1, 256>}, {transform_indices = @transform_14, window_bounds = array<i64: 1, 256, 1024>}, {transform_indices = @transform_15, window_bounds = array<i64: 1, 1, 1024>}, {transform_indices = @transform_16, window_bounds = array<i64: 1, 1024, 256>}, {transform_indices = @transform_17, window_bounds = array<i64: 1, 1, 256>}, {transform_indices = @transform_18, window_bounds = array<i64: 1, 16, 256>}]} {
    %c0_i32 = arith.constant 0 : i32
    %0 = arith.cmpi eq, %arg1, %c0_i32 : i32
    %1 = arith.extui %0 : i1 to i32
    %c0_i32_0 = arith.constant 0 : i32
    %2 = arith.cmpi ne, %1, %c0_i32_0 : i32
    scf.if %2 {
      %c0_82 = arith.constant 0 : index
      %c0_83 = arith.constant 0 : index
      %c0_84 = arith.constant 0 : index
      %112 = vector.load %arg2[%c0_82, %c0_83, %c0_84] : memref<1x16x256xf32, #tpu.memory_space<vmem>>, vector<1x16x256xf32>
      %113 = vector.shape_cast %112 : vector<1x16x256xf32> to vector<16x256xf32>
      %c0_85 = arith.constant 0 : index
      %c0_86 = arith.constant 0 : index
      %114 = vector.load %arg21[%c0_85, %c0_86] : memref<16x256xf32, #tpu.memory_space<vmem>>, vector<16x256xf32>
      tpu.vector_store %arg21[%c0_85, %c0_86], %113 {strides = array<i32>} : memref<16x256xf32, #tpu.memory_space<vmem>>, vector<16x256xf32>,
    } else {
    }
    %c0 = arith.constant 0 : index
    %c0_1 = arith.constant 0 : index
    %3 = vector.load %arg21[%c0, %c0_1] : memref<16x256xf32, #tpu.memory_space<vmem>>, vector<16x256xf32>
    %cst = arith.constant dense<0.000000e+00> : vector<16xf32>
    %4 = vector.multi_reduction <add>, %3, %cst [1] : vector<16x256xf32> to vector<16xf32>
    %5 = vector.shape_cast %4 : vector<16xf32> to vector<16x1xf32>
    %cst_2 = arith.constant 2.560000e+02 : f32
    %6 = vector.broadcast %cst_2 : f32 to vector<16x1xf32>
    %7 = arith.divf %5, %6 : vector<16x1xf32>
    %8 = vector.broadcast %7 : vector<16x1xf32> to vector<16x256xf32>
    %9 = arith.subf %3, %8 : vector<16x256xf32>
    %10 = arith.mulf %9, %9 : vector<16x256xf32>
    %cst_3 = arith.constant dense<0.000000e+00> : vector<16xf32>
    %11 = vector.multi_reduction <add>, %10, %cst_3 [1] : vector<16x256xf32> to vector<16xf32>
    %12 = vector.shape_cast %11 : vector<16xf32> to vector<16x1xf32>
    %cst_4 = arith.constant 2.560000e+02 : f32
    %13 = vector.broadcast %cst_4 : f32 to vector<16x1xf32>
    %14 = arith.divf %12, %13 : vector<16x1xf32>
    %15 = vector.broadcast %7 : vector<16x1xf32> to vector<16x256xf32>
    %16 = arith.subf %3, %15 : vector<16x256xf32>
    %cst_5 = arith.constant 9.99999974E-6 : f32
    %17 = vector.broadcast %cst_5 : f32 to vector<16x1xf32>
    %18 = arith.addf %14, %17 : vector<16x1xf32>
    %19 = math.rsqrt %18 : vector<16x1xf32>
    %20 = vector.broadcast %19 : vector<16x1xf32> to vector<16x256xf32>
    %21 = arith.mulf %16, %20 : vector<16x256xf32>
    %c0_6 = arith.constant 0 : index
    %c0_7 = arith.constant 0 : index
    %c0_8 = arith.constant 0 : index
    %22 = vector.load %arg4[%c0_6, %c0_7, %c0_8] : memref<1x1x256xf32, #tpu.memory_space<vmem>>, vector<1x1x256xf32>
    %23 = vector.shape_cast %22 : vector<1x1x256xf32> to vector<1x256xf32>
    %24 = vector.broadcast %23 : vector<1x256xf32> to vector<16x256xf32>
    %25 = arith.mulf %21, %24 : vector<16x256xf32>
    %c0_9 = arith.constant 0 : index
    %c0_10 = arith.constant 0 : index
    %c0_11 = arith.constant 0 : index
    %26 = vector.load %arg5[%c0_9, %c0_10, %c0_11] : memref<1x1x256xf32, #tpu.memory_space<vmem>>, vector<1x1x256xf32>
    %27 = vector.shape_cast %26 : vector<1x1x256xf32> to vector<1x256xf32>
    %28 = vector.broadcast %27 : vector<1x256xf32> to vector<16x256xf32>
    %29 = arith.addf %25, %28 : vector<16x256xf32>
    %30 = arith.truncf %29 : vector<16x256xf32> to vector<16x256xbf16>
    %c0_12 = arith.constant 0 : index
    %c0_13 = arith.constant 0 : index
    %c0_14 = arith.constant 0 : index
    %31 = vector.load %arg6[%c0_12, %c0_13, %c0_14] : memref<1x256x256xbf16, #tpu.memory_space<vmem>>, vector<1x256x256xbf16>
    %32 = vector.shape_cast %31 : vector<1x256x256xbf16> to vector<256x256xbf16>
    %cst_15 = arith.constant dense<0.000000e+00> : vector<16x256xf32>
    %33 = tpu.matmul %30, %32, %cst_15 {dimension_numbers = #tpu.dot_dimension_numbers<[1], [0], [0], [1], [0, 0, 1, 1], [], []>} : vector<16x256xbf16>, vector<256x256xbf16>, vector<16x256xf32> -> vector<16x256xf32>
    %c0_16 = arith.constant 0 : index
    %c0_17 = arith.constant 0 : index
    %c0_18 = arith.constant 0 : index
    %34 = vector.load %arg7[%c0_16, %c0_17, %c0_18] : memref<1x1x256xf32, #tpu.memory_space<vmem>>, vector<1x1x256xf32>
    %35 = vector.shape_cast %34 : vector<1x1x256xf32> to vector<1x256xf32>
    %36 = vector.broadcast %35 : vector<1x256xf32> to vector<16x256xf32>
    %37 = arith.addf %33, %36 : vector<16x256xf32>
    %cst_19 = arith.constant 1.250000e-01 : f32
    %38 = vector.broadcast %cst_19 : f32 to vector<16x256xf32>
    %39 = arith.mulf %37, %38 : vector<16x256xf32>
    %40 = arith.truncf %39 : vector<16x256xf32> to vector<16x256xbf16>
    %c0_20 = arith.constant 0 : index
    %c0_21 = arith.constant 0 : index
    %41 = vector.load %arg22[%c0_20, %c0_21] : memref<16x256xbf16, #tpu.memory_space<vmem>>, vector<16x256xbf16>
    tpu.vector_store %arg22[%c0_20, %c0_21], %40 {strides = array<i32>} : memref<16x256xbf16, #tpu.memory_space<vmem>>, vector<16x256xbf16>,
    %c0_22 = arith.constant 0 : index
    %c0_23 = arith.constant 0 : index
    %c0_24 = arith.constant 0 : index
    %42 = vector.load %arg8[%c0_22, %c0_23, %c0_24] : memref<1x256x256xbf16, #tpu.memory_space<vmem>>, vector<1x256x256xbf16>
    %43 = vector.shape_cast %42 : vector<1x256x256xbf16> to vector<256x256xbf16>
    %cst_25 = arith.constant dense<0.000000e+00> : vector<16x256xf32>
    %44 = tpu.matmul %30, %43, %cst_25 {dimension_numbers = #tpu.dot_dimension_numbers<[1], [0], [0], [1], [0, 0, 1, 1], [], []>} : vector<16x256xbf16>, vector<256x256xbf16>, vector<16x256xf32> -> vector<16x256xf32>
    %c0_26 = arith.constant 0 : index
    %c0_27 = arith.constant 0 : index
    %c0_28 = arith.constant 0 : index
    %45 = vector.load %arg9[%c0_26, %c0_27, %c0_28] : memref<1x1x256xf32, #tpu.memory_space<vmem>>, vector<1x1x256xf32>
    %46 = vector.shape_cast %45 : vector<1x1x256xf32> to vector<1x256xf32>
    %47 = vector.broadcast %46 : vector<1x256xf32> to vector<16x256xf32>
    %48 = arith.addf %44, %47 : vector<16x256xf32>
    %49 = arith.truncf %48 : vector<16x256xf32> to vector<16x256xbf16>
    %c0_29 = arith.constant 0 : index
    %c0_30 = arith.constant 0 : index
    %50 = vector.load %arg23[%c0_29, %c0_30] : memref<16x256xbf16, #tpu.memory_space<vmem>>, vector<16x256xbf16>
    tpu.vector_store %arg23[%c0_29, %c0_30], %49 {strides = array<i32>} : memref<16x256xbf16, #tpu.memory_space<vmem>>, vector<16x256xbf16>,
    %c0_31 = arith.constant 0 : index
    %c0_32 = arith.constant 0 : index
    %c0_33 = arith.constant 0 : index
    %51 = vector.load %arg10[%c0_31, %c0_32, %c0_33] : memref<1x256x256xbf16, #tpu.memory_space<vmem>>, vector<1x256x256xbf16>
    %52 = vector.shape_cast %51 : vector<1x256x256xbf16> to vector<256x256xbf16>
    %cst_34 = arith.constant dense<0.000000e+00> : vector<16x256xf32>
    %53 = tpu.matmul %30, %52, %cst_34 {dimension_numbers = #tpu.dot_dimension_numbers<[1], [0], [0], [1], [0, 0, 1, 1], [], []>} : vector<16x256xbf16>, vector<256x256xbf16>, vector<16x256xf32> -> vector<16x256xf32>
    %c0_35 = arith.constant 0 : index
    %c0_36 = arith.constant 0 : index
    %c0_37 = arith.constant 0 : index
    %54 = vector.load %arg11[%c0_35, %c0_36, %c0_37] : memref<1x1x256xf32, #tpu.memory_space<vmem>>, vector<1x1x256xf32>
    %55 = vector.shape_cast %54 : vector<1x1x256xf32> to vector<1x256xf32>
    %56 = vector.broadcast %55 : vector<1x256xf32> to vector<16x256xf32>
    %57 = arith.addf %53, %56 : vector<16x256xf32>
    %58 = arith.truncf %57 : vector<16x256xf32> to vector<16x256xbf16>
    %c0_38 = arith.constant 0 : index
    %c0_39 = arith.constant 0 : index
    %59 = vector.load %arg24[%c0_38, %c0_39] : memref<16x256xbf16, #tpu.memory_space<vmem>>, vector<16x256xbf16>
    tpu.vector_store %arg24[%c0_38, %c0_39], %58 {strides = array<i32>} : memref<16x256xbf16, #tpu.memory_space<vmem>>, vector<16x256xbf16>,
    %c0_40 = arith.constant 0 : index
    %c0_41 = arith.constant 0 : index
    %c0_42 = arith.constant 0 : index
    %60 = vector.load %arg3[%c0_40, %c0_41, %c0_42] : memref<1x16x16xf32, #tpu.memory_space<vmem>>, vector<1x16x16xf32>
    %61 = vector.shape_cast %60 : vector<1x16x16xf32> to vector<16x16xf32>
    %c0_i32_43 = arith.constant 0 : i32
    %c2_i32 = arith.constant 2 : i32
    %62 = arith.addi %c0_i32_43, %c2_i32 : i32
    %c1_i32 = arith.constant 1 : i32
    scf.for %arg27 = %c0_i32_43 to %62 step %c1_i32  : i32 {
      %c128_i32 = arith.constant 128 : i32
      %112 = arith.muli %arg27, %c128_i32 : i32
      %113 = tpu.assume_multiple %112, 128 : i32
      %c0_82 = arith.constant 0 : index
      %114 = arith.index_cast %113 : i32 to index
      %115 = vector.load %arg22[%c0_82, %114] : memref<16x256xbf16, #tpu.memory_space<vmem>>, vector<16x128xbf16>
      %c0_83 = arith.constant 0 : index
      %116 = arith.index_cast %113 : i32 to index
      %117 = vector.load %arg23[%c0_83, %116] : memref<16x256xbf16, #tpu.memory_space<vmem>>, vector<16x128xbf16>
      %c0_84 = arith.constant 0 : index
      %118 = arith.index_cast %113 : i32 to index
      %119 = vector.load %arg24[%c0_84, %118] : memref<16x256xbf16, #tpu.memory_space<vmem>>, vector<16x128xbf16>
      %120 = vector.extract_strided_slice %115 {offsets = [0, 0], sizes = [16, 64], strides = [1, 1]} : vector<16x128xbf16> to vector<16x64xbf16>
      %121 = vector.extract_strided_slice %117 {offsets = [0, 0], sizes = [16, 64], strides = [1, 1]} : vector<16x128xbf16> to vector<16x64xbf16>
      %122 = vector.extract_strided_slice %119 {offsets = [0, 0], sizes = [16, 64], strides = [1, 1]} : vector<16x128xbf16> to vector<16x64xbf16>
      %cst_85 = arith.constant dense<0.000000e+00> : vector<16x16xf32>
      %123 = tpu.matmul %120, %121, %cst_85 {dimension_numbers = #tpu.dot_dimension_numbers<[1], [1], [0], [0], [0, 0, 1, 0], [], []>} : vector<16x64xbf16>, vector<16x64xbf16>, vector<16x16xf32> -> vector<16x16xf32>
      %124 = arith.addf %123, %61 : vector<16x16xf32>
      %cst_86 = arith.constant dense<0xFF800000> : vector<16xf32>
      %125 = vector.multi_reduction <maximumf>, %124, %cst_86 [1] : vector<16x16xf32> to vector<16xf32>
      %126 = vector.shape_cast %125 : vector<16xf32> to vector<16x1xf32>
      %127 = vector.broadcast %126 : vector<16x1xf32> to vector<16x16xf32>
      %128 = arith.subf %124, %127 : vector<16x16xf32>
      %129 = math.exp %128 : vector<16x16xf32>
      %cst_87 = arith.constant dense<0.000000e+00> : vector<16xf32>
      %130 = vector.multi_reduction <add>, %129, %cst_87 [1] : vector<16x16xf32> to vector<16xf32>
      %131 = vector.shape_cast %130 : vector<16xf32> to vector<16x1xf32>
      %132 = tpu.reciprocal %131 {approx = true} : vector<16x1xf32> -> vector<16x1xf32>
      %133 = vector.broadcast %132 : vector<16x1xf32> to vector<16x16xf32>
      %134 = arith.mulf %129, %133 : vector<16x16xf32>
      %135 = arith.truncf %134 : vector<16x16xf32> to vector<16x16xbf16>
      %cst_88 = arith.constant dense<0.000000e+00> : vector<16x64xf32>
      %136 = tpu.matmul %135, %122, %cst_88 {dimension_numbers = #tpu.dot_dimension_numbers<[1], [0], [0], [1], [0, 0, 1, 1], [], []>} : vector<16x16xbf16>, vector<16x64xbf16>, vector<16x64xf32> -> vector<16x64xf32>
      %137 = arith.truncf %136 : vector<16x64xf32> to vector<16x64xbf16>
      %138 = vector.extract_strided_slice %115 {offsets = [0, 64], sizes = [16, 64], strides = [1, 1]} : vector<16x128xbf16> to vector<16x64xbf16>
      %139 = vector.extract_strided_slice %117 {offsets = [0, 64], sizes = [16, 64], strides = [1, 1]} : vector<16x128xbf16> to vector<16x64xbf16>
      %140 = vector.extract_strided_slice %119 {offsets = [0, 64], sizes = [16, 64], strides = [1, 1]} : vector<16x128xbf16> to vector<16x64xbf16>
      %cst_89 = arith.constant dense<0.000000e+00> : vector<16x16xf32>
      %141 = tpu.matmul %138, %139, %cst_89 {dimension_numbers = #tpu.dot_dimension_numbers<[1], [1], [0], [0], [0, 0, 1, 0], [], []>} : vector<16x64xbf16>, vector<16x64xbf16>, vector<16x16xf32> -> vector<16x16xf32>
      %142 = arith.addf %141, %61 : vector<16x16xf32>
      %cst_90 = arith.constant dense<0xFF800000> : vector<16xf32>
      %143 = vector.multi_reduction <maximumf>, %142, %cst_90 [1] : vector<16x16xf32> to vector<16xf32>
      %144 = vector.shape_cast %143 : vector<16xf32> to vector<16x1xf32>
      %145 = vector.broadcast %144 : vector<16x1xf32> to vector<16x16xf32>
      %146 = arith.subf %142, %145 : vector<16x16xf32>
      %147 = math.exp %146 : vector<16x16xf32>
      %cst_91 = arith.constant dense<0.000000e+00> : vector<16xf32>
      %148 = vector.multi_reduction <add>, %147, %cst_91 [1] : vector<16x16xf32> to vector<16xf32>
      %149 = vector.shape_cast %148 : vector<16xf32> to vector<16x1xf32>
      %150 = tpu.reciprocal %149 {approx = true} : vector<16x1xf32> -> vector<16x1xf32>
      %151 = vector.broadcast %150 : vector<16x1xf32> to vector<16x16xf32>
      %152 = arith.mulf %147, %151 : vector<16x16xf32>
      %153 = arith.truncf %152 : vector<16x16xf32> to vector<16x16xbf16>
      %cst_92 = arith.constant dense<0.000000e+00> : vector<16x64xf32>
      %154 = tpu.matmul %153, %140, %cst_92 {dimension_numbers = #tpu.dot_dimension_numbers<[1], [0], [0], [1], [0, 0, 1, 1], [], []>} : vector<16x16xbf16>, vector<16x64xbf16>, vector<16x64xf32> -> vector<16x64xf32>
      %155 = arith.truncf %154 : vector<16x64xf32> to vector<16x64xbf16>
      %156 = tpu.concatenate %137, %155 in 1 : vector<16x64xbf16>, vector<16x64xbf16> -> vector<16x128xbf16>
      %c0_93 = arith.constant 0 : index
      %157 = arith.index_cast %113 : i32 to index
      %158 = vector.load %arg25[%c0_93, %157] : memref<16x256xbf16, #tpu.memory_space<vmem>>, vector<16x128xbf16>
      tpu.vector_store %arg25[%c0_93, %157], %156 {strides = array<i32>} : memref<16x256xbf16, #tpu.memory_space<vmem>>, vector<16x128xbf16>,
    }
    %c2_i32_44 = arith.constant 2 : i32
    %c0_45 = arith.constant 0 : index
    %c0_46 = arith.constant 0 : index
    %63 = vector.load %arg25[%c0_45, %c0_46] : memref<16x256xbf16, #tpu.memory_space<vmem>>, vector<16x256xbf16>
    %c0_47 = arith.constant 0 : index
    %c0_48 = arith.constant 0 : index
    %c0_49 = arith.constant 0 : index
    %64 = vector.load %arg12[%c0_47, %c0_48, %c0_49] : memref<1x256x256xbf16, #tpu.memory_space<vmem>>, vector<1x256x256xbf16>
    %65 = vector.shape_cast %64 : vector<1x256x256xbf16> to vector<256x256xbf16>
    %cst_50 = arith.constant dense<0.000000e+00> : vector<16x256xf32>
    %66 = tpu.matmul %63, %65, %cst_50 {dimension_numbers = #tpu.dot_dimension_numbers<[1], [0], [0], [1], [0, 0, 1, 1], [], []>} : vector<16x256xbf16>, vector<256x256xbf16>, vector<16x256xf32> -> vector<16x256xf32>
    %c0_51 = arith.constant 0 : index
    %c0_52 = arith.constant 0 : index
    %c0_53 = arith.constant 0 : index
    %67 = vector.load %arg13[%c0_51, %c0_52, %c0_53] : memref<1x1x256xf32, #tpu.memory_space<vmem>>, vector<1x1x256xf32>
    %68 = vector.shape_cast %67 : vector<1x1x256xf32> to vector<1x256xf32>
    %69 = vector.broadcast %68 : vector<1x256xf32> to vector<16x256xf32>
    %70 = arith.addf %66, %69 : vector<16x256xf32>
    %71 = arith.addf %3, %70 : vector<16x256xf32>
    %cst_54 = arith.constant dense<0.000000e+00> : vector<16xf32>
    %72 = vector.multi_reduction <add>, %71, %cst_54 [1] : vector<16x256xf32> to vector<16xf32>
    %73 = vector.shape_cast %72 : vector<16xf32> to vector<16x1xf32>
    %cst_55 = arith.constant 2.560000e+02 : f32
    %74 = vector.broadcast %cst_55 : f32 to vector<16x1xf32>
    %75 = arith.divf %73, %74 : vector<16x1xf32>
    %76 = vector.broadcast %75 : vector<16x1xf32> to vector<16x256xf32>
    %77 = arith.subf %71, %76 : vector<16x256xf32>
    %78 = arith.mulf %77, %77 : vector<16x256xf32>
    %cst_56 = arith.constant dense<0.000000e+00> : vector<16xf32>
    %79 = vector.multi_reduction <add>, %78, %cst_56 [1] : vector<16x256xf32> to vector<16xf32>
    %80 = vector.shape_cast %79 : vector<16xf32> to vector<16x1xf32>
    %cst_57 = arith.constant 2.560000e+02 : f32
    %81 = vector.broadcast %cst_57 : f32 to vector<16x1xf32>
    %82 = arith.divf %80, %81 : vector<16x1xf32>
    %83 = vector.broadcast %75 : vector<16x1xf32> to vector<16x256xf32>
    %84 = arith.subf %71, %83 : vector<16x256xf32>
    %cst_58 = arith.constant 9.99999974E-6 : f32
    %85 = vector.broadcast %cst_58 : f32 to vector<16x1xf32>
    %86 = arith.addf %82, %85 : vector<16x1xf32>
    %87 = math.rsqrt %86 : vector<16x1xf32>
    %88 = vector.broadcast %87 : vector<16x1xf32> to vector<16x256xf32>
    %89 = arith.mulf %84, %88 : vector<16x256xf32>
    %c0_59 = arith.constant 0 : index
    %c0_60 = arith.constant 0 : index
    %c0_61 = arith.constant 0 : index
    %90 = vector.load %arg14[%c0_59, %c0_60, %c0_61] : memref<1x1x256xf32, #tpu.memory_space<vmem>>, vector<1x1x256xf32>
    %91 = vector.shape_cast %90 : vector<1x1x256xf32> to vector<1x256xf32>
    %92 = vector.broadcast %91 : vector<1x256xf32> to vector<16x256xf32>
    %93 = arith.mulf %89, %92 : vector<16x256xf32>
    %c0_62 = arith.constant 0 : index
    %c0_63 = arith.constant 0 : index
    %c0_64 = arith.constant 0 : index
    %94 = vector.load %arg15[%c0_62, %c0_63, %c0_64] : memref<1x1x256xf32, #tpu.memory_space<vmem>>, vector<1x1x256xf32>
    %95 = vector.shape_cast %94 : vector<1x1x256xf32> to vector<1x256xf32>
    %96 = vector.broadcast %95 : vector<1x256xf32> to vector<16x256xf32>
    %97 = arith.addf %93, %96 : vector<16x256xf32>
    %98 = arith.truncf %97 : vector<16x256xf32> to vector<16x256xbf16>
    %cst_65 = arith.constant 0.000000e+00 : f32
    %99 = vector.broadcast %cst_65 : f32 to vector<16x256xf32>
    %c0_66 = arith.constant 0 : index
    %c0_67 = arith.constant 0 : index
    %100 = vector.load %arg26[%c0_66, %c0_67] : memref<16x256xf32, #tpu.memory_space<vmem>>, vector<16x256xf32>
    tpu.vector_store %arg26[%c0_66, %c0_67], %99 {strides = array<i32>} : memref<16x256xf32, #tpu.memory_space<vmem>>, vector<16x256xf32>,
    %c0_i32_68 = arith.constant 0 : i32
    %c2_i32_69 = arith.constant 2 : i32
    %101 = arith.addi %c0_i32_68, %c2_i32_69 : i32
    %c1_i32_70 = arith.constant 1 : i32
    scf.for %arg27 = %c0_i32_68 to %101 step %c1_i32_70  : i32 {
      %c512_i32 = arith.constant 512 : i32
      %112 = arith.muli %arg27, %c512_i32 : i32
      %113 = tpu.assume_multiple %112, 512 : i32
      %c0_82 = arith.constant 0 : index
      %c0_83 = arith.constant 0 : index
      %114 = arith.index_cast %113 : i32 to index
      %115 = vector.load %arg16[%c0_82, %c0_83, %114] : memref<1x256x1024xbf16, #tpu.memory_space<vmem>>, vector<1x256x512xbf16>
      %116 = vector.shape_cast %115 : vector<1x256x512xbf16> to vector<256x512xbf16>
      %cst_84 = arith.constant dense<0.000000e+00> : vector<16x512xf32>
      %117 = tpu.matmul %98, %116, %cst_84 {dimension_numbers = #tpu.dot_dimension_numbers<[1], [0], [0], [1], [0, 0, 1, 1], [], []>} : vector<16x256xbf16>, vector<256x512xbf16>, vector<16x512xf32> -> vector<16x512xf32>
      %c0_85 = arith.constant 0 : index
      %c0_86 = arith.constant 0 : index
      %118 = arith.index_cast %113 : i32 to index
      %119 = vector.load %arg17[%c0_85, %c0_86, %118] : memref<1x1x1024xf32, #tpu.memory_space<vmem>>, vector<1x1x512xf32>
      %120 = vector.shape_cast %119 : vector<1x1x512xf32> to vector<1x512xf32>
      %121 = vector.broadcast %120 : vector<1x512xf32> to vector<16x512xf32>
      %122 = arith.addf %117, %121 : vector<16x512xf32>
      %cst_87 = arith.constant 1.702000e+00 : f32
      %123 = vector.broadcast %cst_87 : f32 to vector<16x512xf32>
      %124 = arith.mulf %123, %122 : vector<16x512xf32>
      %125 = arith.negf %124 : vector<16x512xf32>
      %126 = math.exp %125 : vector<16x512xf32>
      %cst_88 = arith.constant 1.000000e+00 : f32
      %127 = vector.broadcast %cst_88 : f32 to vector<16x512xf32>
      %128 = arith.addf %127, %126 : vector<16x512xf32>
      %129 = arith.divf %127, %128 : vector<16x512xf32>
      %130 = arith.mulf %122, %129 : vector<16x512xf32>
      %c0_89 = arith.constant 0 : index
      %c0_90 = arith.constant 0 : index
      %131 = vector.load %arg26[%c0_89, %c0_90] : memref<16x256xf32, #tpu.memory_space<vmem>>, vector<16x256xf32>
      %132 = arith.truncf %130 : vector<16x512xf32> to vector<16x512xbf16>
      %c0_91 = arith.constant 0 : index
      %133 = arith.index_cast %113 : i32 to index
      %c0_92 = arith.constant 0 : index
      %134 = vector.load %arg18[%c0_91, %133, %c0_92] : memref<1x1024x256xbf16, #tpu.memory_space<vmem>>, vector<1x512x256xbf16>
      %135 = vector.shape_cast %134 : vector<1x512x256xbf16> to vector<512x256xbf16>
      %cst_93 = arith.constant dense<0.000000e+00> : vector<16x256xf32>
      %136 = tpu.matmul %132, %135, %cst_93 {dimension_numbers = #tpu.dot_dimension_numbers<[1], [0], [0], [1], [0, 0, 1, 1], [], []>} : vector<16x512xbf16>, vector<512x256xbf16>, vector<16x256xf32> -> vector<16x256xf32>
      %137 = arith.addf %131, %136 : vector<16x256xf32>
      %c0_94 = arith.constant 0 : index
      %c0_95 = arith.constant 0 : index
      %138 = vector.load %arg26[%c0_94, %c0_95] : memref<16x256xf32, #tpu.memory_space<vmem>>, vector<16x256xf32>
      tpu.vector_store %arg26[%c0_94, %c0_95], %137 {strides = array<i32>} : memref<16x256xf32, #tpu.memory_space<vmem>>, vector<16x256xf32>,
    }
    %c2_i32_71 = arith.constant 2 : i32
    %c0_72 = arith.constant 0 : index
    %c0_73 = arith.constant 0 : index
    %102 = vector.load %arg26[%c0_72, %c0_73] : memref<16x256xf32, #tpu.memory_space<vmem>>, vector<16x256xf32>
    %103 = arith.addf %71, %102 : vector<16x256xf32>
    %c0_74 = arith.constant 0 : index
    %c0_75 = arith.constant 0 : index
    %c0_76 = arith.constant 0 : index
    %104 = vector.load %arg19[%c0_74, %c0_75, %c0_76] : memref<1x1x256xf32, #tpu.memory_space<vmem>>, vector<1x1x256xf32>
    %105 = vector.shape_cast %104 : vector<1x1x256xf32> to vector<1x256xf32>
    %106 = vector.broadcast %105 : vector<1x256xf32> to vector<16x256xf32>
    %107 = arith.addf %103, %106 : vector<16x256xf32>
    %c0_77 = arith.constant 0 : index
    %c0_78 = arith.constant 0 : index
    %108 = vector.load %arg21[%c0_77, %c0_78] : memref<16x256xf32, #tpu.memory_space<vmem>>, vector<16x256xf32>
    tpu.vector_store %arg21[%c0_77, %c0_78], %107 {strides = array<i32>} : memref<16x256xf32, #tpu.memory_space<vmem>>, vector<16x256xf32>,
    %c0_79 = arith.constant 0 : index
    %c0_80 = arith.constant 0 : index
    %c0_81 = arith.constant 0 : index
    %109 = vector.load %arg20[%c0_79, %c0_80, %c0_81] : memref<1x16x256xf32, #tpu.memory_space<vmem>>, vector<1x16x256xf32>
    %110 = vector.shape_cast %109 : vector<1x16x256xf32> to vector<16x256xf32>
    %111 = vector.shape_cast %107 : vector<16x256xf32> to vector<1x16x256xf32>
    tpu.vector_store %arg20[%c0_79, %c0_80, %c0_81], %111 {strides = array<i32>} : memref<1x16x256xf32, #tpu.memory_space<vmem>>, vector<1x16x256xf32>,
    return
  }
  func.func @transform_0(%arg0: i32, %arg1: i32) -> (i32, i32, i32) {
    %c0_i32 = arith.constant 0 : i32
    %c0_i32_0 = arith.constant 0 : i32
    %c0_i32_1 = arith.constant 0 : i32
    return %arg0, %c0_i32, %c0_i32_0 : i32, i32, i32
  }
  func.func @transform_1(%arg0: i32, %arg1: i32) -> (i32, i32, i32) {
    %c0_i32 = arith.constant 0 : i32
    %c0_i32_0 = arith.constant 0 : i32
    %c0_i32_1 = arith.constant 0 : i32
    %c0_i32_2 = arith.constant 0 : i32
    return %c0_i32, %c0_i32_0, %c0_i32_1 : i32, i32, i32
  }
  func.func @transform_2(%arg0: i32, %arg1: i32) -> (i32, i32, i32) {
    %c0_i32 = arith.constant 0 : i32
    %c0_i32_0 = arith.constant 0 : i32
    %c0_i32_1 = arith.constant 0 : i32
    return %arg1, %c0_i32, %c0_i32_0 : i32, i32, i32
  }
  func.func @transform_3(%arg0: i32, %arg1: i32) -> (i32, i32, i32) {
    %c0_i32 = arith.constant 0 : i32
    %c0_i32_0 = arith.constant 0 : i32
    %c0_i32_1 = arith.constant 0 : i32
    return %arg1, %c0_i32, %c0_i32_0 : i32, i32, i32
  }
  func.func @transform_4(%arg0: i32, %arg1: i32) -> (i32, i32, i32) {
    %c0_i32 = arith.constant 0 : i32
    %c0_i32_0 = arith.constant 0 : i32
    %c0_i32_1 = arith.constant 0 : i32
    return %arg1, %c0_i32, %c0_i32_0 : i32, i32, i32
  }
  func.func @transform_5(%arg0: i32, %arg1: i32) -> (i32, i32, i32) {
    %c0_i32 = arith.constant 0 : i32
    %c0_i32_0 = arith.constant 0 : i32
    %c0_i32_1 = arith.constant 0 : i32
    return %arg1, %c0_i32, %c0_i32_0 : i32, i32, i32
  }
  func.func @transform_6(%arg0: i32, %arg1: i32) -> (i32, i32, i32) {
    %c0_i32 = arith.constant 0 : i32
    %c0_i32_0 = arith.constant 0 : i32
    %c0_i32_1 = arith.constant 0 : i32
    return %arg1, %c0_i32, %c0_i32_0 : i32, i32, i32
  }
  func.func @transform_7(%arg0: i32, %arg1: i32) -> (i32, i32, i32) {
    %c0_i32 = arith.constant 0 : i32
    %c0_i32_0 = arith.constant 0 : i32
    %c0_i32_1 = arith.constant 0 : i32
    return %arg1, %c0_i32, %c0_i32_0 : i32, i32, i32
  }
  func.func @transform_8(%arg0: i32, %arg1: i32) -> (i32, i32, i32) {
    %c0_i32 = arith.constant 0 : i32
    %c0_i32_0 = arith.constant 0 : i32
    %c0_i32_1 = arith.constant 0 : i32
    return %arg1, %c0_i32, %c0_i32_0 : i32, i32, i32
  }
  func.func @transform_9(%arg0: i32, %arg1: i32) -> (i32, i32, i32) {
    %c0_i32 = arith.constant 0 : i32
    %c0_i32_0 = arith.constant 0 : i32
    %c0_i32_1 = arith.constant 0 : i32
    return %arg1, %c0_i32, %c0_i32_0 : i32, i32, i32
  }
  func.func @transform_10(%arg0: i32, %arg1: i32) -> (i32, i32, i32) {
    %c0_i32 = arith.constant 0 : i32
    %c0_i32_0 = arith.constant 0 : i32
    %c0_i32_1 = arith.constant 0 : i32
    return %arg1, %c0_i32, %c0_i32_0 : i32, i32, i32
  }
  func.func @transform_11(%arg0: i32, %arg1: i32) -> (i32, i32, i32) {
    %c0_i32 = arith.constant 0 : i32
    %c0_i32_0 = arith.constant 0 : i32
    %c0_i32_1 = arith.constant 0 : i32
    return %arg1, %c0_i32, %c0_i32_0 : i32, i32, i32
  }
  func.func @transform_12(%arg0: i32, %arg1: i32) -> (i32, i32, i32) {
    %c0_i32 = arith.constant 0 : i32
    %c0_i32_0 = arith.constant 0 : i32
    %c0_i32_1 = arith.constant 0 : i32
    return %arg1, %c0_i32, %c0_i32_0 : i32, i32, i32
  }
  func.func @transform_13(%arg0: i32, %arg1: i32) -> (i32, i32, i32) {
    %c0_i32 = arith.constant 0 : i32
    %c0_i32_0 = arith.constant 0 : i32
    %c0_i32_1 = arith.constant 0 : i32
    return %arg1, %c0_i32, %c0_i32_0 : i32, i32, i32
  }
  func.func @transform_14(%arg0: i32, %arg1: i32) -> (i32, i32, i32) {
    %c0_i32 = arith.constant 0 : i32
    %c0_i32_0 = arith.constant 0 : i32
    %c0_i32_1 = arith.constant 0 : i32
    return %arg1, %c0_i32, %c0_i32_0 : i32, i32, i32
  }
  func.func @transform_15(%arg0: i32, %arg1: i32) -> (i32, i32, i32) {
    %c0_i32 = arith.constant 0 : i32
    %c0_i32_0 = arith.constant 0 : i32
    %c0_i32_1 = arith.constant 0 : i32
    return %arg1, %c0_i32, %c0_i32_0 : i32, i32, i32
  }
  func.func @transform_16(%arg0: i32, %arg1: i32) -> (i32, i32, i32) {
    %c0_i32 = arith.constant 0 : i32
    %c0_i32_0 = arith.constant 0 : i32
    %c0_i32_1 = arith.constant 0 : i32
    return %arg1, %c0_i32, %c0_i32_0 : i32, i32, i32
  }
  func.func @transform_17(%arg0: i32, %arg1: i32) -> (i32, i32, i32) {
    %c0_i32 = arith.constant 0 : i32
    %c0_i32_0 = arith.constant 0 : i32
    %c0_i32_1 = arith.constant 0 : i32
    return %arg1, %c0_i32, %c0_i32_0 : i32, i32, i32
  }
  func.func @transform_18(%arg0: i32, %arg1: i32) -> (i32, i32, i32) {
    %c0_i32 = arith.constant 0 : i32
    %c0_i32_0 = arith.constant 0 : i32
    %c0_i32_1 = arith.constant 0 : i32
    return %arg0, %c0_i32, %c0_i32_0 : i32, i32, i32
  }
}

</mosaic_0001>

<bundles_post_ra>
// kernel: tpu_custom_call.1
= control target key start
LH: loop header
LB: loop body
LE: loop exit
PB: predicated region body
PF: predicated region fallthrough
CT: control target
= control target key end

     0   :  { %s7151_s0 = inlined_call_operand.hbm [shape: f32[2,16,256], index: 0, kind: input, shape index: {}]   ;;  %s7152_s1 = inlined_call_operand.hbm [shape: f32[1,16,16], index: 1, kind: input, shape index: {}]   ;;  %s7153_s2 = inlined_call_operand.hbm [shape: f32[2,1,256], index: 2, kind: input, shape index: {}]   ;;  %s7154_s3 = inlined_call_operand.hbm [shape: f32[2,1,256], index: 3, kind: input, shape index: {}]   ;;  %s7155_s4 = inlined_call_operand.hbm [shape: bf16[2,256,256], index: 4, kind: input, shape index: {}]   ;;  %s7156_s5 = inlined_call_operand.hbm [shape: f32[2,1,256], index: 5, kind: input, shape index: {}]   ;;  %s7157_s6 = inlined_call_operand.hbm [shape: bf16[2,256,256], index: 6, kind: input, shape index: {}]   ;;  %s7158_s7 = inlined_call_operand.hbm [shape: f32[2,1,256], index: 7, kind: input, shape index: {}]   ;;  %s7159_s8 = inlined_call_operand.hbm [shape: bf16[2,256,256], index: 8, kind: input, shape index: {}]   ;;  %s7160_s9 = inlined_call_operand.hbm [shape: f32[2,1,256], index: 9, kind: input, shape index: {}]   ;;  %s7161_s10 = inlined_call_operand.hbm [shape: bf16[2,256,256], index: 10, kind: input, shape index: {}]   ;;  %s7162_s11 = inlined_call_operand.hbm [shape: f32[2,1,256], index: 11, kind: input, shape index: {}]   ;;  %s7163_s12 = inlined_call_operand.hbm [shape: f32[2,1,256], index: 12, kind: input, shape index: {}]   ;;  %s7164_s13 = inlined_call_operand.hbm [shape: f32[2,1,256], index: 13, kind: input, shape index: {}]   ;;  %s7165_s14 = inlined_call_operand.hbm [shape: bf16[2,256,1024], index: 14, kind: input, shape index: {}]   ;;  %s7166_s15 = inlined_call_operand.hbm [shape: f32[2,1,1024], index: 15, kind: input, shape index: {}]   ;;  %s7167_s16 = inlined_call_operand.hbm [shape: bf16[2,1024,256], index: 16, kind: input, shape index: {}]   ;;  %s7168_s17 = inlined_call_operand.hbm [shape: f32[2,1,256], index: 17, kind: input, shape index: {}]   ;;  %s7169_s18 = inlined_call_operand.hbm [shape: f32[2,16,256], index: 18, kind: output, shape index: {}]  }
   0x1   :  { %7217 = sst [smem:[#allocation51_spill]] %s7151_s0 }
   0x2   :  { %7218 = sst [smem:[#allocation52_spill]] %s7152_s1 }
   0x3   :  { %7219 = sst [smem:[#allocation53_spill]] %s7153_s2 }
   0x4   :  { %7220 = sst [smem:[#allocation54_spill]] %s7154_s3 }
   0x5   :  { %7221 = sst [smem:[#allocation55_spill]] %s7155_s4 }
   0x6   :  { %7222 = sst [smem:[#allocation56_spill]] %s7156_s5 }
   0x7   :  { %7223 = sst [smem:[#allocation57_spill]] %s7157_s6 }
   0x8   :  { %7224 = sst [smem:[#allocation58_spill]] %s7158_s7 }
   0x9   :  { %7225 = sst [smem:[#allocation59_spill]] %s7159_s8 }
   0xa   :  { %7226 = sst [smem:[#allocation60_spill]] %s7160_s9 }
   0xb   :  { %7227 = sst [smem:[#allocation61_spill]] %s7163_s12 }
   0xc   :  { %7228 = sst [smem:[#allocation62_spill]] %s7164_s13 }
   0xd   :  { %7229 = sst [smem:[#allocation63_spill]] %s7165_s14 }
   0xe   :  { %7230 = sst [smem:[#allocation64_spill]] %s7166_s15 }
   0xf   :  { %7231 = sst [smem:[#allocation65_spill]] %s7167_s16 }
  0x10   :  { %7232 = sst [smem:[#allocation66_spill]] %s7168_s17 }
  0x11   :  { %7233 = sst [smem:[#allocation67_spill]] %s7169_s18 }
  0x12   :  { %23 = vsyncpa [#allocation9], 0 }
  0x13   :  { %25 = vsyncpa [#allocation9 + $0x1], 0 }
  0x14   :  { %26 = vsyncpa [#allocation12], 0 }
  0x15   :  { %27 = vsyncpa [#allocation10], 0 }
  0x16   :  { %29 = vsyncpa [#allocation10 + $0x1], 0  ;;  %s5879_s27 = smov 0   ;;  %s5881_s28 = smov 0  }
  0x17   :  { %s5883_s29 = smov 0   ;;  %s5885_s30 = smov 0  }
  0x18   :  { %s5887_s0 = smov 0   ;;  %s5889_s19 = smov 0  }
  0x19   :  { %s5891_s1 = smov 0   ;;  %s5893_s20 = smov 0  }
  0x1a   :  { %s5895_s21 = smov 0   ;;  %s5897_s22 = smov 0  }
  0x1b   :  { %s5899_s2 = smov 0  }
  0x1c LB: > { %7234 = sst [smem:[#allocation34_spill]] %s5705_s28  ;;  %s5935_s23 = sadd.s32 4294967295, %s5741_s2   ;;  %s5741_s2 = sphi %s5899_s2, %s35_s2   ;;  %s5737_s22 = sphi %s5897_s22, %s7313_s22   ;;  %s5733_s21 = sphi %s5895_s21, %s7315_s21   ;;  %s5729_s20 = sphi %s5893_s20, %s7311_s20   ;;  %s5725_s1 = sphi %s5891_s1, %s7314_s1   ;;  %s5721_s19 = sphi %s5889_s19, %s7310_s19   ;;  %s5717_s0 = sphi %s5887_s0, %s7309_s0   ;;  %s5713_s30 = sphi %s5885_s30, %s7308_s30   ;;  %s5709_s29 = sphi %s5883_s29, %s7307_s29   ;;  %s5705_s28 = sphi %s5881_s28, %s7306_s28   ;;  %s5701_s27 = sphi %s5879_s27, %s7305_s27  }
  0x1d   : > { %7235 = sst [smem:[#allocation35_spill]] %s5709_s29  ;;  %s4172_s24 = sadd.s32 4294967294, %s5741_s2  }
  0x1e   : > { %7236 = sst [smem:[#allocation36_spill]] %s5713_s30  ;;  %s44_s25 = sadd.s32 1, %s5733_s21 }
  0x1f   : > { %7237 = sst [smem:[#allocation37_spill]] %s5717_s0  ;;  %s47_s26 = sadd.s32 1, %s5737_s22 }
  0x20   : > { %7238 = sst [smem:[#allocation38_spill]] %s5721_s19  ;;  %p45_p0 = scmp.ge.s32.totalorder %s44_s25, 2 }
  0x21   : > { %7239 = sst [smem:[#allocation39_spill]] %s5725_s1  ;;  %s54_s18 = sadd.s32 1, %s5721_s19 }
  0x22   : > { %7240 = sst [smem:[#allocation40_spill]] %s5729_s20  ;;  %p7182_p1 = scmp.ne.s32.totalorder %s5721_s19, %s5717_s0 }
  0x23   : > { %7241 = sst [smem:[#allocation41_spill]] %s5737_s22  ;;  %p62_p2 = scmp.eq.s32.totalorder %s5741_s2, 0 }
  0x24   : > { %7242 = sst [smem:[#allocation42_spill]] %s5935_s23  ;;  %s7317_s25 = smov (%p45_p0, %s44_s25), 0 }
  0x25   : > { %7243 = sst [smem:[#allocation43_spill]] %s7317_s25  ;;  %s7319_s26 = smov (!%p45_p0, %s47_s26), %s5737_s22 }
  0x26   : > { %p5952_p3 = por %p62_p2, %p7182_p1  ;;  %p7181_p4 = scmp.ne.s32.totalorder %s5717_s0, %s5713_s30 }
  0x27   : > { %p49_p5 = scmp.ge.s32.totalorder %s7319_s26, 2  ;;  %p7193_p6 = scmp.eq.s32.totalorder %s5935_s23, 0 }
  0x28   : > { %s7244_s20 = scalar_select %p5952_p3, 1, 0 }
  0x29   : > { %s98_s1 = ssub.s32 %s5733_s21, %s7317_s25  ;;  %s101_s17 = sadd.s32 1, %s5709_s29 }
  0x2a   : > { %s7321_s26 = smov (%p49_p5, %s7319_s26), 0  ;;  %p5969_p7 = por %p7193_p6, %p7181_p4 }
  0x2b   : > { %7245 = sst [smem:[#allocation44_spill]] %s7321_s26  ;;  %p99_p8 = scmp.eq.s32.totalorder %s98_s1, 0 }
  0x2c   : > { %s7246_s16 = scalar_select %p5969_p7, 1, 0 }
  0x2d   : > { %s51_s15 = ssub.s32 %s5737_s22, %s7321_s26  ;;  %p108_p9 = scmp.ne.s32.totalorder %s5709_s29, %s5705_s28 }
  0x2e   : > { %7247 = sst [smem:[#allocation45_spill]] %s7246_s16  ;;  %p52_p10 = scmp.eq.s32.totalorder %s51_s15, 0 }
  0x2f   : > { %p114_p11 = scmp.ne.s32.totalorder %s5705_s28, %s5701_s27  ;;  %p5987_p12 = por %p108_p9, %p62_p2 }
  0x30   : > { %s5980_s25 = scalar_select %p99_p8, %s5709_s29, %s101_s17  }
  0x31   : > { %s5983_s14 = scalar_select %p52_p10, %s5721_s19, %s54_s18  }
  0x32   : > { %7248 = sst [smem:[#allocation46_spill]] %s5980_s25  ;;  %p5993_p13 = por %p114_p11, %p7193_p6 }
  0x33   : > { %7249 = sst [smem:[#allocation47_spill]] %s5983_s14  ;;  %p528_p0 = scmp.eq.s32.totalorder %s5935_s23, 3 }
  0x34   : > { %s7250_s13 = scalar_select %p5987_p12, 1, 0 }
  0x35   : > { %s7251_s12 = scalar_select %p5993_p13, 1, 0 }
  0x36   : > { %p534_p5 = scmp.eq.s32.totalorder %s4172_s24, 3  ;;  %p4173_p4 = scmp.ge.s32.totalorder %s5741_s2, 1 }
  0x37   : > { %7252 = sst [smem:[#allocation48_spill]] %s7251_s12  ;;  %p541_p1 = scmp.lt.s32.totalorder %s5741_s2, 5 }
  0x38   : > { %p7253_p7 = scmp.ne.s32.totalorder %s5721_s19, %s5717_s0  ;;  %p7256_p8 = scmp.ne.s32.totalorder %s5717_s0, %s5713_s30 }
  0x39   : > { %p6014_p2 = pnand %p4173_p4, %p541_p1  ;;  %s5751_s27 = smov [#allocation11]  }
  0x3a   : > { %p6003_p3 = por %p528_p0, %p7253_p7  ;;  %p6010_p10 = por %p534_p5, %p7256_p8 }
  0x3b   : > { %s7259_s18 = scalar_select %p6014_p2, 1, 0 }
  0x3c   : > { %s7254_s15 = scalar_select %p6003_p3, 1, 0 }
  0x3d   : > { %s7257_s17 = scalar_select %p6010_p10, 1, 0 }
  0x3e   : > { %7255 = sst [smem:[#allocation49_spill]] %s7254_s15  ;;  %p4625_p9 = pneg %p6014_p2 }
  0x3f   : > { %7258 = sst [smem:[#allocation50_spill]] %s7257_s17  ;;  %s553_s1 = sshll.u32 %s5751_s27, 4  ;;  %s554_s1 = int_to_ptr.vmem [resolvable:$true] %s553_s1 }
  0x40   : > { %p6022_p7 = pnand %p4625_p9, %p7193_p6  ;;  %s7261_s25 = sld [smem:[#allocation52_spill]] }
  0x42   : > { %p5101_p4 = pneg %p6022_p7 }
  0x46   : > { %s5099_s17 = scalar_lea.hbm %s7261_s25, 256 }
  0x47   : > { %p5100_p1 = scmp.ne.s32.totalorder %s7261_s25, %s5099_s17  ;;  %p5106_p5 = scmp.lt.u32.totalorder %s5099_s17, %s7261_s25 }
  0x49   : > { %p5102_p11 = pnand %p5101_p4, %p5100_p1 }
  0x4b   : > { %p5103_p0 = pneg %p5102_p11 }
  0x4d   : > { %p5108_p8 = pnand %p5106_p5, %p5103_p0 }
  0x4f   : > { %5111 = shalt.err (!%p5108_p8)
}
  0x50   : > { %s5112_s28 = scalar_lea.vmem %s554_s1, 256  ;;  %p5120_p3 = scmp.lt.s32.totalorder %s554_s1, %s554_s1 }
  0x51   : > { %p5113_p9 = scmp.ne.s32.totalorder %s554_s1, %s5112_s28  ;;  %p5121_p13 = scmp.lt.s32.totalorder %s5112_s28, %s5112_s28 }
  0x53   : > { %p5115_p6 = pnand %p5113_p9, %p5101_p4  ;;  %p5122_p2 = por %p5121_p13, %p5120_p3 }
  0x55   : > { %p5116_p10 = pneg %p5115_p6 }
  0x57   : > { %p5123_p12 = pnand %p5122_p2, %p5116_p10 }
  0x59   : > { %5126 = shalt.err (!%p5123_p12)
}
  0x5a   : > { %s5752_s14 = smov 128   ;;  %s5753_s30 = smov 8  }
  0x5b   : > { %4628 = dma.hbm_to_vmem [thread:$0]  (!%p6022_p7), %s7261_s25, 256, %s554_s1, [#allocation12], %s5752_s14, %s5752_s14, %s5753_s30  }
  0x5c   : > { %p4175_p1 = scmp.ge.s32.totalorder %s5741_s2, 4 }
  0x5d   : > { %s567_s12 = sand.u32 (!%p4175_p1), 1, %s5741_s2   ;;  %s569_s28 = sand.u32 (!%p4175_p1), 1, %s5721_s19  }
  0x5e   : > { %563 = sbr.rel (%p4175_p1) target bundleno = 530 (0x212), region = 20  ;;  %s4176_s17 = sshll.u32 (!%p4175_p1), %s569_s28, 5 }
  0x5f   : > { %s4530_s27 = sshll.u32 (!%p4175_p1), %s5737_s22, 9  ;;  %s7262_s23 = sld [smem:[#allocation51_spill]] (!%p4175_p1) }
  0x60   : > { %s571_s1 = scalar_lea.vmem (!%p4175_p1), [#allocation8], %s4176_s17  ;;  %s6054_s30 = sand.u32 (!%p4175_p1), 1, %s5709_s29  }
  0x61   : > { %s578_s14 = sshll.u32 (!%p4175_p1), %s571_s1, 4  ;;  %s6056_s26 = scalar_lea.sflag (!%p4175_p1), [#allocation9], %s567_s12  ;;  %s6051_s14 = int_to_ptr.vmem [resolvable:$true] %s578_s14 }
  0x62   : > { %p7263_p6 = scmp.ne.s32.totalorder (!%p4175_p1), %s7244_s20, 0 }
  0x65   : > { %s6049_s24 = scalar_lea.hbm %s7262_s23, %s4530_s27  ;;  %s5131_s28 = scalar_lea.hbm %s7262_s23, 1024 }
  0x66   : > { %s5127_s15 = scalar_lea.hbm %s6049_s24, 512  ;;  %p5132_p10 = scmp.lt.u32.totalorder %s6049_s24, %s7262_s23 }
  0x67   : > { %p5128_p3 = scmp.ne.s32.totalorder %s6049_s24, %s5127_s15  ;;  %p5133_p2 = scmp.lt.u32.totalorder %s5131_s28, %s5127_s15 }
  0x68   : > { %p5135_p4 = scmp.lt.u32.totalorder %s5127_s15, %s6049_s24 }
  0x69   : > { %p5129_p12 = pnand %p5128_p3, %p7263_p6  ;;  %p5134_p7 = por %p5133_p2, %p5132_p10 }
  0x6b   : > { %p5130_p13 = pneg %p5129_p12  ;;  %p5136_p11 = por %p5135_p4, %p5134_p7 }
  0x6d   : > { %p5137_p0 = pnand %p5136_p11, %p5130_p13 }
  0x6f   : > { %5140 = shalt.err (!%p5137_p0)
}
  0x70   : > { %s5141_s12 = scalar_lea.vmem %s6051_s14, 512  ;;  %s5754_s17 = smov [#allocation8]  }
  0x71   : > { %p5142_p5 = scmp.ne.s32.totalorder %s6051_s14, %s5141_s12  ;;  %s5145_s1 = sshll.u32 %s5754_s17, 4  ;;  %s5146_s1 = int_to_ptr.vmem [resolvable:$false] %s5145_s1 }
  0x72   : > { %s5147_s25 = scalar_lea.vmem %s5146_s1, 1024  ;;  %p5148_p1 = scmp.lt.s32.totalorder %s6051_s14, %s5146_s1 }
  0x73   : > { %p5143_p8 = pnand %p5142_p5, %p7263_p6  ;;  %p5149_p3 = scmp.lt.s32.totalorder %s5147_s25, %s5141_s12 }
  0x75   : > { %p5144_p9 = pneg %p5143_p8  ;;  %p5150_p12 = por %p5149_p3, %p5148_p1 }
  0x77   : > { %p5151_p10 = pnand %p5150_p12, %p5144_p9 }
  0x79   : > { %5154 = shalt.err (!%p5151_p10)
}
  0x7a   : > { %s5755_s15 = smov 256   ;;  %s5756_s16 = smov 16  }
  0x7b   : > { %4587 = dma.hbm_to_vmem [thread:$0]  (%p7263_p6), %s6049_s24, 512, %s6051_s14, %s6056_s26, %s5755_s15, %s5755_s15, %s5756_s16  }
  0x7c   : > { %s6081_s0 = sshll.u32 %s6054_s30, 1  ;;  %s6084_s28 = sshll.u32 %s5733_s21, 5 }
  0x7d   : > { %s7264_s17 = sld [smem:[#allocation53_spill]]  ;;  %s592_s25 = scalar_lea.vmem [#allocation13], %s6081_s0 }
  0x7e   : > { %s600_s23 = sshll.u32 %s592_s25, 4  ;;  %s7265_s3 = sld [smem:[#allocation54_spill]]  ;;  %s601_s23 = int_to_ptr.vmem [resolvable:$true] %s600_s23 }
  0x7f   : > { %p7266_p13 = scmp.ne.s32.totalorder %s7250_s13, 0 }
  0x83   : > { %s6090_s1 = scalar_lea.hbm %s7264_s17, %s6084_s28  ;;  %s5159_s12 = scalar_lea.hbm %s7264_s17, 64 }
  0x84   : > { %s6097_s14 = scalar_lea.hbm %s7265_s3, %s6084_s28  ;;  %s5155_s15 = scalar_lea.hbm %s6090_s1, 32 }
  0x85   : > { %p5156_p6 = scmp.ne.s32.totalorder %s6090_s1, %s5155_s15  ;;  %p5160_p4 = scmp.lt.u32.totalorder %s6090_s1, %s7264_s17 }
  0x86   : > { %p5161_p11 = scmp.lt.u32.totalorder %s5159_s12, %s5155_s15  ;;  %p5163_p5 = scmp.lt.u32.totalorder %s5155_s15, %s6090_s1 }
  0x87   : > { %p5157_p2 = pnand %p5156_p6, %p7266_p13 }
  0x88   : > { %p5162_p0 = por %p5161_p11, %p5160_p4 }
  0x89   : > { %p5158_p7 = pneg %p5157_p2 }
  0x8a   : > { %p5164_p8 = por %p5163_p5, %p5162_p0 }
  0x8c   : > { %p5165_p9 = pnand %p5164_p8, %p5158_p7 }
  0x8e   : > { %5168 = shalt.err (!%p5165_p9)
}
  0x8f   : > { %s5169_s25 = scalar_lea.vmem %s601_s23, 32  ;;  %s5757_s20 = smov [#allocation13]  }
  0x90   : > { %p5170_p1 = scmp.ne.s32.totalorder %s601_s23, %s5169_s25  ;;  %s5173_s24 = sshll.u32 %s5757_s20, 4  ;;  %s5174_s24 = int_to_ptr.vmem [resolvable:$false] %s5173_s24 }
  0x91   : > { %s5175_s16 = scalar_lea.vmem %s5174_s24, 64  ;;  %p5176_p10 = scmp.lt.s32.totalorder %s601_s23, %s5174_s24 }
  0x92   : > { %p5171_p3 = pnand %p5170_p1, %p7266_p13  ;;  %p5177_p6 = scmp.lt.s32.totalorder %s5175_s16, %s5169_s25 }
  0x94   : > { %p5172_p12 = pneg %p5171_p3  ;;  %p5178_p2 = por %p5177_p6, %p5176_p10 }
  0x96   : > { %p5179_p4 = pnand %p5178_p2, %p5172_p12 }
  0x98   : > { %5182 = shalt.err (!%p5179_p4)
}
  0x99   : > { %4588 = dma.hbm_to_vmem [thread:$0]  (%p7266_p13), %s6090_s1, 32, %s601_s23, %s6056_s26  }
  0x9a   : > { %s611_s19 = scalar_lea.vmem [#allocation14], %s6081_s0  ;;  %s6119_s15 = sshll.u32 %s6054_s30, 8 }
  0x9b   : > { %s619_s22 = sshll.u32 %s611_s19, 4  ;;  %s5183_s27 = scalar_lea.hbm %s6097_s14, 32  ;;  %s620_s22 = int_to_ptr.vmem [resolvable:$true] %s619_s22 }
  0x9c   : > { %p5184_p7 = scmp.ne.s32.totalorder %s6097_s14, %s5183_s27  ;;  %s5187_s20 = scalar_lea.hbm %s7265_s3, 64 }
  0x9d   : > { %p5188_p5 = scmp.lt.u32.totalorder %s6097_s14, %s7265_s3  ;;  %p5189_p8 = scmp.lt.u32.totalorder %s5187_s20, %s5183_s27 }
  0x9e   : > { %p5185_p11 = pnand %p5184_p7, %p7266_p13  ;;  %p5191_p1 = scmp.lt.u32.totalorder %s5183_s27, %s6097_s14 }
  0x9f   : > { %p5190_p9 = por %p5189_p8, %p5188_p5 }
  0xa0   : > { %p5186_p0 = pneg %p5185_p11 }
  0xa1   : > { %p5192_p3 = por %p5191_p1, %p5190_p9 }
  0xa3   : > { %p5193_p12 = pnand %p5192_p3, %p5186_p0 }
  0xa5   : > { %5196 = shalt.err (!%p5193_p12)
}
  0xa6   : > { %s5197_s23 = scalar_lea.vmem %s620_s22, 32  ;;  %s5758_s1 = smov [#allocation14]  }
  0xa7   : > { %p5198_p10 = scmp.ne.s32.totalorder %s620_s22, %s5197_s23  ;;  %s5201_s19 = sshll.u32 %s5758_s1, 4  ;;  %s5202_s19 = int_to_ptr.vmem [resolvable:$false] %s5201_s19 }
  0xa8   : > { %s5203_s12 = scalar_lea.vmem %s5202_s19, 64  ;;  %p5204_p4 = scmp.lt.s32.totalorder %s620_s22, %s5202_s19 }
  0xa9   : > { %p5199_p6 = pnand %p5198_p10, %p7266_p13  ;;  %p5205_p7 = scmp.lt.s32.totalorder %s5203_s12, %s5197_s23 }
  0xab   : > { %p5200_p2 = pneg %p5199_p6  ;;  %p5206_p11 = por %p5205_p7, %p5204_p4 }
  0xad   : > { %p5207_p5 = pnand %p5206_p11, %p5200_p2 }
  0xaf   : > { %5210 = shalt.err (!%p5207_p5)
}
  0xb0   : > { %4589 = dma.hbm_to_vmem [thread:$0]  (%p7266_p13), %s6097_s14, 32, %s620_s22, %s6056_s26  }
  0xb1   : > { %s6140_s27 = sshll.u32 %s5733_s21, 12  ;;  %s630_s25 = scalar_lea.vmem [#allocation15], %s6119_s15 }
  0xb2   : > { %s637_s20 = sshll.u32 %s630_s25, 4  ;;  %s7267_s4 = sld [smem:[#allocation55_spill]]  ;;  %s6149_s20 = int_to_ptr.vmem [resolvable:$true] %s637_s20 }
  0xb8   : > { %s6147_s23 = scalar_lea.hbm %s7267_s4, %s6140_s27  ;;  %s5215_s19 = scalar_lea.hbm %s7267_s4, 8192 }
  0xb9   : > { %s5211_s1 = scalar_lea.hbm %s6147_s23, 4096  ;;  %p5216_p1 = scmp.lt.u32.totalorder %s6147_s23, %s7267_s4 }
  0xba   : > { %p5212_p0 = scmp.ne.s32.totalorder %s6147_s23, %s5211_s1  ;;  %p5217_p3 = scmp.lt.u32.totalorder %s5215_s19, %s5211_s1 }
  0xbb   : > { %p5219_p10 = scmp.lt.u32.totalorder %s5211_s1, %s6147_s23 }
  0xbc   : > { %p5213_p8 = pnand %p5212_p0, %p7266_p13  ;;  %p5218_p12 = por %p5217_p3, %p5216_p1 }
  0xbe   : > { %p5214_p9 = pneg %p5213_p8  ;;  %p5220_p6 = por %p5219_p10, %p5218_p12 }
  0xc0   : > { %p5221_p2 = pnand %p5220_p6, %p5214_p9 }
  0xc2   : > { %5224 = shalt.err (!%p5221_p2)
}
  0xc3   : > { %s5225_s24 = scalar_lea.vmem %s6149_s20, 4096  ;;  %s5759_s16 = smov [#allocation15]  }
  0xc4   : > { %p5226_p4 = scmp.ne.s32.totalorder %s6149_s20, %s5225_s24  ;;  %s5229_s14 = sshll.u32 %s5759_s16, 4  ;;  %s5230_s14 = int_to_ptr.vmem [resolvable:$false] %s5229_s14 }
  0xc5   : > { %s5231_s22 = scalar_lea.vmem %s5230_s14, 8192  ;;  %p5232_p5 = scmp.lt.s32.totalorder %s6149_s20, %s5230_s14 }
  0xc6   : > { %p5227_p7 = pnand %p5226_p4, %p7266_p13  ;;  %p5233_p0 = scmp.lt.s32.totalorder %s5231_s22, %s5225_s24 }
  0xc8   : > { %p5228_p11 = pneg %p5227_p7  ;;  %p5234_p8 = por %p5233_p0, %p5232_p5 }
  0xca   : > { %p5235_p1 = pnand %p5234_p8, %p5228_p11 }
  0xcc   : > { %5238 = shalt.err (!%p5235_p1)
}
  0xcd   : > { %s7209_s1 = smov 128   ;;  %s7211_s19 = smov 8  }
  0xce   : > { %4590 = dma.hbm_to_vmem [thread:$0]  (%p7266_p13), %s6147_s23, 4096, %s6149_s20, %s6056_s26, %s7209_s1, %s7209_s1, %s7211_s19  }
  0xcf   : > { %s7268_s5 = sld [smem:[#allocation56_spill]]  ;;  %s651_s16 = scalar_lea.vmem [#allocation16], %s6081_s0 }
  0xd0   : > { %s659_s14 = sshll.u32 %s651_s16, 4  ;;  %s7269_s6 = sld [smem:[#allocation57_spill]]  ;;  %s660_s14 = int_to_ptr.vmem [resolvable:$true] %s659_s14 }
  0xd5   : > { %s6180_s24 = scalar_lea.hbm %s7268_s5, %s6084_s28  ;;  %s5243_s12 = scalar_lea.hbm %s7268_s5, 64 }
  0xd6   : > { %s6187_s4 = scalar_lea.hbm %s7269_s6, %s6140_s27  ;;  %s5239_s17 = scalar_lea.hbm %s6180_s24, 32 }
  0xd7   : > { %p5240_p9 = scmp.ne.s32.totalorder %s6180_s24, %s5239_s17  ;;  %p5244_p10 = scmp.lt.u32.totalorder %s6180_s24, %s7268_s5 }
  0xd8   : > { %p5245_p6 = scmp.lt.u32.totalorder %s5243_s12, %s5239_s17  ;;  %p5247_p4 = scmp.lt.u32.totalorder %s5239_s17, %s6180_s24 }
  0xd9   : > { %p5241_p3 = pnand %p5240_p9, %p7266_p13 }
  0xda   : > { %p5246_p2 = por %p5245_p6, %p5244_p10 }
  0xdb   : > { %p5242_p12 = pneg %p5241_p3 }
  0xdc   : > { %p5248_p7 = por %p5247_p4, %p5246_p2 }
  0xde   : > { %p5249_p11 = pnand %p5248_p7, %p5242_p12 }
  0xe0   : > { %5252 = shalt.err (!%p5249_p11)
}
  0xe1   : > { %s5253_s3 = scalar_lea.vmem %s660_s14, 32  ;;  %s5762_s16 = smov [#allocation16]  }
  0xe2   : > { %p5254_p5 = scmp.ne.s32.totalorder %s660_s14, %s5253_s3  ;;  %s5257_s22 = sshll.u32 %s5762_s16, 4  ;;  %s5258_s22 = int_to_ptr.vmem [resolvable:$false] %s5257_s22 }
  0xe3   : > { %s5259_s20 = scalar_lea.vmem %s5258_s22, 64  ;;  %p5260_p1 = scmp.lt.s32.totalorder %s660_s14, %s5258_s22 }
  0xe4   : > { %p5255_p0 = pnand %p5254_p5, %p7266_p13  ;;  %p5261_p9 = scmp.lt.s32.totalorder %s5259_s20, %s5253_s3 }
  0xe6   : > { %p5256_p8 = pneg %p5255_p0  ;;  %p5262_p3 = por %p5261_p9, %p5260_p1 }
  0xe8   : > { %p5263_p6 = pnand %p5262_p3, %p5256_p8 }
  0xea   : > { %5266 = shalt.err (!%p5263_p6)
}
  0xeb   : > { %4591 = dma.hbm_to_vmem [thread:$0]  (%p7266_p13), %s6180_s24, 32, %s660_s14, %s6056_s26  }
  0xec   : > { %s670_s17 = scalar_lea.vmem [#allocation17], %s6119_s15  ;;  %s7270_s7 = sld [smem:[#allocation58_spill]] }
  0xed   : > { %s677_s1 = sshll.u32 %s670_s17, 4  ;;  %s5267_s3 = scalar_lea.hbm %s6187_s4, 4096  ;;  %s6208_s1 = int_to_ptr.vmem [resolvable:$true] %s677_s1 }
  0xee   : > { %p5268_p12 = scmp.ne.s32.totalorder %s6187_s4, %s5267_s3  ;;  %s5271_s20 = scalar_lea.hbm %s7269_s6, 8192 }
  0xef   : > { %p5272_p4 = scmp.lt.u32.totalorder %s6187_s4, %s7269_s6  ;;  %p5273_p7 = scmp.lt.u32.totalorder %s5271_s20, %s5267_s3 }
  0xf0   : > { %p5269_p10 = pnand %p5268_p12, %p7266_p13  ;;  %p5275_p5 = scmp.lt.u32.totalorder %s5267_s3, %s6187_s4 }
  0xf1   : > { %p5274_p11 = por %p5273_p7, %p5272_p4 }
  0xf2   : > { %s6214_s25 = scalar_lea.hbm %s7270_s7, %s6084_s28  ;;  %p5270_p2 = pneg %p5269_p10 }
  0xf3   : > { %p5276_p0 = por %p5275_p5, %p5274_p11 }
  0xf5   : > { %p5277_p8 = pnand %p5276_p0, %p5270_p2 }
  0xf7   : > { %5280 = shalt.err (!%p5277_p8)
}
  0xf8   : > { %s5281_s14 = scalar_lea.vmem %s6208_s1, 4096  ;;  %s5763_s17 = smov [#allocation17]  }
  0xf9   : > { %p5282_p1 = scmp.ne.s32.totalorder %s6208_s1, %s5281_s14  ;;  %s5285_s23 = sshll.u32 %s5763_s17, 4  ;;  %s5286_s23 = int_to_ptr.vmem [resolvable:$false] %s5285_s23 }
  0xfa   : > { %s5287_s19 = scalar_lea.vmem %s5286_s23, 8192  ;;  %p5288_p6 = scmp.lt.s32.totalorder %s6208_s1, %s5286_s23 }
  0xfb   : > { %p5283_p9 = pnand %p5282_p1, %p7266_p13  ;;  %p5289_p12 = scmp.lt.s32.totalorder %s5287_s19, %s5281_s14 }
  0xfd   : > { %p5284_p3 = pneg %p5283_p9  ;;  %p5290_p10 = por %p5289_p12, %p5288_p6 }
  0xff   : > { %p5291_p4 = pnand %p5290_p10, %p5284_p3 }
 0x101   : > { %5294 = shalt.err (!%p5291_p4)
}
 0x102   : > { %s7271_s12 = smov 8   ;;  %s7272_s3 = smov 128  }
 0x103   : > { %4592 = dma.hbm_to_vmem [thread:$0]  (%p7266_p13), %s6187_s4, 4096, %s6208_s1, %s6056_s26, %s7272_s3, %s7272_s3, %s7271_s12  }
 0x104   : > { %s691_s16 = scalar_lea.vmem [#allocation18], %s6081_s0  ;;  %s7273_s8 = sld [smem:[#allocation59_spill]] }
 0x105   : > { %s699_s22 = sshll.u32 %s691_s16, 4  ;;  %s5295_s17 = scalar_lea.hbm %s6214_s25, 32  ;;  %s700_s22 = int_to_ptr.vmem [resolvable:$true] %s699_s22 }
 0x106   : > { %p5296_p2 = scmp.ne.s32.totalorder %s6214_s25, %s5295_s17  ;;  %s5299_s5 = scalar_lea.hbm %s7270_s7, 64 }
 0x107   : > { %p5300_p5 = scmp.lt.u32.totalorder %s6214_s25, %s7270_s7  ;;  %p5301_p0 = scmp.lt.u32.totalorder %s5299_s5, %s5295_s17 }
 0x108   : > { %p5297_p7 = pnand %p5296_p2, %p7266_p13  ;;  %p5303_p1 = scmp.lt.u32.totalorder %s5295_s17, %s6214_s25 }
 0x109   : > { %p5302_p8 = por %p5301_p0, %p5300_p5 }
 0x10a   : > { %s6246_s14 = scalar_lea.hbm %s7273_s8, %s6140_s27  ;;  %p5298_p11 = pneg %p5297_p7 }
 0x10b   : > { %p5304_p9 = por %p5303_p1, %p5302_p8 }
 0x10d   : > { %p5305_p3 = pnand %p5304_p9, %p5298_p11 }
 0x10f   : > { %5308 = shalt.err (!%p5305_p3)
}
 0x110   : > { %s5309_s4 = scalar_lea.vmem %s700_s22, 32  ;;  %s5764_s1 = smov [#allocation18]  }
 0x111   : > { %p5310_p6 = scmp.ne.s32.totalorder %s700_s22, %s5309_s4  ;;  %s5313_s16 = sshll.u32 %s5764_s1, 4  ;;  %s5314_s16 = int_to_ptr.vmem [resolvable:$false] %s5313_s16 }
 0x112   : > { %s5315_s20 = scalar_lea.vmem %s5314_s16, 64  ;;  %p5316_p4 = scmp.lt.s32.totalorder %s700_s22, %s5314_s16 }
 0x113   : > { %p5311_p12 = pnand %p5310_p6, %p7266_p13  ;;  %p5317_p2 = scmp.lt.s32.totalorder %s5315_s20, %s5309_s4 }
 0x115   : > { %p5312_p10 = pneg %p5311_p12  ;;  %p5318_p7 = por %p5317_p2, %p5316_p4 }
 0x117   : > { %p5319_p0 = pnand %p5318_p7, %p5312_p10 }
 0x119   : > { %5322 = shalt.err (!%p5319_p0)
}
 0x11a   : > { %4593 = dma.hbm_to_vmem [thread:$0]  (%p7266_p13), %s6214_s25, 32, %s700_s22, %s6056_s26  }
 0x11b   : > { %s710_s5 = scalar_lea.vmem [#allocation19], %s6119_s15  ;;  %s7274_s9 = sld [smem:[#allocation60_spill]] }
 0x11c   : > { %s717_s6 = sshll.u32 %s710_s5, 4  ;;  %s5323_s23 = scalar_lea.hbm %s6246_s14, 4096  ;;  %s6267_s6 = int_to_ptr.vmem [resolvable:$true] %s717_s6 }
 0x11d   : > { %p5324_p11 = scmp.ne.s32.totalorder %s6246_s14, %s5323_s23  ;;  %s5327_s1 = scalar_lea.hbm %s7273_s8, 8192 }
 0x11e   : > { %p5328_p1 = scmp.lt.u32.totalorder %s6246_s14, %s7273_s8  ;;  %p5329_p9 = scmp.lt.u32.totalorder %s5327_s1, %s5323_s23 }
 0x11f   : > { %p5325_p5 = pnand %p5324_p11, %p7266_p13  ;;  %p5331_p6 = scmp.lt.u32.totalorder %s5323_s23, %s6246_s14 }
 0x120   : > { %p5330_p3 = por %p5329_p9, %p5328_p1 }
 0x121   : > { %s6273_s17 = scalar_lea.hbm %s7274_s9, %s6084_s28  ;;  %p5326_p8 = pneg %p5325_p5 }
 0x122   : > { %p5332_p12 = por %p5331_p6, %p5330_p3 }
 0x124   : > { %p5333_p10 = pnand %p5332_p12, %p5326_p8 }
 0x126   : > { %5336 = shalt.err (!%p5333_p10)
}
 0x127   : > { %s5337_s22 = scalar_lea.vmem %s6267_s6, 4096  ;;  %s5765_s20 = smov [#allocation19]  }
 0x128   : > { %p5338_p4 = scmp.ne.s32.totalorder %s6267_s6, %s5337_s22  ;;  %s5341_s5 = sshll.u32 %s5765_s20, 4  ;;  %s5342_s5 = int_to_ptr.vmem [resolvable:$false] %s5341_s5 }
 0x129   : > { %s5343_s29 = scalar_lea.vmem %s5342_s5, 8192  ;;  %p5344_p0 = scmp.lt.s32.totalorder %s6267_s6, %s5342_s5 }
 0x12a   : > { %p5339_p2 = pnand %p5338_p4, %p7266_p13  ;;  %p5345_p11 = scmp.lt.s32.totalorder %s5343_s29, %s5337_s22 }
 0x12c   : > { %p5340_p7 = pneg %p5339_p2  ;;  %p5346_p5 = por %p5345_p11, %p5344_p0 }
 0x12e   : > { %p5347_p1 = pnand %p5346_p5, %p5340_p7 }
 0x130   : > { %5350 = shalt.err (!%p5347_p1)
}
 0x131   : > { %4594 = dma.hbm_to_vmem [thread:$0]  (%p7266_p13), %s6246_s14, 4096, %s6267_s6, %s6056_s26, %s7272_s3, %s7272_s3, %s7271_s12  }
 0x132   : > { %s731_s24 = scalar_lea.vmem [#allocation20], %s6081_s0  ;;  %s6305_s1 = scalar_lea.hbm %s7161_s10, %s6140_s27 }
 0x133   : > { %s739_s23 = sshll.u32 %s731_s24, 4  ;;  %s5351_s16 = scalar_lea.hbm %s6273_s17, 32  ;;  %s740_s23 = int_to_ptr.vmem [resolvable:$true] %s739_s23 }
 0x134   : > { %p5352_p8 = scmp.ne.s32.totalorder %s6273_s17, %s5351_s16  ;;  %s5355_s20 = scalar_lea.hbm %s7274_s9, 64 }
 0x135   : > { %p5356_p6 = scmp.lt.u32.totalorder %s6273_s17, %s7274_s9  ;;  %p5357_p12 = scmp.lt.u32.totalorder %s5355_s20, %s5351_s16 }
 0x136   : > { %p5353_p9 = pnand %p5352_p8, %p7266_p13  ;;  %p5359_p4 = scmp.lt.u32.totalorder %s5351_s16, %s6273_s17 }
 0x137   : > { %p5358_p10 = por %p5357_p12, %p5356_p6 }
 0x138   : > { %p5354_p3 = pneg %p5353_p9 }
 0x139   : > { %p5360_p2 = por %p5359_p4, %p5358_p10 }
 0x13b   : > { %p5361_p7 = pnand %p5360_p2, %p5354_p3 }
 0x13d   : > { %5364 = shalt.err (!%p5361_p7)
}
 0x13e   : > { %s5365_s27 = scalar_lea.vmem %s740_s23, 32  ;;  %s5766_s14 = smov [#allocation20]  }
 0x13f   : > { %p5366_p0 = scmp.ne.s32.totalorder %s740_s23, %s5365_s27  ;;  %s5369_s6 = sshll.u32 %s5766_s14, 4  ;;  %s5370_s6 = int_to_ptr.vmem [resolvable:$false] %s5369_s6 }
 0x140   : > { %s5371_s24 = scalar_lea.vmem %s5370_s6, 64  ;;  %p5372_p1 = scmp.lt.s32.totalorder %s740_s23, %s5370_s6 }
 0x141   : > { %p5367_p11 = pnand %p5366_p0, %p7266_p13  ;;  %p5373_p8 = scmp.lt.s32.totalorder %s5371_s24, %s5365_s27 }
 0x143   : > { %p5368_p5 = pneg %p5367_p11  ;;  %p5374_p9 = por %p5373_p8, %p5372_p1 }
 0x145   : > { %p5375_p6 = pnand %p5374_p9, %p5368_p5 }
 0x147   : > { %5378 = shalt.err (!%p5375_p6)
}
 0x148   : > { %4595 = dma.hbm_to_vmem [thread:$0]  (%p7266_p13), %s6273_s17, 32, %s740_s23, %s6056_s26  }
 0x149   : > { %s750_s19 = scalar_lea.vmem [#allocation21], %s6119_s15  ;;  %s6332_s22 = scalar_lea.hbm %s7162_s11, %s6084_s28 }
 0x14a   : > { %s757_s4 = sshll.u32 %s750_s19, 4  ;;  %s5379_s20 = scalar_lea.hbm %s6305_s1, 4096  ;;  %s6326_s4 = int_to_ptr.vmem [resolvable:$true] %s757_s4 }
 0x14b   : > { %p5380_p3 = scmp.ne.s32.totalorder %s6305_s1, %s5379_s20  ;;  %s5383_s27 = scalar_lea.hbm %s7161_s10, 8192 }
 0x14c   : > { %p5384_p4 = scmp.lt.u32.totalorder %s6305_s1, %s7161_s10  ;;  %p5385_p2 = scmp.lt.u32.totalorder %s5383_s27, %s5379_s20 }
 0x14d   : > { %p5381_p12 = pnand %p5380_p3, %p7266_p13  ;;  %p5387_p0 = scmp.lt.u32.totalorder %s5379_s20, %s6305_s1 }
 0x14e   : > { %p5386_p7 = por %p5385_p2, %p5384_p4 }
 0x14f   : > { %p5382_p10 = pneg %p5381_p12 }
 0x150   : > { %p5388_p11 = por %p5387_p0, %p5386_p7 }
 0x152   : > { %p5389_p5 = pnand %p5388_p11, %p5382_p10 }
 0x154   : > { %5392 = shalt.err (!%p5389_p5)
}
 0x155   : > { %s5393_s15 = scalar_lea.vmem %s6326_s4, 4096  ;;  %s5767_s23 = smov [#allocation21]  }
 0x156   : > { %p5394_p1 = scmp.ne.s32.totalorder %s6326_s4, %s5393_s15  ;;  %s5397_s6 = sshll.u32 %s5767_s23, 4  ;;  %s5398_s6 = int_to_ptr.vmem [resolvable:$false] %s5397_s6 }
 0x157   : > { %s5399_s24 = scalar_lea.vmem %s5398_s6, 8192  ;;  %p5400_p6 = scmp.lt.s32.totalorder %s6326_s4, %s5398_s6 }
 0x158   : > { %p5395_p8 = pnand %p5394_p1, %p7266_p13  ;;  %p5401_p3 = scmp.lt.s32.totalorder %s5399_s24, %s5393_s15 }
 0x15a   : > { %p5396_p9 = pneg %p5395_p8  ;;  %p5402_p12 = por %p5401_p3, %p5400_p6 }
 0x15c   : > { %p5403_p4 = pnand %p5402_p12, %p5396_p9 }
 0x15e   : > { %5406 = shalt.err (!%p5403_p4)
}
 0x15f   : > { %4596 = dma.hbm_to_vmem [thread:$0]  (%p7266_p13), %s6305_s1, 4096, %s6326_s4, %s6056_s26, %s7272_s3, %s7272_s3, %s7271_s12  }
 0x160   : > { %s771_s19 = scalar_lea.vmem [#allocation22], %s6081_s0  ;;  %s7275_s5 = sld [smem:[#allocation61_spill]] }
 0x161   : > { %s779_s16 = sshll.u32 %s771_s19, 4  ;;  %s5407_s27 = scalar_lea.hbm %s6332_s22, 32  ;;  %s780_s16 = int_to_ptr.vmem [resolvable:$true] %s779_s16 }
 0x162   : > { %p5408_p10 = scmp.ne.s32.totalorder %s6332_s22, %s5407_s27  ;;  %s5411_s15 = scalar_lea.hbm %s7162_s11, 64 }
 0x163   : > { %p5412_p0 = scmp.lt.u32.totalorder %s6332_s22, %s7162_s11  ;;  %p5413_p11 = scmp.lt.u32.totalorder %s5411_s15, %s5407_s27 }
 0x164   : > { %p5409_p2 = pnand %p5408_p10, %p7266_p13  ;;  %p5415_p1 = scmp.lt.u32.totalorder %s5407_s27, %s6332_s22 }
 0x165   : > { %p5414_p5 = por %p5413_p11, %p5412_p0 }
 0x166   : > { %s6364_s29 = scalar_lea.hbm %s7275_s5, %s6084_s28  ;;  %p5410_p7 = pneg %p5409_p2 }
 0x167   : > { %p5416_p8 = por %p5415_p1, %p5414_p5 }
 0x169   : > { %p5417_p9 = pnand %p5416_p8, %p5410_p7 }
 0x16b   : > { %5420 = shalt.err (!%p5417_p9)
}
 0x16c   : > { %s5421_s1 = scalar_lea.vmem %s780_s16, 32  ;;  %s5768_s4 = smov [#allocation22]  }
 0x16d   : > { %p5422_p6 = scmp.ne.s32.totalorder %s780_s16, %s5421_s1  ;;  %s5425_s24 = sshll.u32 %s5768_s4, 4  ;;  %s5426_s24 = int_to_ptr.vmem [resolvable:$false] %s5425_s24 }
 0x16e   : > { %s5427_s19 = scalar_lea.vmem %s5426_s24, 64  ;;  %p5428_p4 = scmp.lt.s32.totalorder %s780_s16, %s5426_s24 }
 0x16f   : > { %p5423_p3 = pnand %p5422_p6, %p7266_p13  ;;  %p5429_p10 = scmp.lt.s32.totalorder %s5427_s19, %s5421_s1 }
 0x171   : > { %p5424_p12 = pneg %p5423_p3  ;;  %p5430_p2 = por %p5429_p10, %p5428_p4 }
 0x173   : > { %p5431_p0 = pnand %p5430_p2, %p5424_p12 }
 0x175   : > { %5434 = shalt.err (!%p5431_p0)
}
 0x176   : > { %4597 = dma.hbm_to_vmem [thread:$0]  (%p7266_p13), %s6332_s22, 32, %s780_s16, %s6056_s26  }
 0x177   : > { %s790_s25 = scalar_lea.vmem [#allocation23], %s6081_s0  ;;  %s7276_s17 = sld [smem:[#allocation62_spill]] }
 0x178   : > { %s798_s20 = sshll.u32 %s790_s25, 4  ;;  %s5435_s23 = scalar_lea.hbm %s6364_s29, 32  ;;  %s799_s20 = int_to_ptr.vmem [resolvable:$true] %s798_s20 }
 0x179   : > { %p5436_p7 = scmp.ne.s32.totalorder %s6364_s29, %s5435_s23  ;;  %s5439_s4 = scalar_lea.hbm %s7275_s5, 64 }
 0x17a   : > { %p5440_p1 = scmp.lt.u32.totalorder %s6364_s29, %s7275_s5  ;;  %p5441_p8 = scmp.lt.u32.totalorder %s5439_s4, %s5435_s23 }
 0x17b   : > { %p5437_p11 = pnand %p5436_p7, %p7266_p13  ;;  %p5443_p6 = scmp.lt.u32.totalorder %s5435_s23, %s6364_s29 }
 0x17c   : > { %p5442_p9 = por %p5441_p8, %p5440_p1 }
 0x17d   : > { %s6389_s15 = scalar_lea.hbm %s7276_s17, %s6084_s28  ;;  %p5438_p5 = pneg %p5437_p11 }
 0x17e   : > { %p5444_p3 = por %p5443_p6, %p5442_p9 }
 0x180   : > { %p5445_p12 = pnand %p5444_p3, %p5438_p5 }
 0x182   : > { %5448 = shalt.err (!%p5445_p12)
}
 0x183   : > { %s5449_s22 = scalar_lea.vmem %s799_s20, 32  ;;  %s5769_s16 = smov [#allocation23]  }
 0x184   : > { %p5450_p4 = scmp.ne.s32.totalorder %s799_s20, %s5449_s22  ;;  %s5453_s25 = sshll.u32 %s5769_s16, 4  ;;  %s5454_s25 = int_to_ptr.vmem [resolvable:$false] %s5453_s25 }
 0x185   : > { %s5455_s27 = scalar_lea.vmem %s5454_s25, 64  ;;  %p5456_p0 = scmp.lt.s32.totalorder %s799_s20, %s5454_s25 }
 0x186   : > { %p5451_p10 = pnand %p5450_p4, %p7266_p13  ;;  %p5457_p7 = scmp.lt.s32.totalorder %s5455_s27, %s5449_s22 }
 0x188   : > { %p5452_p2 = pneg %p5451_p10  ;;  %p5458_p11 = por %p5457_p7, %p5456_p0 }
 0x18a   : > { %p5459_p1 = pnand %p5458_p11, %p5452_p2 }
 0x18c   : > { %5462 = shalt.err (!%p5459_p1)
}
 0x18d   : > { %4598 = dma.hbm_to_vmem [thread:$0]  (%p7266_p13), %s6364_s29, 32, %s799_s20, %s6056_s26  }
 0x18e   : > { %s809_s14 = scalar_lea.vmem [#allocation24], %s6081_s0  ;;  %s7214_s6 = sshll.u32 %s6054_s30, 10 }
 0x18f   : > { %s817_s23 = sshll.u32 %s809_s14, 4  ;;  %s5463_s1 = scalar_lea.hbm %s6389_s15, 32  ;;  %s818_s23 = int_to_ptr.vmem [resolvable:$true] %s817_s23 }
 0x190   : > { %p5464_p5 = scmp.ne.s32.totalorder %s6389_s15, %s5463_s1  ;;  %s5467_s19 = scalar_lea.hbm %s7276_s17, 64 }
 0x191   : > { %p5468_p6 = scmp.lt.u32.totalorder %s6389_s15, %s7276_s17  ;;  %p5469_p3 = scmp.lt.u32.totalorder %s5467_s19, %s5463_s1 }
 0x192   : > { %p5465_p8 = pnand %p5464_p5, %p7266_p13  ;;  %p5471_p4 = scmp.lt.u32.totalorder %s5463_s1, %s6389_s15 }
 0x193   : > { %p5470_p12 = por %p5469_p3, %p5468_p6 }
 0x194   : > { %p5466_p9 = pneg %p5465_p8 }
 0x195   : > { %p5472_p10 = por %p5471_p4, %p5470_p12 }
 0x197   : > { %p5473_p2 = pnand %p5472_p10, %p5466_p9 }
 0x199   : > { %5476 = shalt.err (!%p5473_p2)
}
 0x19a   : > { %s5477_s29 = scalar_lea.vmem %s818_s23, 32  ;;  %s5770_s20 = smov [#allocation24]  }
 0x19b   : > { %p5478_p0 = scmp.ne.s32.totalorder %s818_s23, %s5477_s29  ;;  %s5481_s25 = sshll.u32 %s5770_s20, 4  ;;  %s5482_s25 = int_to_ptr.vmem [resolvable:$false] %s5481_s25 }
 0x19c   : > { %s5483_s27 = scalar_lea.vmem %s5482_s25, 64  ;;  %p5484_p1 = scmp.lt.s32.totalorder %s818_s23, %s5482_s25 }
 0x19d   : > { %p5479_p7 = pnand %p5478_p0, %p7266_p13  ;;  %p5485_p5 = scmp.lt.s32.totalorder %s5483_s27, %s5477_s29 }
 0x19f   : > { %p5480_p11 = pneg %p5479_p7  ;;  %p5486_p8 = por %p5485_p5, %p5484_p1 }
 0x1a1   : > { %p5487_p3 = pnand %p5486_p8, %p5480_p11 }
 0x1a3   : > { %5490 = shalt.err (!%p5487_p3)
}
 0x1a4   : > { %4599 = dma.hbm_to_vmem [thread:$0]  (%p7266_p13), %s6389_s15, 32, %s818_s23, %s6056_s26  }
 0x1a5   : > { %s4543_s14 = sshll.u32 %s5733_s21, 14  ;;  %s828_s1 = scalar_lea.vmem [#allocation25], %s7214_s6 }
 0x1a6   : > { %s835_s4 = sshll.u32 %s828_s1, 4  ;;  %s7277_s22 = sld [smem:[#allocation63_spill]]  ;;  %s6439_s4 = int_to_ptr.vmem [resolvable:$true] %s835_s4 }
 0x1ac   : > { %s7278_s16 = smov %s7277_s22  ;;  %s6437_s29 = scalar_lea.hbm %s7277_s22, %s4543_s14 }
 0x1ad   : > { %s5491_s20 = scalar_lea.hbm %s6437_s29, 16384  ;;  %s5495_s25 = scalar_lea.hbm %s7278_s16, 32768 }
 0x1ae   : > { %p5492_p9 = scmp.ne.s32.totalorder %s6437_s29, %s5491_s20  ;;  %p5496_p4 = scmp.lt.u32.totalorder %s6437_s29, %s7278_s16 }
 0x1af   : > { %p5497_p10 = scmp.lt.u32.totalorder %s5495_s25, %s5491_s20  ;;  %p5499_p0 = scmp.lt.u32.totalorder %s5491_s20, %s6437_s29 }
 0x1b0   : > { %p5493_p6 = pnand %p5492_p9, %p7266_p13 }
 0x1b1   : > { %p5498_p2 = por %p5497_p10, %p5496_p4 }
 0x1b2   : > { %p5494_p12 = pneg %p5493_p6 }
 0x1b3   : > { %p5500_p7 = por %p5499_p0, %p5498_p2 }
 0x1b5   : > { %p5501_p11 = pnand %p5500_p7, %p5494_p12 }
 0x1b7   : > { %5504 = shalt.err (!%p5501_p11)
}
 0x1b8   : > { %s5505_s24 = scalar_lea.vmem %s6439_s4, 16384  ;;  %s5771_s19 = smov [#allocation25]  }
 0x1b9   : > { %p5506_p1 = scmp.ne.s32.totalorder %s6439_s4, %s5505_s24  ;;  %s5509_s22 = sshll.u32 %s5771_s19, 4  ;;  %s5510_s22 = int_to_ptr.vmem [resolvable:$false] %s5509_s22 }
 0x1ba   : > { %s5511_s15 = scalar_lea.vmem %s5510_s22, 32768  ;;  %p5512_p3 = scmp.lt.s32.totalorder %s6439_s4, %s5510_s22 }
 0x1bb   : > { %p5507_p5 = pnand %p5506_p1, %p7266_p13  ;;  %p5513_p9 = scmp.lt.s32.totalorder %s5511_s15, %s5505_s24 }
 0x1bd   : > { %p5508_p8 = pneg %p5507_p5  ;;  %p5514_p6 = por %p5513_p9, %p5512_p3 }
 0x1bf   : > { %p5515_p4 = pnand %p5514_p6, %p5508_p8 }
 0x1c1   : > { %5518 = shalt.err (!%p5515_p4)
}
 0x1c2   : > { %s5772_s20 = smov 512   ;;  %s5773_s23 = smov 32  }
 0x1c3   : > { %4600 = dma.hbm_to_vmem [thread:$0]  (%p7266_p13), %s6437_s29, 16384, %s6439_s4, %s6056_s26, %s5772_s20, %s5772_s20, %s5773_s23  }
 0x1c4   : > { %s4218_s25 = sshll.u32 %s6054_s30, 3  ;;  %s4544_s27 = sshll.u32 %s5733_s21, 7 }
 0x1c5   : > { %s7279_s24 = sld [smem:[#allocation64_spill]]  ;;  %s849_s15 = scalar_lea.vmem [#allocation26], %s4218_s25 }
 0x1c6   : > { %s857_s6 = sshll.u32 %s849_s15, 4  ;;  %s7280_s8 = sld [smem:[#allocation65_spill]]  ;;  %s858_s6 = int_to_ptr.vmem [resolvable:$true] %s857_s6 }
 0x1cb   : > { %s6468_s22 = scalar_lea.hbm %s7279_s24, %s4544_s27  ;;  %s5523_s23 = scalar_lea.hbm %s7279_s24, 256 }
 0x1cc   : > { %s6475_s9 = scalar_lea.hbm %s7280_s8, %s4543_s14  ;;  %s5519_s4 = scalar_lea.hbm %s6468_s22, 128 }
 0x1cd   : > { %p5520_p12 = scmp.ne.s32.totalorder %s6468_s22, %s5519_s4  ;;  %p5524_p0 = scmp.lt.u32.totalorder %s6468_s22, %s7279_s24 }
 0x1ce   : > { %p5525_p7 = scmp.lt.u32.totalorder %s5523_s23, %s5519_s4  ;;  %p5527_p1 = scmp.lt.u32.totalorder %s5519_s4, %s6468_s22 }
 0x1cf   : > { %p5521_p10 = pnand %p5520_p12, %p7266_p13 }
 0x1d0   : > { %p5526_p11 = por %p5525_p7, %p5524_p0 }
 0x1d1   : > { %p5522_p2 = pneg %p5521_p10 }
 0x1d2   : > { %p5528_p5 = por %p5527_p1, %p5526_p11 }
 0x1d4   : > { %p5529_p8 = pnand %p5528_p5, %p5522_p2 }
 0x1d6   : > { %5532 = shalt.err (!%p5529_p8)
}
 0x1d7   : > { %s5533_s7 = scalar_lea.vmem %s858_s6, 128  ;;  %s5774_s5 = smov [#allocation26]  }
 0x1d8   : > { %p5534_p3 = scmp.ne.s32.totalorder %s858_s6, %s5533_s7  ;;  %s5537_s14 = sshll.u32 %s5774_s5, 4  ;;  %s5538_s14 = int_to_ptr.vmem [resolvable:$false] %s5537_s14 }
 0x1d9   : > { %s5539_s25 = scalar_lea.vmem %s5538_s14, 256  ;;  %p5540_p4 = scmp.lt.s32.totalorder %s858_s6, %s5538_s14 }
 0x1da   : > { %p5535_p9 = pnand %p5534_p3, %p7266_p13  ;;  %p5541_p12 = scmp.lt.s32.totalorder %s5539_s25, %s5533_s7 }
 0x1dc   : > { %p5536_p6 = pneg %p5535_p9  ;;  %p5542_p10 = por %p5541_p12, %p5540_p4 }
 0x1de   : > { %p5543_p0 = pnand %p5542_p10, %p5536_p6 }
 0x1e0   : > { %5546 = shalt.err (!%p5543_p0)
}
 0x1e1   : > { %4601 = dma.hbm_to_vmem [thread:$0]  (%p7266_p13), %s6468_s22, 128, %s858_s6, %s6056_s26  }
 0x1e2   : > { %s7281_s19 = sshll.u32 %s6054_s30, 10  ;;  %s7282_s23 = sld [smem:[#allocation66_spill]] }
 0x1e3   : > { %s868_s15 = scalar_lea.vmem [#allocation27], %s7281_s19  ;;  %s5547_s1 = scalar_lea.hbm %s6475_s9, 16384 }
 0x1e4   : > { %s875_s4 = sshll.u32 %s868_s15, 4  ;;  %p5548_p2 = scmp.ne.s32.totalorder %s6475_s9, %s5547_s1  ;;  %s6497_s4 = int_to_ptr.vmem [resolvable:$true] %s875_s4 }
 0x1e5   : > { %s5551_s14 = scalar_lea.hbm %s7280_s8, 32768  ;;  %p5552_p1 = scmp.lt.u32.totalorder %s6475_s9, %s7280_s8 }
 0x1e6   : > { %p5549_p7 = pnand %p5548_p2, %p7266_p13  ;;  %p5553_p5 = scmp.lt.u32.totalorder %s5551_s14, %s5547_s1 }
 0x1e7   : > { %p5555_p3 = scmp.lt.u32.totalorder %s5547_s1, %s6475_s9 }
 0x1e8   : > { %s6503_s27 = scalar_lea.hbm %s7282_s23, %s6084_s28  ;;  %p5550_p11 = pneg %p5549_p7 }
 0x1e9   : > { %p5554_p8 = por %p5553_p5, %p5552_p1 }
 0x1eb   : > { %p5556_p9 = por %p5555_p3, %p5554_p8 }
 0x1ed   : > { %p5557_p6 = pnand %p5556_p9, %p5550_p11 }
 0x1ef   : > { %5560 = shalt.err (!%p5557_p6)
}
 0x1f0   : > { %s5561_s28 = scalar_lea.vmem %s6497_s4, 16384  ;;  %s5775_s22 = smov [#allocation27]  }
 0x1f1   : > { %p5562_p4 = scmp.ne.s32.totalorder %s6497_s4, %s5561_s28  ;;  %s5565_s25 = sshll.u32 %s5775_s22, 4  ;;  %s5566_s25 = int_to_ptr.vmem [resolvable:$false] %s5565_s25 }
 0x1f2   : > { %s5567_s19 = scalar_lea.vmem %s5566_s25, 32768  ;;  %p5568_p0 = scmp.lt.s32.totalorder %s6497_s4, %s5566_s25 }
 0x1f3   : > { %p5563_p12 = pnand %p5562_p4, %p7266_p13  ;;  %p5569_p2 = scmp.lt.s32.totalorder %s5567_s19, %s5561_s28 }
 0x1f5   : > { %p5564_p10 = pneg %p5563_p12  ;;  %p5570_p7 = por %p5569_p2, %p5568_p0 }
 0x1f7   : > { %p5571_p1 = pnand %p5570_p7, %p5564_p10 }
 0x1f9   : > { %5574 = shalt.err (!%p5571_p1)
}
 0x1fa   : > { %4602 = dma.hbm_to_vmem [thread:$0]  (%p7266_p13), %s6475_s9, 16384, %s6497_s4, %s6056_s26, %s7272_s3, %s7272_s3, %s7271_s12  }
 0x1fb   : > { %s889_s15 = scalar_lea.vmem [#allocation28], %s6081_s0  ;;  %s5575_s20 = scalar_lea.hbm %s6503_s27, 32 }
 0x1fc   : > { %s897_s29 = sshll.u32 %s889_s15, 4  ;;  %p5576_p11 = scmp.ne.s32.totalorder %s6503_s27, %s5575_s20  ;;  %s898_s29 = int_to_ptr.vmem [resolvable:$true] %s897_s29 }
 0x1fd   : > { %s5579_s5 = scalar_lea.hbm %s7282_s23, 64  ;;  %p5580_p3 = scmp.lt.u32.totalorder %s6503_s27, %s7282_s23 }
 0x1fe   : > { %p5577_p5 = pnand %p5576_p11, %p7266_p13  ;;  %p5581_p9 = scmp.lt.u32.totalorder %s5579_s5, %s5575_s20 }
 0x1ff   : > { %p5583_p4 = scmp.lt.u32.totalorder %s5575_s20, %s6503_s27 }
 0x200   : > { %p5578_p8 = pneg %p5577_p5  ;;  %p5582_p6 = por %p5581_p9, %p5580_p3 }
 0x202   : > { %p5584_p12 = por %p5583_p4, %p5582_p6 }
 0x204   : > { %p5585_p10 = pnand %p5584_p12, %p5578_p8 }
 0x206   : > { %5588 = shalt.err (!%p5585_p10)
}
 0x207   : > { %s5589_s9 = scalar_lea.vmem %s898_s29, 32  ;;  %s5776_s0 = smov [#allocation28]  }
 0x208   : > { %p5590_p0 = scmp.ne.s32.totalorder %s898_s29, %s5589_s9  ;;  %s5593_s12 = sshll.u32 %s5776_s0, 4  ;;  %s5594_s12 = int_to_ptr.vmem [resolvable:$false] %s5593_s12 }
 0x209   : > { %s5595_s3 = scalar_lea.vmem %s5594_s12, 64  ;;  %p5596_p1 = scmp.lt.s32.totalorder %s898_s29, %s5594_s12 }
 0x20a   : > { %p5591_p2 = pnand %p5590_p0, %p7266_p13  ;;  %p5597_p11 = scmp.lt.s32.totalorder %s5595_s3, %s5589_s9 }
 0x20c   : > { %p5592_p7 = pneg %p5591_p2  ;;  %p5598_p5 = por %p5597_p11, %p5596_p1 }
 0x20e   : > { %p5599_p3 = pnand %p5598_p5, %p5592_p7 }
 0x210   : > { %5602 = shalt.err (!%p5599_p3)
}
 0x211   : > { %4603 = dma.hbm_to_vmem [thread:$0]  (%p7266_p13), %s6503_s27, 32, %s898_s29, %s6056_s26  }
 0x212 PF: > { %p7283_p8 = scmp.ne.s32.totalorder %s7259_s18, 0 }
 0x213   : > { %s7284_s4 = sld [smem:[#allocation42_spill]] (!%p7283_p8)  ;;  %s7285_s30 = sld [smem:[#allocation37_spill]] (!%p7283_p8) }
 0x214   : > { %906 = sbr.rel (%p7283_p8) target bundleno = 3794 (0xed2), region = 92  ;;  %s7286_s28 = sld [smem:[#allocation45_spill]] (!%p7283_p8) }
 0x219   : > { %s908_s22 = sand.u32 (!%p7283_p8), 1, %s7284_s4   ;;  %s7216_s25 = sand.u32 (!%p7283_p8), 1, %s7285_s30  }
 0x21a   : > { %s6555_s19 = sshll.u32 (!%p7283_p8), %s7216_s25, 5  ;;  %s909_s15 = scalar_lea.sflag (!%p7283_p8), [#allocation9], %s908_s22 }
 0x21b   : > { %s6558_s20 = scalar_lea.vmem [#allocation8], %s6555_s19  ;;  %p7287_p9 = scmp.ne.s32.totalorder %s7286_s28, 0 }
 0x21d   : > { %5684 = dma.done.wait (%p7287_p9), %s909_s15, 512  }
 0x21e   : > { %5686 = vsyncadd (%p7287_p9), %s909_s15, 4294966784  ;;  %p7288_p13 = scmp.eq.s32.totalorder %s7284_s4, 0 }
 0x220   : > { %5688 = dma.done.wait (%p7288_p13), [#allocation12], 256   ;;  %p7289_p6 = pmov %p7288_p13 }
 0x221   : > { %s7290_s13 = sld [smem:[#allocation34_spill]]  ;;  %s7291_s18 = sld [smem:[#allocation48_spill]] }
 0x222   : > { %5690 = vsyncadd (%p7289_p6), [#allocation12], 4294967040 }
 0x227   : > { %s923_s26 = sand.u32 1, %s7290_s13   ;;  %p7292_p4 = scmp.ne.s32.totalorder %s7291_s18, 0 }
 0x228   : > { %s6569_s27 = sshll.u32 %s923_s26, 1 }
 0x229   : > { %s925_s29 = scalar_lea.vmem [#allocation13], %s6569_s27 }
 0x22a   : > { %5692 = dma.done.wait (%p7292_p4), %s909_s15, 49568  }
 0x22b   : > { %5694 = vsyncadd (%p7292_p4), %s909_s15, 4294917728  ;;  %s4232_s1 = sshll.u32 %s923_s26, 8  ;;  %s4242_s7 = sshll.u32 %s923_s26, 10 }
 0x22c   : > { %s4243_s5 = sshll.u32 %s923_s26, 3  ;;  %s6577_s6 = scalar_lea.vmem [#allocation15], %s4232_s1 }
 0x22d   : > { %s6580_s0 = scalar_lea.vmem [#allocation17], %s4232_s1  ;;  %s970_s12 = scalar_lea.vmem [#allocation18], %s6569_s27 }
 0x22e   : > { %s6583_s3 = scalar_lea.vmem [#allocation19], %s4232_s1  ;;  %s988_s4 = scalar_lea.vmem [#allocation20], %s6569_s27 }
 0x22f   : > { %s6586_s30 = scalar_lea.vmem [#allocation21], %s4232_s1  ;;  %s1006_s28 = scalar_lea.vmem [#allocation22], %s6569_s27 }
 0x230   : > { %s1015_s22 = scalar_lea.vmem [#allocation23], %s6569_s27  ;;  %s1024_s15 = scalar_lea.vmem [#allocation24], %s6569_s27 }
 0x231   : > { %s6591_s13 = scalar_lea.vmem [#allocation25], %s4242_s7  ;;  %s6593_s18 = scalar_lea.vmem [#allocation26], %s4243_s5 }
 0x232   : > { %s6595_s26 = scalar_lea.vmem [#allocation27], %s4242_s7  ;;  %s1060_s25 = scalar_lea.vmem [#allocation28], %s6569_s27 }
 0x233   : > { %s6599_s14 = scalar_lea.vmem [#allocation29], %s6555_s19  ;;  %s7293_s9 = sld [smem:[#allocation39_spill]] }
 0x239   : > { %p4247_p12 = scmp.ne.s32.totalorder %s7293_s9, 0 }
 0x23a   : > { %v1198_v0 = vld [vmem:[%s6558_s20] sm:$0xff] (!%p4247_p12)  ;;  %v1199_v1 = vld [vmem:[%s6558_s20 + $0x8] sm:$0xff] (!%p4247_p12)  ;;  %v1200_v2 = vld [vmem:[%s6558_s20 + $0x10] sm:$0xff] (!%p4247_p12) }
 0x23b   : > { %1197 = sbr.rel (%p4247_p12) target bundleno = 578 (0x242), region = 168  ;;  %1202 = vst [vmem:[#allocation2] sm:$0xff] (!%p4247_p12), %v1198_v0  ;;  %1203 = vst [vmem:[#allocation2 + $0x8] sm:$0xff] (!%p4247_p12), %v1199_v1  ;;  %v1201_v3 = vld [vmem:[%s6558_s20 + $0x18] sm:$0xff] (!%p4247_p12) }
 0x23c   : > { %1204 = vst [vmem:[#allocation2 + $0x10] sm:$0xff] (!%p4247_p12), %v1200_v2  ;;  %1205 = vst [vmem:[#allocation2 + $0x18] sm:$0xff] (!%p4247_p12), %v1201_v3 }
 0x242 PF: > { %v6606_v4 = vld [vmem:[#allocation2] sm:$0xff]  ;;  %v6608_v5 = vld [vmem:[#allocation2 + $0x8] sm:$0xff]  ;;  %v4764_v15 = vld [vmem:[%s6580_s0 + $0x14] ss:$8 sps:$4 sm:$0xff]   ;;  %s7294_s19 = scalar_lea.vmem [#allocation14], %s6569_s27  ;;  %s7295_s20 = scalar_lea.vmem [#allocation16], %s6569_s27 }
 0x243   : > { %v6610_v6 = vld [vmem:[#allocation2 + $0x10] sm:$0xff]  ;;  %v1210_v7 = vadd.f32 %v6608_v5, %v6606_v4  ;;  %v6614_v8 = vld [vmem:[#allocation2 + $0x18] sm:$0xff]  ;;  %v4758_v12 = vld [vmem:[%s6580_s0 + $0x4] ss:$8 sps:$4 sm:$0xff]  }
 0x244   : > { %v1213_v9 = vadd.f32 %v6614_v8, %v6610_v6  ;;  %v4755_v10 = vld [vmem:[%s6577_s6 + $0x4] ss:$8 sps:$4 sm:$0xff]   ;;  %v4757_v11 = vld [vmem:[%s6577_s6] ss:$8 sps:$4 sm:$0xff]   ;;  %v4761_v14 = vld [vmem:[%s6577_s6 + $0x14] ss:$8 sps:$4 sm:$0xff]   ;;  %1736 = vmatprep.subr.bf16.mxu1 %v4758_v12 }
 0x245   : > { %1211 = vadd.xlane.f32.xlu0 %v1210_v7  ;;  %v4760_v13 = vld [vmem:[%s6580_s0] ss:$8 sps:$4 sm:$0xff]   ;;  %1481 = vmatprep.subr.bf16.mxu0 %v4755_v10  ;;  %v4763_v16 = vld [vmem:[%s6577_s6 + $0x10] ss:$8 sps:$4 sm:$0xff]   ;;  %v4766_v17 = vld [vmem:[%s6580_s0 + $0x10] ss:$8 sps:$4 sm:$0xff]  }
 0x246   : > { %1482 = vmatpush1.bf16.msra.mxu0 %v4757_v11  ;;  %1737 = vmatpush1.bf16.msra.mxu1 %v4760_v13  ;;  %v4767_v18 = vld [vmem:[%s6577_s6 + $0x24] ss:$8 sps:$4 sm:$0xff]   ;;  %v4770_v19 = vld [vmem:[%s6580_s0 + $0x24] ss:$8 sps:$4 sm:$0xff]   ;;  %v4773_v22 = vld [vmem:[%s6577_s6 + $0x34] ss:$8 sps:$4 sm:$0xff]  }
 0x247   : > { %1483 = vmatprep.subr.bf16.mxu0 %v4761_v14  ;;  %1738 = vmatprep.subr.bf16.mxu1 %v4764_v15  ;;  %v4769_v20 = vld [vmem:[%s6577_s6 + $0x20] ss:$8 sps:$4 sm:$0xff]   ;;  %v4772_v21 = vld [vmem:[%s6580_s0 + $0x20] ss:$8 sps:$4 sm:$0xff]   ;;  %v4775_v24 = vld [vmem:[%s6577_s6 + $0x30] ss:$8 sps:$4 sm:$0xff]  }
 0x248   : > { %v4776_v23 = vld [vmem:[%s6580_s0 + $0x34] ss:$8 sps:$4 sm:$0xff]   ;;  %v4778_v25 = vld [vmem:[%s6580_s0 + $0x30] ss:$8 sps:$4 sm:$0xff]   ;;  %v4779_v26 = vld [vmem:[%s6577_s6 + $0x44] ss:$8 sps:$4 sm:$0xff]  }
 0x249   : > { %1214 = vadd.xlane.f32.xlu0 %v1213_v9  ;;  %v4782_v27 = vld [vmem:[%s6580_s0 + $0x44] ss:$8 sps:$4 sm:$0xff]   ;;  %v4784_v29 = vld [vmem:[%s6580_s0 + $0x40] ss:$8 sps:$4 sm:$0xff]   ;;  %v4785_v30 = vld [vmem:[%s6577_s6 + $0x54] ss:$8 sps:$4 sm:$0xff]  }
 0x24a   : > { %1484 = vmatpush1.bf16.msra.mxu0 %v4763_v16  ;;  %1739 = vmatpush1.bf16.msra.mxu1 %v4766_v17  ;;  %v4781_v28 = vld [vmem:[%s6577_s6 + $0x40] ss:$8 sps:$4 sm:$0xff]   ;;  %v4787_v32 = vld [vmem:[%s6577_s6 + $0x50] ss:$8 sps:$4 sm:$0xff]   ;;  %v4790_v33 = vld [vmem:[%s6580_s0 + $0x50] ss:$8 sps:$4 sm:$0xff]  }
 0x24b   : > { %1485 = vmatprep.subr.bf16.mxu0 %v4767_v18  ;;  %1740 = vmatprep.subr.bf16.mxu1 %v4770_v19  ;;  %v4788_v31 = vld [vmem:[%s6580_s0 + $0x54] ss:$8 sps:$4 sm:$0xff]   ;;  %v4791_v34 = vld [vmem:[%s6577_s6 + $0x64] ss:$8 sps:$4 sm:$0xff]   ;;  %v4794_v35 = vld [vmem:[%s6580_s0 + $0x64] ss:$8 sps:$4 sm:$0xff]  }
 0x24c   : > { %v4793_v36 = vld [vmem:[%s6577_s6 + $0x60] ss:$8 sps:$4 sm:$0xff]   ;;  %v4796_v37 = vld [vmem:[%s6580_s0 + $0x60] ss:$8 sps:$4 sm:$0xff]   ;;  %v4797_v38 = vld [vmem:[%s6577_s6 + $0x74] ss:$8 sps:$4 sm:$0xff]  }
 0x24d   : > { %v4800_v39 = vld [vmem:[%s6580_s0 + $0x74] ss:$8 sps:$4 sm:$0xff]   ;;  %v4802_v41 = vld [vmem:[%s6580_s0 + $0x70] ss:$8 sps:$4 sm:$0xff]   ;;  %v4803_v42 = vld [vmem:[%s6577_s6 + $0x84] ss:$8 sps:$4 sm:$0xff]  }
 0x24e   : > { %1486 = vmatpush1.bf16.msra.mxu0 %v4769_v20  ;;  %1741 = vmatpush1.bf16.msra.mxu1 %v4772_v21  ;;  %v4799_v40 = vld [vmem:[%s6577_s6 + $0x70] ss:$8 sps:$4 sm:$0xff]   ;;  %v4805_v44 = vld [vmem:[%s6577_s6 + $0x80] ss:$8 sps:$4 sm:$0xff]   ;;  %v4808_v45 = vld [vmem:[%s6580_s0 + $0x80] ss:$8 sps:$4 sm:$0xff]  }
 0x24f   : > { %1487 = vmatprep.subr.bf16.mxu0 %v4773_v22  ;;  %1742 = vmatprep.subr.bf16.mxu1 %v4776_v23  ;;  %v4806_v43 = vld [vmem:[%s6580_s0 + $0x84] ss:$8 sps:$4 sm:$0xff]   ;;  %v4809_v46 = vld [vmem:[%s6577_s6 + $0x94] ss:$8 sps:$4 sm:$0xff]   ;;  %v4812_v62 = vld [vmem:[%s6580_s0 + $0x94] ss:$8 sps:$4 sm:$0xff]  }
 0x250   : > { %v4811_v61 = vld [vmem:[%s6577_s6 + $0x90] ss:$8 sps:$4 sm:$0xff]   ;;  %v4814_v63 = vld [vmem:[%s6580_s0 + $0x90] ss:$8 sps:$4 sm:$0xff]   ;;  %v4815_v0 = vld [vmem:[%s6577_s6 + $0xa4] ss:$8 sps:$4 sm:$0xff]  }
 0x251   : > { %v4817_v1 = vld [vmem:[%s6577_s6 + $0xa0] ss:$8 sps:$4 sm:$0xff]   ;;  %v4820_v3 = vld [vmem:[%s6580_s0 + $0xa0] ss:$8 sps:$4 sm:$0xff]   ;;  %v4821_v7 = vld [vmem:[%s6577_s6 + $0xb4] ss:$8 sps:$4 sm:$0xff]  }
 0x252   : > { %1488 = vmatpush1.bf16.msra.mxu0 %v4775_v24  ;;  %1743 = vmatpush1.bf16.msra.mxu1 %v4778_v25  ;;  %v4818_v2 = vld [vmem:[%s6580_s0 + $0xa4] ss:$8 sps:$4 sm:$0xff]   ;;  %v4824_v10 = vld [vmem:[%s6580_s0 + $0xb4] ss:$8 sps:$4 sm:$0xff]   ;;  %v4826_v11 = vld [vmem:[%s6580_s0 + $0xb0] ss:$8 sps:$4 sm:$0xff]  }
 0x253   : > { %1489 = vmatprep.subr.bf16.mxu0 %v4779_v26  ;;  %1744 = vmatprep.subr.bf16.mxu1 %v4782_v27  ;;  %v4823_v9 = vld [vmem:[%s6577_s6 + $0xb0] ss:$8 sps:$4 sm:$0xff]   ;;  %v4827_v12 = vld [vmem:[%s6577_s6 + $0xc4] ss:$8 sps:$4 sm:$0xff]   ;;  %v4829_v13 = vld [vmem:[%s6577_s6 + $0xc0] ss:$8 sps:$4 sm:$0xff]  }
 0x254   : > { %v4830_v14 = vld [vmem:[%s6580_s0 + $0xc4] ss:$8 sps:$4 sm:$0xff]   ;;  %v4832_v15 = vld [vmem:[%s6580_s0 + $0xc0] ss:$8 sps:$4 sm:$0xff]   ;;  %v4833_v16 = vld [vmem:[%s6577_s6 + $0xd4] ss:$8 sps:$4 sm:$0xff]  }
 0x255   : > { %v4836_v17 = vld [vmem:[%s6580_s0 + $0xd4] ss:$8 sps:$4 sm:$0xff]   ;;  %v4838_v19 = vld [vmem:[%s6580_s0 + $0xd0] ss:$8 sps:$4 sm:$0xff]   ;;  %v4839_v20 = vld [vmem:[%s6577_s6 + $0xe4] ss:$8 sps:$4 sm:$0xff]  }
 0x256   : > { %1490 = vmatpush1.bf16.msra.mxu0 %v4781_v28  ;;  %1745 = vmatpush1.bf16.msra.mxu1 %v4784_v29  ;;  %v4835_v18 = vld [vmem:[%s6577_s6 + $0xd0] ss:$8 sps:$4 sm:$0xff]   ;;  %v4841_v22 = vld [vmem:[%s6577_s6 + $0xe0] ss:$8 sps:$4 sm:$0xff]   ;;  %v4844_v23 = vld [vmem:[%s6580_s0 + $0xe0] ss:$8 sps:$4 sm:$0xff]  }
 0x257   : > { %1491 = vmatprep.subr.bf16.mxu0 %v4785_v30  ;;  %1746 = vmatprep.subr.bf16.mxu1 %v4788_v31  ;;  %v4842_v21 = vld [vmem:[%s6580_s0 + $0xe4] ss:$8 sps:$4 sm:$0xff]   ;;  %v4845_v24 = vld [vmem:[%s6577_s6 + $0xf4] ss:$8 sps:$4 sm:$0xff]   ;;  %v4848_v25 = vld [vmem:[%s6580_s0 + $0xf4] ss:$8 sps:$4 sm:$0xff]  }
 0x258   : > { %v4847_v26 = vld [vmem:[%s6577_s6 + $0xf0] ss:$8 sps:$4 sm:$0xff]   ;;  %v4850_v27 = vld [vmem:[%s6580_s0 + $0xf0] ss:$8 sps:$4 sm:$0xff]  }
 0x259   : > { %v4853_v28 = vld [vmem:[%s6583_s3 + $0x4] ss:$8 sps:$4 sm:$0xff]  }
 0x25a   : > { %1492 = vmatpush1.bf16.msra.mxu0 %v4787_v32  ;;  %1747 = vmatpush1.bf16.msra.mxu1 %v4790_v33  ;;  %v1245_v33 = vlaneseq }
 0x25b   : > { %1493 = vmatprep.subr.bf16.mxu0 %v4791_v34  ;;  %1748 = vmatprep.subr.bf16.mxu1 %v4794_v35 }
 0x25e   : > { %1494 = vmatpush1.bf16.msra.mxu0 %v4793_v36  ;;  %1749 = vmatpush1.bf16.msra.mxu1 %v4796_v37  ;;  %v6703_v36 = vshrl.u32 %v1245_v33, 7  ;;  %v6761_v33 = vld [vmem:[#allocation11 + $0x8] sm:$0xff] }
 0x25f   : > { %1495 = vmatprep.subr.bf16.mxu0 %v4797_v38  ;;  %1750 = vmatprep.subr.bf16.mxu1 %v4800_v39  ;;  %v1243_v39 = vld [vmem:[%s925_s29] sm:$0x3]  ;;  %s6775_s29 = smov 0  }
 0x260   : > { %v6706_v37 = vsub.s32 1, %v6703_v36  ;;  %v6709_v38 = vsub.s32 0, %v6703_v36 }
 0x262   : > { %1496 = vmatpush1.bf16.msra.mxu0 %v4799_v40  ;;  %1751 = vmatpush1.bf16.msra.mxu1 %v4802_v41 }
 0x263   : > { %1497 = vmatprep.subr.bf16.mxu0 %v4803_v42  ;;  %1752 = vmatprep.subr.bf16.mxu1 %v4806_v43  ;;  %v1252_v42 = vrot.slane %v1243_v39, %v6706_v37  ;;  %v1259_v43 = vld [vmem:[%s7294_s19] sm:$0x3] }
 0x266   : > { %1498 = vmatpush1.bf16.msra.mxu0 %v4805_v44  ;;  %1753 = vmatpush1.bf16.msra.mxu1 %v4808_v45  ;;  %v1248_v45 = vrot.slane %v1243_v39, %v6709_v38 }
 0x267   : > { %1499 = vmatprep.subr.bf16.mxu0 %v4809_v46  ;;  %1754 = vmatprep.subr.bf16.mxu1 %v4812_v62  ;;  %v4851_v62 = vld [vmem:[%s6583_s3] ss:$8 sps:$4 sm:$0xff]  }
 0x26a   : > { %1500 = vmatpush1.bf16.msra.mxu0 %v4811_v61  ;;  %1755 = vmatpush1.bf16.msra.mxu1 %v4814_v63 }
 0x26b   : > { %1501 = vmatprep.subr.bf16.mxu0 %v4815_v0  ;;  %1756 = vmatprep.subr.bf16.mxu1 %v4818_v2  ;;  %v4859_v0 = vld [vmem:[%s6583_s3 + $0x24] ss:$8 sps:$4 sm:$0xff]   ;;  %v4862_v2 = vld [vmem:[%s6583_s3 + $0x34] ss:$8 sps:$4 sm:$0xff]  }
 0x26e   : > { %1502 = vmatpush1.bf16.msra.mxu0 %v4817_v1  ;;  %1757 = vmatpush1.bf16.msra.mxu1 %v4820_v3  ;;  %v4857_v1 = vld [vmem:[%s6583_s3 + $0x20] ss:$8 sps:$4 sm:$0xff]   ;;  %v4860_v3 = vld [vmem:[%s6583_s3 + $0x30] ss:$8 sps:$4 sm:$0xff]  }
 0x26f   : > { %1503 = vmatprep.subr.bf16.mxu0 %v4821_v7  ;;  %1758 = vmatprep.subr.bf16.mxu1 %v4824_v10  ;;  %v4865_v7 = vld [vmem:[%s6583_s3 + $0x44] ss:$8 sps:$4 sm:$0xff]   ;;  %v4868_v10 = vld [vmem:[%s6583_s3 + $0x54] ss:$8 sps:$4 sm:$0xff]  }
 0x272   : > { %1504 = vmatpush1.bf16.msra.mxu0 %v4823_v9  ;;  %1759 = vmatpush1.bf16.msra.mxu1 %v4826_v11  ;;  %v4863_v9 = vld [vmem:[%s6583_s3 + $0x40] ss:$8 sps:$4 sm:$0xff]   ;;  %v4866_v11 = vld [vmem:[%s6583_s3 + $0x50] ss:$8 sps:$4 sm:$0xff]  }
 0x273   : > { %1505 = vmatprep.subr.bf16.mxu0 %v4827_v12  ;;  %1760 = vmatprep.subr.bf16.mxu1 %v4830_v14  ;;  %v4871_v12 = vld [vmem:[%s6583_s3 + $0x64] ss:$8 sps:$4 sm:$0xff]   ;;  %v4874_v14 = vld [vmem:[%s6583_s3 + $0x74] ss:$8 sps:$4 sm:$0xff]  }
 0x276   : > { %1506 = vmatpush1.bf16.msra.mxu0 %v4829_v13  ;;  %1761 = vmatpush1.bf16.msra.mxu1 %v4832_v15  ;;  %v4869_v13 = vld [vmem:[%s6583_s3 + $0x60] ss:$8 sps:$4 sm:$0xff]   ;;  %v4872_v15 = vld [vmem:[%s6583_s3 + $0x70] ss:$8 sps:$4 sm:$0xff]  }
 0x277   : > { %1507 = vmatprep.subr.bf16.mxu0 %v4833_v16  ;;  %1762 = vmatprep.subr.bf16.mxu1 %v4836_v17  ;;  %v4877_v16 = vld [vmem:[%s6583_s3 + $0x84] ss:$8 sps:$4 sm:$0xff]   ;;  %v4875_v17 = vld [vmem:[%s6583_s3 + $0x80] ss:$8 sps:$4 sm:$0xff]  }
 0x27a   : > { %1508 = vmatpush1.bf16.msra.mxu0 %v4835_v18  ;;  %1763 = vmatpush1.bf16.msra.mxu1 %v4838_v19  ;;  %v4880_v18 = vld [vmem:[%s6583_s3 + $0x94] ss:$8 sps:$4 sm:$0xff]   ;;  %v4878_v19 = vld [vmem:[%s6583_s3 + $0x90] ss:$8 sps:$4 sm:$0xff]  }
 0x27b   : > { %1509 = vmatprep.subr.bf16.mxu0 %v4839_v20  ;;  %1764 = vmatprep.subr.bf16.mxu1 %v4842_v21  ;;  %v4883_v20 = vld [vmem:[%s6583_s3 + $0xa4] ss:$8 sps:$4 sm:$0xff]   ;;  %v4881_v21 = vld [vmem:[%s6583_s3 + $0xa0] ss:$8 sps:$4 sm:$0xff]  }
 0x27e   : > { %1510 = vmatpush1.bf16.msra.mxu0 %v4841_v22  ;;  %1765 = vmatpush1.bf16.msra.mxu1 %v4844_v23  ;;  %v4886_v22 = vld [vmem:[%s6583_s3 + $0xb4] ss:$8 sps:$4 sm:$0xff]   ;;  %v4884_v23 = vld [vmem:[%s6583_s3 + $0xb0] ss:$8 sps:$4 sm:$0xff]  }
 0x27f   : > { %1511 = vmatprep.subr.bf16.mxu0 %v4845_v24  ;;  %1766 = vmatprep.subr.bf16.mxu1 %v4848_v25  ;;  %v4889_v24 = vld [vmem:[%s6583_s3 + $0xc4] ss:$8 sps:$4 sm:$0xff]   ;;  %v4887_v25 = vld [vmem:[%s6583_s3 + $0xc0] ss:$8 sps:$4 sm:$0xff]  }
 0x282   : > { %1512 = vmatpush1.bf16.msra.mxu0 %v4847_v26  ;;  %1767 = vmatpush1.bf16.msra.mxu1 %v4850_v27  ;;  %v4892_v26 = vld [vmem:[%s6583_s3 + $0xd4] ss:$8 sps:$4 sm:$0xff]   ;;  %v4890_v27 = vld [vmem:[%s6583_s3 + $0xd0] ss:$8 sps:$4 sm:$0xff]  }
 0x283   : > { %1987 = vmatprep.subr.bf16.mxu0 %v4853_v28  ;;  %v4895_v28 = vld [vmem:[%s6583_s3 + $0xe4] ss:$8 sps:$4 sm:$0xff]  }
 0x2d2   : > { %v1212_v47 = vpop.xlane.xlu0 %1211 }
 0x2d3   : > { %v1217_v48 = vmul.f32 0.00390625, %v1212_v47  ;;  %v1268_v47 = vrot.slane %v1259_v43, %v6706_v37 }
 0x2d5   : > { %v6656_v49 = vsub.f32 %v6606_v4, %v1217_v48  ;;  %v6659_v50 = vsub.f32 %v6608_v5, %v1217_v48  ;;  %v1264_v48 = vrot.slane %v1259_v43, %v6709_v38 }
 0x2d6   : > { %v1215_v51 = vpop.xlane.xlu0 %1214 }
 0x2d7   : > { %v1218_v52 = vmul.f32 0.00390625, %v1215_v51  ;;  %v1223_v53 = vmul.f32 %v6656_v49, %v6656_v49  ;;  %v1224_v54 = vmul.f32 %v6659_v50, %v6659_v50 }
 0x2d9   : > { %v6666_v55 = vsub.f32 %v6610_v6, %v1218_v52  ;;  %v6669_v56 = vsub.f32 %v6614_v8, %v1218_v52  ;;  %v1227_v57 = vadd.f32 %v1224_v54, %v1223_v53 }
 0x2db   : > { %1228 = vadd.xlane.f32.xlu1 %v1227_v57  ;;  %v1225_v58 = vmul.f32 %v6666_v55, %v6666_v55  ;;  %v1226_v59 = vmul.f32 %v6669_v56, %v6669_v56 }
 0x2dd   : > { %v1230_v60 = vadd.f32 %v1226_v59, %v1225_v58 }
 0x2df   : > { %1231 = vadd.xlane.f32.xlu1 %v1230_v60 }
 0x368   : > { %v1229_v29 = vpop.xlane.xlu1 %1228 }
 0x369   : > { %v1233_v30 = vmul.f32 0.00390625, %v1229_v29  ;;  %v4893_v29 = vld [vmem:[%s6583_s3 + $0xe0] ss:$8 sps:$4 sm:$0xff]  }
 0x36b   : > { %v1235_v31 = vadd.f32 1e-05, %v1233_v30  ;;  %v4898_v30 = vld [vmem:[%s6583_s3 + $0xf4] ss:$8 sps:$4 sm:$0xff]  }
 0x36c   : > { %v1232_v32 = vpop.xlane.xlu1 %1231 }
 0x36d   : > { %4899 = vrsqrt.f32 %v1235_v31  ;;  %v1234_v34 = vmul.f32 0.00390625, %v1232_v32  ;;  %v4896_v31 = vld [vmem:[%s6583_s3 + $0xf0] ss:$8 sps:$4 sm:$0xff]   ;;  %v6759_v32 = vld [vmem:[#allocation11] sm:$0xff] }
 0x36f   : > { %v1236_v35 = vadd.f32 1e-05, %v1234_v34  ;;  %v1309_v34 = vld [vmem:[%s7295_s20] sm:$0x3] }
 0x370   : > { %v1314_v39 = vrot.slane %v1309_v34, %v6709_v38 }
 0x371   : > { %4901 = vrsqrt.f32 %v1236_v35  ;;  %v1564_v35 = vld [vmem:[%s970_s12] sm:$0x3] }
 0x377   : > { %v4900_v40 = vpop.eup %4899 }
 0x378   : > { %v1240_v41 = vmul.f32 %v4900_v40, %v6659_v50  ;;  %v1239_v44 = vmul.f32 %v4900_v40, %v6656_v49  ;;  %v1318_v40 = vrot.slane %v1309_v34, %v6706_v37 }
 0x37a   : > { %v1256_v52 = vmul.f32 %v1252_v42, %v1240_v41  ;;  %v1255_v53 = vmul.f32 %v1248_v45, %v1239_v44  ;;  %v1569_v41 = vrot.slane %v1564_v35, %v6709_v38  ;;  %v1573_v44 = vrot.slane %v1564_v35, %v6706_v37 }
 0x37b   : > { %v4902_v46 = vpop.eup %4901 }
 0x37c   : > { %v1242_v51 = vmul.f32 %v4902_v46, %v6669_v56  ;;  %v1241_v50 = vmul.f32 %v4902_v46, %v6666_v55  ;;  %v1272_v58 = vadd.f32 %v1268_v47, %v1256_v52  ;;  %v1271_v59 = vadd.f32 %v1264_v48, %v1255_v53  ;;  %v4856_v56 = vld [vmem:[%s6583_s3 + $0x14] ss:$8 sps:$4 sm:$0xff]   ;;  %v4854_v55 = vld [vmem:[%s6583_s3 + $0x10] ss:$8 sps:$4 sm:$0xff]  }
 0x37e   : > { %v1258_v54 = vmul.f32 %v1252_v42, %v1242_v51  ;;  %v1257_v57 = vmul.f32 %v1248_v45, %v1241_v50 }
 0x380   : > { %v1274_v49 = vadd.f32 %v1268_v47, %v1258_v54  ;;  %v1273_v60 = vadd.f32 %v1264_v48, %v1257_v57 }
 0x382   : > { %v1276_v61 = vpack.c.bf16 %v1274_v49, %v1272_v58  ;;  %v6724_v63 = vpack.c.bf16 %v1273_v60, %v1271_v59 }
 0x384   : > { %1513 = vmatprep.mubr.bf16.mxu0 %v1276_v61  ;;  %1768 = vmatprep.mubr.bf16.mxu1 %v1276_v61 }
 0x385   : > { %1514 = vmatmul.mubr.bf16.vlgmr.msra.gmra.mrb[0].mxu0 %v6724_v63  ;;  %1769 = vmatmul.mubr.bf16.vlgmr.msra.gmra.mrb[0].mxu1 %v6724_v63 }
 0x386   : > { %1988 = vmatpush1.bf16.msra.mxu0 %v4851_v62  ;;  %2019 = vmatprep.mubr.bf16.mxu0 %v1276_v61 }
 0x387   : > { %1989 = vmatprep.subr.bf16.mxu0 %v4856_v56 }
 0x38a   : > { %1990 = vmatpush1.bf16.msra.mxu0 %v4854_v55 }
 0x38b   : > { %1991 = vmatprep.subr.bf16.mxu0 %v4859_v0 }
 0x38e   : > { %1992 = vmatpush1.bf16.msra.mxu0 %v4857_v1 }
 0x38f   : > { %1993 = vmatprep.subr.bf16.mxu0 %v4862_v2 }
 0x392   : > { %1994 = vmatpush1.bf16.msra.mxu0 %v4860_v3  ;;  %v1815_v3 = vld [vmem:[%s988_s4] sm:$0x3] }
 0x393   : > { %1995 = vmatprep.subr.bf16.mxu0 %v4865_v7  ;;  %v1820_v7 = vrot.slane %v1815_v3, %v6709_v38 }
 0x396   : > { %1996 = vmatpush1.bf16.msra.mxu0 %v4863_v9 }
 0x397   : > { %1997 = vmatprep.subr.bf16.mxu0 %v4868_v10  ;;  %v1824_v10 = vrot.slane %v1815_v3, %v6706_v37 }
 0x39a   : > { %1998 = vmatpush1.bf16.msra.mxu0 %v4866_v11 }
 0x39b   : > { %1999 = vmatprep.subr.bf16.mxu0 %v4871_v12 }
 0x39e   : > { %2000 = vmatpush1.bf16.msra.mxu0 %v4869_v13 }
 0x39f   : > { %2001 = vmatprep.subr.bf16.mxu0 %v4874_v14 }
 0x3a2   : > { %2002 = vmatpush1.bf16.msra.mxu0 %v4872_v15 }
 0x3a3   : > { %2003 = vmatprep.subr.bf16.mxu0 %v4877_v16 }
 0x3a6   : > { %2004 = vmatpush1.bf16.msra.mxu0 %v4875_v17 }
 0x3a7   : > { %2005 = vmatprep.subr.bf16.mxu0 %v4880_v18 }
 0x3aa   : > { %2006 = vmatpush1.bf16.msra.mxu0 %v4878_v19 }
 0x3ab   : > { %2007 = vmatprep.subr.bf16.mxu0 %v4883_v20 }
 0x3ae   : > { %2008 = vmatpush1.bf16.msra.mxu0 %v4881_v21 }
 0x3af   : > { %2009 = vmatprep.subr.bf16.mxu0 %v4886_v22 }
 0x3b2   : > { %2010 = vmatpush1.bf16.msra.mxu0 %v4884_v23 }
 0x3b3   : > { %2011 = vmatprep.subr.bf16.mxu0 %v4889_v24 }
 0x3b6   : > { %2012 = vmatpush1.bf16.msra.mxu0 %v4887_v25 }
 0x3b7   : > { %2013 = vmatprep.subr.bf16.mxu0 %v4892_v26 }
 0x3ba   : > { %2014 = vmatpush1.bf16.msra.mxu0 %v4890_v27 }
 0x3bb   : > { %2015 = vmatprep.subr.bf16.mxu0 %v4895_v28 }
 0x3be   : > { %2016 = vmatpush1.bf16.msra.mxu0 %v4893_v29 }
 0x3bf   : > { %2017 = vmatprep.subr.bf16.mxu0 %v4898_v30 }
 0x3c2   : > { %2018 = vmatpush1.bf16.msra.mxu0 %v4896_v31 }
 0x3c5   : > { %2020 = vmatmul.mubr.bf16.vlgmr.msra.gmra.mrb[4].mxu0 %v6724_v63 }
 0x458   : > { %v1515_v42 = vpop.f32.mrb[0].mxu0  ;;  %v1770_v43 = vpop.f32.mrb[0].mxu1 }
 0x459   : > { %v1516_v45 = vadd.f32 %v1515_v42, %v1314_v39  ;;  %v1517_v46 = vpop.f32.mrb[1].mxu0  ;;  %v1772_v47 = vpop.f32.mrb[1].mxu1  ;;  %v1771_v50 = vadd.f32 %v1770_v43, %v1569_v41 }
 0x45a   : > { %v1518_v48 = vadd.f32 %v1517_v46, %v1318_v40  ;;  %v1519_v51 = vpop.f32.mrb[2].mxu0  ;;  %v1774_v52 = vpop.f32.mrb[2].mxu1  ;;  %v1773_v49 = vadd.f32 %v1772_v47, %v1573_v44 }
 0x45b   : > { %v1520_v53 = vadd.f32 %v1519_v51, %v1314_v39  ;;  %v1775_v54 = vadd.f32 %v1774_v52, %v1569_v41  ;;  %v1521_v57 = vpop.f32.mrb[3].mxu0  ;;  %v1776_v58 = vpop.f32.mrb[3].mxu1  ;;  %v1524_v61 = vmul.f32 0.125, %v1516_v45 }
 0x45c   : > { %v1522_v59 = vadd.f32 %v1521_v57, %v1318_v40  ;;  %v1777_v60 = vadd.f32 %v1776_v58, %v1573_v44  ;;  %v1525_v56 = vmul.f32 0.125, %v1518_v48 }
 0x45d   : > { %v1526_v62 = vmul.f32 0.125, %v1520_v53  ;;  %v1779_v63 = vpack.c.bf16 %v1775_v54, %v1771_v50 }
 0x45e   : > { %v1527_v55 = vmul.f32 0.125, %v1522_v59  ;;  %v1780_v0 = vpack.c.bf16 %v1777_v60, %v1773_v49 }
 0x45f   : > { %v1528_v1 = vpack.c.bf16 %v1526_v62, %v1524_v61  ;;  %1781 = vst [vmem:[#allocation4] sm:$0xff] %v1779_v63 }
 0x460   : > { %v1529_v2 = vpack.c.bf16 %v1527_v55, %v1525_v56  ;;  %1782 = vst [vmem:[#allocation4 + $0x8] sm:$0xff] %v1780_v0 }
 0x461   : > { %1530 = vst [vmem:[#allocation3] sm:$0xff] %v1528_v1 }
 0x462   : > { %1531 = vst [vmem:[#allocation3 + $0x8] sm:$0xff] %v1529_v2 }
 0x498   : > { %v2021_v9 = vpop.f32.mrb[4].mxu0 }
 0x499   : > { %v2023_v11 = vpop.f32.mrb[5].mxu0  ;;  %v2022_v13 = vadd.f32 %v2021_v9, %v1820_v7 }
 0x49a   : > { %v2025_v12 = vpop.f32.mrb[6].mxu0  ;;  %v2024_v16 = vadd.f32 %v2023_v11, %v1824_v10 }
 0x49b   : > { %v2026_v14 = vadd.f32 %v2025_v12, %v1820_v7  ;;  %v2027_v15 = vpop.f32.mrb[7].mxu0 }
 0x49c   : > { %v2028_v17 = vadd.f32 %v2027_v15, %v1824_v10 }
 0x49d   : > { %v2030_v18 = vpack.c.bf16 %v2026_v14, %v2022_v13 }
 0x49e   : > { %v2031_v19 = vpack.c.bf16 %v2028_v17, %v2024_v16 }
 0x49f   : > { %2032 = vst [vmem:[#allocation5] sm:$0xff] %v2030_v18 }
 0x4a0   : > { %2033 = vst [vmem:[#allocation5 + $0x8] sm:$0xff] %v2031_v19 }
 0x4a1 LB: >> { %v5777_v20 = vmov 0.0   ;;  %vm5778_vm0 = vmmov 0   ;;  %s4344_s1 = sshll.u32 %s5745_s29, 7  ;;  %vm2054_vm1 = vcmask 523264   ;;  %vm2102_vm2 = vcmask 130048   ;;  %s5779_s0 = smov 64   ;;  %s5745_s29 = sphi %s6775_s29, %s2041_s29  }
 0x4a2   : >> { %4557 = vmatprep.subr.bf16.mxu0 %v5777_v20  ;;  %4559 = vmatprep.mubr.msk.bf16.mxu0 %vm5778_vm0, %v5777_v20  ;;  %s2043_s7 = sshra.s32 %s4344_s1, 7  ;;  %s2041_s29 = sadd.s32 1, %s5745_s29  }
 0x4a3   : >> { %4563 = vmatprep.subr.bf16.mxu1 %v5777_v20  ;;  %4565 = vmatprep.mubr.msk.bf16.mxu1 %vm5778_vm0, %v5777_v20  ;;  %s6787_s5 = sshll.u32 %s2043_s7, 3  ;;  %p2038_p10 = scmp.ge.s32.totalorder %s2041_s29, 2  }
 0x4a4   : >> { %s2049_s6 = scalar_lea.vmem [#allocation4], %s6787_s5  ;;  %s2046_s9 = scalar_lea.vmem [#allocation3], %s6787_s5 }
 0x4a5   : >> { %v2050_v21 = vld [vmem:[%s2049_s6] sm:$0xff]  ;;  %s2052_s12 = scalar_lea.vmem [#allocation5], %s6787_s5  ;;  %s2304_s3 = scalar_lea.vmem [#allocation6], %s6787_s5 }
 0x4a6   : >> { %v2059_v22 = vsel %vm2054_vm1, %v2050_v21, 0  ;;  %v2047_v23 = vld [vmem:[%s2046_s9] sm:$0xff]  ;;  %s6893_s4 = smov (%p2038_p10), 0  }
 0x4a7   : >> { %4558 = vmatpush3.bf16.xpose.msra.mxu0 %v2059_v22  ;;  %v2053_v47 = vld [vmem:[%s2052_s12] sm:$0xff] }
 0x4a8   : >> { %4575 = vmatprep.subr.bf16.mxu0 %v5777_v20  ;;  %4564 = vmatpush3.bf16.msra.mxu1 %v2053_v47 }
 0x4a9   : >> { %4569 = vmatprep.subr.bf16.mxu1 %v5777_v20 }
 0x4ae   : >> { %4560 = vmatmul.mubr.msk.bf16.vlgmr.msra.gmra.mrb[0].mxu0 %vm2054_vm1, %v2047_v23 }
 0x4af   : >> { %4577 = vmatprep.mubr.msk.bf16.mxu0 %vm5778_vm0, %v5777_v20 }
 0x581   : >> { %v2095_v24 = vpop.f32.mrb[0].mxu0 }
 0x582   : >> { %v2096_v25 = vadd.f32 %v2095_v24, %v6759_v32  ;;  %v4561_v26 = vpop.f32.mrb[1].mxu0 }
 0x583   : >> { %v2098_v27 = vpop.f32.mrb[2].mxu0 }
 0x584   : >> { %v2099_v28 = vadd.f32 %v2098_v27, %v6761_v33  ;;  %v4562_v29 = vpop.f32.mrb[3].mxu0  ;;  %v2103_v30 = vsel %vm2102_vm2, %v2096_v25, -inf }
 0x585   : >> { %2104 = vmax.xlane.f32.xlu0 %v2103_v30 }
 0x586   : >> { %v2106_v31 = vsel %vm2102_vm2, %v2099_v28, -inf }
 0x589   : >> { %2107 = vmax.xlane.f32.xlu0 %v2106_v31 }
 0x59f   : >> { %2175 = vrot.lane.b32.xlu0 %v2050_v21, %s5779_s0 }
 0x612   : >> { %v2105_v34 = vpop.xlane.xlu0 %2104 }
 0x613   : >> { %v2109_v35 = vsub.f32 %v2096_v25, %v2105_v34 }
 0x615   : >> { %v2111_v39 = vmul.f32 1.442695, %v2109_v35 }
 0x616   : >> { %v2108_v40 = vpop.xlane.xlu0 %2107 }
 0x617   : >> { %4903 = vpow2.f32 %v2111_v39  ;;  %v2110_v41 = vsub.f32 %v2099_v28, %v2108_v40 }
 0x619   : >> { %v2113_v42 = vmul.f32 1.442695, %v2110_v41  ;;  %v4919_v41 = vld [vmem:[%s6586_s30 + $0x4] ss:$8 sps:$4 sm:$0xff] (%p2038_p10)  }
 0x61a   : >> { %v2176_v53 = vpop.permute.xlu0 %2175 }
 0x61b   : >> { %4905 = vpow2.f32 %v2113_v42  ;;  %v2181_v58 = vsel %vm2054_vm1, %v2176_v53, 0  ;;  %v4921_v42 = vld [vmem:[%s6586_s30] ss:$8 sps:$4 sm:$0xff] (%p2038_p10)  }
 0x621   : >> { %v4904_v43 = vpop.eup %4903 }
 0x622   : >> { %v2115_v44 = vsel %vm2102_vm2, %v4904_v43, 0.0 }
 0x623   : >> { %2116 = vadd.xlane.f32.xlu1 %v2115_v44  ;;  %v4924_v44 = vld [vmem:[%s6586_s30 + $0x10] ss:$8 sps:$4 sm:$0xff] (%p2038_p10)  }
 0x625   : >> { %v4906_v45 = vpop.eup %4905 }
 0x626   : >> { %v2118_v46 = vsel %vm2102_vm2, %v4906_v45, 0.0 }
 0x627   : >> { %2119 = vadd.xlane.f32.xlu1 %v2118_v46  ;;  %v4930_v46 = vld [vmem:[%s6586_s30 + $0x30] ss:$8 sps:$4 sm:$0xff] (%p2038_p10)  }
 0x638   : >> { %2172 = vrot.lane.b32.xlu1 %v2047_v23, %s5779_s0 }
 0x6b0   : >> { %v2117_v48 = vpop.xlane.xlu1 %2116 }
 0x6b1   : >> { %4907 = vrcp.f32 %v2117_v48  ;;  %v4933_v48 = vld [vmem:[%s6586_s30 + $0x40] ss:$8 sps:$4 sm:$0xff] (%p2038_p10)  }
 0x6b4   : >> { %v2120_v51 = vpop.xlane.xlu1 %2119 }
 0x6b5   : >> { %4909 = vrcp.f32 %v2120_v51  ;;  %v4934_v51 = vld [vmem:[%s6586_s30 + $0x54] ss:$8 sps:$4 sm:$0xff] (%p2038_p10)  }
 0x6b8   : >> { %v2173_v59 = vpop.permute.xlu1 %2172 }
 0x6bb   : >> { %v4908_v52 = vpop.eup %4907 }
 0x6bc   : >> { %v2123_v54 = vmul.f32 %v4908_v52, %v4904_v43  ;;  %v4922_v43 = vld [vmem:[%s6586_s30 + $0x14] ss:$8 sps:$4 sm:$0xff] (%p2038_p10)   ;;  %v4936_v52 = vld [vmem:[%s6586_s30 + $0x50] ss:$8 sps:$4 sm:$0xff] (%p2038_p10)  }
 0x6bf   : >> { %v4910_v50 = vpop.eup %4909 }
 0x6c0   : >> { %v2124_v57 = vmul.f32 %v4910_v50, %v4906_v45  ;;  %v4925_v45 = vld [vmem:[%s6586_s30 + $0x24] ss:$8 sps:$4 sm:$0xff] (%p2038_p10)  }
 0x6c1   : > { %v4937_v50 = vld [vmem:[%s6586_s30 + $0x64] ss:$8 sps:$4 sm:$0xff] (%p2038_p10)  }
 0x6c2   : >> { %v2125_v49 = vpack.c.bf16 %v2124_v57, %v2123_v54  ;;  %v4939_v54 = vld [vmem:[%s6586_s30 + $0x60] ss:$8 sps:$4 sm:$0xff] (%p2038_p10)   ;;  %v4940_v57 = vld [vmem:[%s6586_s30 + $0x74] ss:$8 sps:$4 sm:$0xff] (%p2038_p10)  }
 0x6c4   : >> { %4566 = vmatmul.mubr.msk.bf16.vlgmr.msra.gmra.mrb[0].mxu1 %vm2102_vm2, %v2125_v49  ;;  %v4943_v49 = vld [vmem:[%s6586_s30 + $0x84] ss:$8 sps:$4 sm:$0xff] (%p2038_p10)  }
 0x6c5   : >> { %4570 = vmatpush3.bf16.xpose.msra.mxu1 %v2181_v58  ;;  %4571 = vmatprep.mubr.msk.bf16.mxu1 %vm5778_vm0, %v5777_v20  ;;  %v4942_v58 = vld [vmem:[%s6586_s30 + $0x70] ss:$8 sps:$4 sm:$0xff] (%p2038_p10)  }
 0x6cc   : >> { %4572 = vmatmul.mubr.msk.bf16.vlgmr.msra.gmra.mrb[4].mxu1 %vm2054_vm1, %v2173_v59  ;;  %v4945_v59 = vld [vmem:[%s6586_s30 + $0x80] ss:$8 sps:$4 sm:$0xff] (%p2038_p10)  }
 0x797   : >> { %v2163_v60 = vpop.f32.mrb[0].mxu1 }
 0x798   : >> { %v4567_v61 = vpop.f32.mrb[1].mxu1 }
 0x799   : >> { %v2166_v62 = vpop.f32.mrb[2].mxu1  ;;  %v4948_v61 = vld [vmem:[%s6586_s30 + $0x90] ss:$8 sps:$4 sm:$0xff] (%p2038_p10)  }
 0x79a   : >> { %v2170_v63 = vpack.c.bf16 %v2166_v62, %v2163_v60  ;;  %v4568_v56 = vpop.f32.mrb[3].mxu1  ;;  %v4946_v60 = vld [vmem:[%s6586_s30 + $0x94] ss:$8 sps:$4 sm:$0xff] (%p2038_p10)   ;;  %v4949_v62 = vld [vmem:[%s6586_s30 + $0xa4] ss:$8 sps:$4 sm:$0xff] (%p2038_p10)  }
 0x79b   : > { %v4952_v56 = vld [vmem:[%s6586_s30 + $0xb4] ss:$8 sps:$4 sm:$0xff] (%p2038_p10)  }
 0x79f   : >> { %v2217_v55 = vpop.f32.mrb[4].mxu1 }
 0x7a0   : >> { %v2218_v0 = vadd.f32 %v2217_v55, %v6759_v32  ;;  %v4573_v1 = vpop.f32.mrb[5].mxu1  ;;  %v4927_v32 = vld [vmem:[%s6586_s30 + $0x20] ss:$8 sps:$4 sm:$0xff] (%p2038_p10)   ;;  %v4954_v55 = vld [vmem:[%s6586_s30 + $0xb0] ss:$8 sps:$4 sm:$0xff] (%p2038_p10)  }
 0x7a1   : >> { %v2220_v2 = vpop.f32.mrb[6].mxu1  ;;  %v4957_v1 = vld [vmem:[%s6586_s30 + $0xc0] ss:$8 sps:$4 sm:$0xff] (%p2038_p10)  }
 0x7a2   : >> { %v2221_v3 = vadd.f32 %v2220_v2, %v6761_v33  ;;  %v4574_v7 = vpop.f32.mrb[7].mxu1  ;;  %v2224_v9 = vsel %vm2102_vm2, %v2218_v0, -inf  ;;  %v4928_v33 = vld [vmem:[%s6586_s30 + $0x34] ss:$8 sps:$4 sm:$0xff] (%p2038_p10)  }
 0x7a3   : >> { %2225 = vmax.xlane.f32.xlu1 %v2224_v9  ;;  %v4958_v2 = vld [vmem:[%s6586_s30 + $0xd4] ss:$8 sps:$4 sm:$0xff] (%p2038_p10)   ;;  %v4961_v7 = vld [vmem:[%s6586_s30 + $0xe4] ss:$8 sps:$4 sm:$0xff] (%p2038_p10)   ;;  %v4963_v9 = vld [vmem:[%s6586_s30 + $0xe0] ss:$8 sps:$4 sm:$0xff] (%p2038_p10)  }
 0x7a4   : >> { %v2227_v10 = vsel %vm2102_vm2, %v2221_v3, -inf }
 0x7a5   : >> { %2228 = vmax.xlane.f32.xlu0 %v2227_v10  ;;  %v4964_v10 = vld [vmem:[%s6586_s30 + $0xf4] ss:$8 sps:$4 sm:$0xff] (%p2038_p10)  }
 0x830   : >> { %v2226_v11 = vpop.xlane.xlu1 %2225 }
 0x831   : >> { %v2230_v12 = vsub.f32 %v2218_v0, %v2226_v11  ;;  %v4955_v0 = vld [vmem:[%s6586_s30 + $0xc4] ss:$8 sps:$4 sm:$0xff] (%p2038_p10)   ;;  %v4966_v11 = vld [vmem:[%s6586_s30 + $0xf0] ss:$8 sps:$4 sm:$0xff] (%p2038_p10)  }
 0x832   : >> { %v2229_v13 = vpop.xlane.xlu0 %2228 }
 0x833   : >> { %v2232_v14 = vmul.f32 1.442695, %v2230_v12  ;;  %v2231_v15 = vsub.f32 %v2221_v3, %v2229_v13  ;;  %v4960_v3 = vld [vmem:[%s6586_s30 + $0xd0] ss:$8 sps:$4 sm:$0xff] (%p2038_p10)   ;;  %v2340_v13 = vld [vmem:[%s1006_s28] sm:$0x3] (%p2038_p10) }
 0x835   : >> { %4911 = vpow2.f32 %v2232_v14  ;;  %v2234_v16 = vmul.f32 1.442695, %v2231_v15  ;;  %v2345_v14 = vrot.slane (%p2038_p10), %v2340_v13, %v6709_v38  ;;  %v2349_v15 = vrot.slane (%p2038_p10), %v2340_v13, %v6706_v37 }
 0x837   : >> { %4913 = vpow2.f32 %v2234_v16 }
 0x83f   : >> { %v4912_v17 = vpop.eup %4911 }
 0x840   : >> { %v2236_v18 = vsel %vm2102_vm2, %v4912_v17, 0.0 }
 0x841   : >> { %v4914_v19 = vpop.eup %4913  ;;  %2237 = vadd.xlane.f32.xlu0 %v2236_v18 }
 0x842   : >> { %v2239_v20 = vsel %vm2102_vm2, %v4914_v19, 0.0 }
 0x843   : >> { %2240 = vadd.xlane.f32.xlu1 %v2239_v20 }
 0x857   : >> { %2248 = vrot.lane.b32.xlu0 %v2053_v47, %s5779_s0  ;;  %v4931_v47 = vld [vmem:[%s6586_s30 + $0x44] ss:$8 sps:$4 sm:$0xff] (%p2038_p10)  }
 0x8ce   : >> { %v2238_v21 = vpop.xlane.xlu0 %2237 }
 0x8cf   : >> { %4915 = vrcp.f32 %v2238_v21 }
 0x8d0   : >> { %v2241_v22 = vpop.xlane.xlu1 %2240 }
 0x8d1   : >> { %4917 = vrcp.f32 %v2241_v22 }
 0x8d2   : >> { %v2249_v23 = vpop.permute.xlu0 %2248 }
 0x8d3   : >> { %4576 = vmatpush3.bf16.msra.mxu0 %v2249_v23 }
 0x8d4   : > { %2512 = vmatprep.subr.bf16.mxu0 (%p2038_p10), %v4919_v41 }
 0x8d9   : >> { %v4916_v24 = vpop.eup %4915 }
 0x8da   : >> { %v2244_v26 = vmul.f32 %v4916_v24, %v4912_v17 }
 0x8db   : >> { %v4918_v25 = vpop.eup %4917 }
 0x8dc   : >> { %v2245_v27 = vmul.f32 %v4918_v25, %v4914_v19 }
 0x8de   : >> { %v2246_v28 = vpack.c.bf16 %v2245_v27, %v2244_v26 }
 0x8e0   : >> { %4578 = vmatmul.mubr.msk.bf16.vlgmr.msra.gmra.mrb[4].mxu0 %vm2102_vm2, %v2246_v28 }
 0x8e1   : > { %2513 = vmatpush1.bf16.msra.mxu0 (%p2038_p10), %v4921_v42 }
 0x8e2   : > { %2514 = vmatprep.subr.bf16.mxu0 (%p2038_p10), %v4922_v43 }
 0x8e5   : > { %2515 = vmatpush1.bf16.msra.mxu0 (%p2038_p10), %v4924_v44 }
 0x8e6   : > { %2516 = vmatprep.subr.bf16.mxu0 (%p2038_p10), %v4925_v45  ;;  %v5780_v45 = vmov (%p2038_p10), 0.0  }
 0x8e7   : > { %2625 = vst [vmem:[#allocation7] sm:$0xff] (%p2038_p10), %v5780_v45  ;;  %2626 = vst [vmem:[#allocation7 + $0x8] sm:$0xff] (%p2038_p10), %v5780_v45 }
 0x8e8   : > { %2627 = vst [vmem:[#allocation7 + $0x10] sm:$0xff] (%p2038_p10), %v5780_v45  ;;  %2628 = vst [vmem:[#allocation7 + $0x18] sm:$0xff] (%p2038_p10), %v5780_v45 }
 0x8e9   : > { %2517 = vmatpush1.bf16.msra.mxu0 (%p2038_p10), %v4927_v32 }
 0x8ea   : > { %2518 = vmatprep.subr.bf16.mxu0 (%p2038_p10), %v4928_v33 }
 0x8ed   : > { %2519 = vmatpush1.bf16.msra.mxu0 (%p2038_p10), %v4930_v46 }
 0x8ee   : > { %2520 = vmatprep.subr.bf16.mxu0 (%p2038_p10), %v4931_v47 }
 0x8f1   : > { %2521 = vmatpush1.bf16.msra.mxu0 (%p2038_p10), %v4933_v48 }
 0x8f2   : > { %2522 = vmatprep.subr.bf16.mxu0 (%p2038_p10), %v4934_v51 }
 0x8f5   : > { %2523 = vmatpush1.bf16.msra.mxu0 (%p2038_p10), %v4936_v52  ;;  %v2591_v52 = vld [vmem:[%s1015_s22] sm:$0x3] (%p2038_p10) }
 0x8f6   : > { %2524 = vmatprep.subr.bf16.mxu0 (%p2038_p10), %v4937_v50 }
 0x8f9   : > { %2525 = vmatpush1.bf16.msra.mxu0 (%p2038_p10), %v4939_v54  ;;  %v2600_v54 = vrot.slane (%p2038_p10), %v2591_v52, %v6706_v37 }
 0x8fa   : > { %2526 = vmatprep.subr.bf16.mxu0 (%p2038_p10), %v4940_v57  ;;  %v2607_v57 = vld [vmem:[%s1024_s15] sm:$0x3] (%p2038_p10) }
 0x8fd   : > { %2527 = vmatpush1.bf16.msra.mxu0 (%p2038_p10), %v4942_v58 }
 0x8fe   : > { %2528 = vmatprep.subr.bf16.mxu0 (%p2038_p10), %v4943_v49 }
 0x901   : > { %2529 = vmatpush1.bf16.msra.mxu0 (%p2038_p10), %v4945_v59 }
 0x902   : > { %2530 = vmatprep.subr.bf16.mxu0 (%p2038_p10), %v4946_v60  ;;  %v2612_v60 = vrot.slane (%p2038_p10), %v2607_v57, %v6709_v38 }
 0x905   : > { %2531 = vmatpush1.bf16.msra.mxu0 (%p2038_p10), %v4948_v61  ;;  %v2616_v61 = vrot.slane (%p2038_p10), %v2607_v57, %v6706_v37 }
 0x906   : > { %2532 = vmatprep.subr.bf16.mxu0 (%p2038_p10), %v4949_v62 }
 0x9b3   : >> { %v2288_v29 = vpop.f32.mrb[4].mxu0 }
 0x9b4   : >> { %v4579_v30 = vpop.f32.mrb[5].mxu0 }
 0x9b5   : >> { %v2291_v31 = vpop.f32.mrb[6].mxu0 }
 0x9b6   : >> { %v2295_v34 = vpack.c.bf16 %v2291_v31, %v2288_v29  ;;  %v4580_v35 = vpop.f32.mrb[7].mxu0 }
 0x9b8   : >> { %2297 = vrot.lane.b32.xlu1 %v2295_v34, %s5779_s0 }
 0xa26   : > { %2040 = sbr.rel (!%p2038_p10) target bundleno = 1185 (0x4a1), region = 342 }
 0xa2a   : >> { %v2298_v39 = vpop.permute.xlu1 %2297 }
 0xa2b   : >> { %v2301_v40 = vsel %vm2054_vm1, %v2170_v63, %v2298_v39  ;;  %v4951_v63 = vld [vmem:[%s6586_s30 + $0xa0] ss:$8 sps:$4 sm:$0xff] (%p2038_p10)  }
 0xa2c   : >> { %2305 = vst [vmem:[%s2304_s3] sm:$0xff] %v2301_v40  ;;  %2533 = vmatpush1.bf16.msra.mxu0 (%p2038_p10), %v4951_v63 }
 0xa2d   : > { %2534 = vmatprep.subr.bf16.mxu0 %v4952_v56 }
 0xa30   : > { %2535 = vmatpush1.bf16.msra.mxu0 %v4954_v55 }
 0xa31   : > { %2536 = vmatprep.subr.bf16.mxu0 %v4955_v0 }
 0xa33   : > { %v2307_v53 = vld [vmem:[#allocation6 + $0x8] sm:$0xff]  ;;  %v2306_v12 = vld [vmem:[#allocation6] sm:$0xff] }
 0xa34   : > { %2544 = vmatprep.mubr.bf16.mxu0 %v2307_v53  ;;  %2537 = vmatpush1.bf16.msra.mxu0 %v4957_v1  ;;  %v2596_v53 = vrot.slane %v2591_v52, %v6709_v38 }
 0xa35   : > { %2538 = vmatprep.subr.bf16.mxu0 %v4958_v2 }
 0xa38   : > { %2539 = vmatpush1.bf16.msra.mxu0 %v4960_v3 }
 0xa39   : > { %2540 = vmatprep.subr.bf16.mxu0 %v4961_v7 }
 0xa3c   : > { %2541 = vmatpush1.bf16.msra.mxu0 %v4963_v9 }
 0xa3d   : > { %2542 = vmatprep.subr.bf16.mxu0 %v4964_v10 }
 0xa40   : > { %2543 = vmatpush1.bf16.msra.mxu0 %v4966_v11 }
 0xa43   : > { %2545 = vmatmul.mubr.bf16.vlgmr.msra.gmra.mrb[0].mxu0 %v2306_v12 }
 0xb16   : > { %v2546_v16 = vpop.f32.mrb[0].mxu0 }
 0xb17   : > { %v2547_v17 = vadd.f32 %v2546_v16, %v2345_v14  ;;  %v2548_v18 = vpop.f32.mrb[1].mxu0 }
 0xb18   : > { %v2549_v19 = vadd.f32 %v2548_v18, %v2349_v15  ;;  %v2550_v20 = vpop.f32.mrb[2].mxu0 }
 0xb19   : > { %v6862_v21 = vadd.f32 %v2547_v17, %v6606_v4  ;;  %v2551_v22 = vadd.f32 %v2550_v20, %v2345_v14  ;;  %v2552_v23 = vpop.f32.mrb[3].mxu0 }
 0xb1a   : > { %v6865_v24 = vadd.f32 %v2549_v19, %v6608_v5  ;;  %v2553_v25 = vadd.f32 %v2552_v23, %v2349_v15 }
 0xb1b   : > { %v6868_v26 = vadd.f32 %v2551_v22, %v6610_v6 }
 0xb1c   : > { %v6871_v27 = vadd.f32 %v2553_v25, %v6614_v8  ;;  %v2559_v28 = vadd.f32 %v6865_v24, %v6862_v21 }
 0xb1e   : > { %2560 = vadd.xlane.f32.xlu0 %v2559_v28  ;;  %v2562_v4 = vadd.f32 %v6871_v27, %v6868_v26 }
 0xb22   : > { %2563 = vadd.xlane.f32.xlu0 %v2562_v4 }
 0xbab   : > { %v2561_v29 = vpop.xlane.xlu0 %2560 }
 0xbac   : > { %v2565_v30 = vmul.f32 0.00390625, %v2561_v29 }
 0xbae   : > { %v2567_v5 = vsub.f32 %v6862_v21, %v2565_v30  ;;  %v2568_v31 = vsub.f32 %v6865_v24, %v2565_v30 }
 0xbaf   : > { %v2564_v34 = vpop.xlane.xlu0 %2563 }
 0xbb0   : > { %v2566_v6 = vmul.f32 0.00390625, %v2564_v34  ;;  %v2571_v35 = vmul.f32 %v2567_v5, %v2567_v5  ;;  %v2572_v39 = vmul.f32 %v2568_v31, %v2568_v31 }
 0xbb2   : > { %v2569_v8 = vsub.f32 %v6868_v26, %v2566_v6  ;;  %v2570_v40 = vsub.f32 %v6871_v27, %v2566_v6  ;;  %v2575_v41 = vadd.f32 %v2572_v39, %v2571_v35 }
 0xbb4   : > { %2576 = vadd.xlane.f32.xlu1 %v2575_v41  ;;  %v2573_v42 = vmul.f32 %v2569_v8, %v2569_v8  ;;  %v2574_v43 = vmul.f32 %v2570_v40, %v2570_v40 }
 0xbb6   : > { %v2578_v44 = vadd.f32 %v2574_v43, %v2573_v42 }
 0xbb8   : > { %2579 = vadd.xlane.f32.xlu1 %v2578_v44 }
 0xc41   : > { %v2577_v32 = vpop.xlane.xlu1 %2576 }
 0xc42   : > { %v2581_v33 = vmul.f32 0.00390625, %v2577_v32 }
 0xc44   : > { %v2583_v46 = vadd.f32 1e-05, %v2581_v33 }
 0xc45   : > { %v2580_v47 = vpop.xlane.xlu1 %2579 }
 0xc46   : > { %4967 = vrsqrt.f32 %v2583_v46  ;;  %v2582_v48 = vmul.f32 0.00390625, %v2580_v47 }
 0xc48   : > { %v2584_v51 = vadd.f32 1e-05, %v2582_v48 }
 0xc4a   : > { %4969 = vrsqrt.f32 %v2584_v51 }
 0xc50   : > { %v4968_v50 = vpop.eup %4967 }
 0xc51   : > { %v2587_v58 = vmul.f32 %v4968_v50, %v2567_v5  ;;  %v2588_v49 = vmul.f32 %v4968_v50, %v2568_v31 }
 0xc53   : > { %v2603_v62 = vmul.f32 %v2596_v53, %v2587_v58  ;;  %v2604_v63 = vmul.f32 %v2600_v54, %v2588_v49 }
 0xc54   : > { %v4970_v59 = vpop.eup %4969 }
 0xc55   : > { %v2589_v56 = vmul.f32 %v4970_v59, %v2569_v8  ;;  %v2590_v55 = vmul.f32 %v4970_v59, %v2570_v40  ;;  %v2619_v2 = vadd.f32 %v2612_v60, %v2603_v62  ;;  %v2620_v3 = vadd.f32 %v2616_v61, %v2604_v63 }
 0xc57   : > { %v2605_v0 = vmul.f32 %v2596_v53, %v2589_v56  ;;  %v2606_v1 = vmul.f32 %v2600_v54, %v2590_v55 }
 0xc59   : > { %v2621_v7 = vadd.f32 %v2612_v60, %v2605_v0  ;;  %v2622_v9 = vadd.f32 %v2616_v61, %v2606_v1 }
 0xc5b   : > { %v6889_v10 = vpack.c.bf16 %v2621_v7, %v2619_v2  ;;  %v6891_v11 = vpack.c.bf16 %v2622_v9, %v2620_v3 }
 0xc5c LB: >> { %s4385_s30 = sshll.u32 %s5749_s4, 9  ;;  %s2634_s4 = sadd.s32 1, %s5749_s4   ;;  %s5749_s4 = sphi %s6893_s4, %s2634_s4  }
 0xc5d   : >> { %3079 = vmatprep.mubr.bf16.mxu1 %v6891_v11  ;;  %s6902_s28 = sshra.s32 %s4385_s30, 7  ;;  %s6925_s19 = scalar_lea.vmem %s6595_s26, %s4385_s30 [#allocation27] }
 0xc5e   : >> { %s4386_s22 = sshll.u32 %s6902_s28, 2  ;;  %v4971_v32 = vld [vmem:[%s6925_s19 + $0x4] ss:$8 sps:$4 sm:$0xff]   ;;  %v4973_v33 = vld [vmem:[%s6925_s19] ss:$8 sps:$4 sm:$0xff]   ;;  %s2704_s20 = scalar_lea.vmem %s6593_s18, %s6902_s28 [#allocation26] }
 0xc5f   : >> { %s6906_s15 = scalar_lea.vmem %s6591_s13, %s4386_s22 [#allocation25]  ;;  %v4974_v46 = vld [vmem:[%s6925_s19 + $0x14] ss:$8 sps:$4 sm:$0xff]   ;;  %3594 = vmatprep.subr.bf16.mxu0 %v4971_v32  ;;  %v4976_v52 = vld [vmem:[%s6925_s19 + $0x10] ss:$8 sps:$4 sm:$0xff]   ;;  %v4977_v53 = vld [vmem:[%s6925_s19 + $0x24] ss:$8 sps:$4 sm:$0xff]  }
 0xc60   : >> { %v2640_v12 = vld [vmem:[%s6906_s15] sm:$0xff]  ;;  %3595 = vmatpush1.bf16.msra.mxu0 %v4973_v33  ;;  %v4980_v60 = vld [vmem:[%s6925_s19 + $0x34] ss:$8 sps:$4 sm:$0xff]   ;;  %v4982_v61 = vld [vmem:[%s6925_s19 + $0x30] ss:$8 sps:$4 sm:$0xff]   ;;  %p2631_p0 = scmp.ge.s32.totalorder %s2634_s4, 2  }
 0xc61   : >> { %v2642_v13 = vld [vmem:[%s6906_s15 + $0x20] sm:$0xff]  ;;  %3596 = vmatprep.subr.bf16.mxu0 %v4974_v46  ;;  %v4986_v9 = vld [vmem:[%s6925_s19 + $0x54] ss:$8 sps:$4 sm:$0xff]   ;;  %v2649_v32 = vld [vmem:[%s6906_s15 + $0x88] sm:$0xff]  ;;  %s7296_s29 = sld [smem:[#allocation40_spill]] (%p2631_p0)  ;;  %s3734_s27 = sshll.u32 (%p2631_p0), %s6599_s14, 4  ;;  %s7082_s27 = int_to_ptr.vmem [resolvable:$true] %s3734_s27 }
 0xc62   : >> { %v2644_v14 = vld [vmem:[%s6906_s15 + $0x40] sm:$0xff]  ;;  %v4388_v15 = vcombine.high %v2640_v12, %v2642_v13  ;;  %v4387_v16 = vcombine.low %v2640_v12, %v2642_v13  ;;  %v4988_v13 = vld [vmem:[%s6925_s19 + $0x50] ss:$8 sps:$4 sm:$0xff]   ;;  %v2651_v33 = vld [vmem:[%s6906_s15 + $0xa8] sm:$0xff]  ;;  %s7298_s26 = sld [smem:[#allocation67_spill]] (%p2631_p0)  ;;  %s5603_s0 = scalar_lea.vmem (%p2631_p0), %s7082_s27, 512 }
 0xc63   : >> { %v2646_v17 = vld [vmem:[%s6906_s15 + $0x60] sm:$0xff]  ;;  %s7299_s7 = sld [smem:[#allocation49_spill]] (%p2631_p0)  ;;  %p5604_p2 = scmp.ne.s32.totalorder (%p2631_p0), %s7082_s27, %s5603_s0 }
 0xc64   : >> { %v4392_v18 = vcombine.high %v2644_v14, %v2646_v17  ;;  %v2648_v19 = vld [vmem:[%s6906_s15 + $0x80] sm:$0xff]  ;;  %3047 = vmatprep.subr.bf16.mxu1 %v4388_v15  ;;  %v4391_v22 = vcombine.low %v2644_v14, %v2646_v17  ;;  %3597 = vmatpush1.bf16.msra.mxu0 %v4976_v52  ;;  %v4397_v52 = vcombine.low %v2649_v32, %v2651_v33  ;;  %s5781_s12 = smov (%p2631_p0), [#allocation29]  }
 0xc65   : >> { %v2650_v20 = vld [vmem:[%s6906_s15 + $0xa0] sm:$0xff]  ;;  %3048 = vmatpush1.bf16.msra.mxu1 %v4387_v16  ;;  %3598 = vmatprep.subr.bf16.mxu0 %v4977_v53  ;;  %v2657_v53 = vld [vmem:[%s6906_s15 + $0x108] sm:$0xff]  ;;  %s5607_s3 = sshll.u32 (%p2631_p0), %s5781_s12, 4  ;;  %s5608_s3 = int_to_ptr.vmem [resolvable:$false] %s5607_s3 }
 0xc66   : >> { %3049 = vmatprep.subr.bf16.mxu1 %v4392_v18  ;;  %v4396_v23 = vcombine.high %v2648_v19, %v2650_v20  ;;  %v2652_v25 = vld [vmem:[%s6906_s15 + $0xc0] sm:$0xff]  ;;  %v4395_v4 = vcombine.low %v2648_v19, %v2650_v20  ;;  %s5609_s4 = scalar_lea.vmem (%p2631_p0), %s5608_s3, 1024  ;;  %p5610_p5 = scmp.lt.s32.totalorder (%p2631_p0), %s7082_s27, %s5608_s3 }
 0xc67   : >> { %v2654_v28 = vld [vmem:[%s6906_s15 + $0xe0] sm:$0xff]  ;;  %s4548_s1 = sshll.u32 (%p2631_p0), %s7296_s29, 9  ;;  %p5611_p3 = scmp.lt.s32.totalorder (%p2631_p0), %s5609_s4, %s5603_s0 }
 0xc68   : >> { %v4400_v29 = vcombine.high %v2652_v25, %v2654_v28  ;;  %v2656_v30 = vld [vmem:[%s6906_s15 + $0x100] sm:$0xff]  ;;  %v4399_v31 = vcombine.low %v2652_v25, %v2654_v28  ;;  %s7080_s5 = scalar_lea.hbm (%p2631_p0), %s7298_s26, %s4548_s1 }
 0xc69   : >> { %3050 = vmatpush1.bf16.msra.mxu1 %v4391_v22  ;;  %v2658_v5 = vld [vmem:[%s6906_s15 + $0x120] sm:$0xff]  ;;  %p7301_p7 = scmp.ne.s32.totalorder (%p2631_p0), %s7299_s7, 0  ;;  %p5612_p8 = por (%p2631_p0), %p5611_p3, %p5610_p5 }
 0xc6a   : >> { %3051 = vmatprep.subr.bf16.mxu1 %v4396_v23  ;;  %v4404_v34 = vcombine.high %v2656_v30, %v2658_v5  ;;  %v2660_v6 = vld [vmem:[%s6906_s15 + $0x140] sm:$0xff]  ;;  %v4403_v39 = vcombine.low %v2656_v30, %v2658_v5 }
 0xc6b   : >> { %v2662_v35 = vld [vmem:[%s6906_s15 + $0x160] sm:$0xff]  ;;  %p5605_p1 = pnand (%p2631_p0), %p5604_p2, %p7301_p7 }
 0xc6c   : >> { %v4408_v8 = vcombine.high %v2660_v6, %v2662_v35  ;;  %v2664_v40 = vld [vmem:[%s6906_s15 + $0x180] sm:$0xff]  ;;  %v4407_v42 = vcombine.low %v2660_v6, %v2662_v35 }
 0xc6d   : >> { %3052 = vmatpush1.bf16.msra.mxu1 %v4395_v4  ;;  %v2666_v41 = vld [vmem:[%s6906_s15 + $0x1a0] sm:$0xff]  ;;  %p5606_p11 = pneg (%p2631_p0), %p5605_p1 }
 0xc6e   : >> { %3053 = vmatprep.subr.bf16.mxu1 %v4400_v29  ;;  %v2668_v43 = vld [vmem:[%s6906_s15 + $0x1c0] sm:$0xff]  ;;  %v4412_v44 = vcombine.high %v2664_v40, %v2666_v41  ;;  %v4411_v47 = vcombine.low %v2664_v40, %v2666_v41 }
 0xc6f   : >> { %v2670_v45 = vld [vmem:[%s6906_s15 + $0x1e0] sm:$0xff]  ;;  %p5613_p9 = pnand (%p2631_p0), %p5612_p8, %p5606_p11 }
 0xc70   : >> { %v2672_v48 = vld [vmem:[%s6906_s15 + $0x200] sm:$0xff]  ;;  %v4416_v51 = vcombine.high %v2668_v43, %v2670_v45  ;;  %v4415_v54 = vcombine.low %v2668_v43, %v2670_v45  ;;  %v2647_v43 = vld [vmem:[%s6906_s15 + $0x68] sm:$0xff] }
 0xc71   : >> { %3054 = vmatpush1.bf16.msra.mxu1 %v4399_v31  ;;  %v2674_v50 = vld [vmem:[%s6906_s15 + $0x220] sm:$0xff] }
 0xc72   : >> { %3055 = vmatprep.subr.bf16.mxu1 %v4404_v34  ;;  %v2676_v57 = vld [vmem:[%s6906_s15 + $0x240] sm:$0xff]  ;;  %v4420_v58 = vcombine.high %v2672_v48, %v2674_v50  ;;  %v4419_v62 = vcombine.low %v2672_v48, %v2674_v50  ;;  %v2653_v48 = vld [vmem:[%s6906_s15 + $0xc8] sm:$0xff] }
 0xc73   : >> { %v4979_v49 = vld [vmem:[%s6925_s19 + $0x20] ss:$8 sps:$4 sm:$0xff]   ;;  %v4983_v55 = vld [vmem:[%s6925_s19 + $0x44] ss:$8 sps:$4 sm:$0xff]  }
 0xc74   : >> { %v2678_v59 = vld [vmem:[%s6906_s15 + $0x260] sm:$0xff]  ;;  %3599 = vmatpush1.bf16.msra.mxu0 %v4979_v49  ;;  %v2661_v49 = vld [vmem:[%s6906_s15 + $0x148] sm:$0xff] }
 0xc75   : >> { %3056 = vmatpush1.bf16.msra.mxu1 %v4403_v39  ;;  %v2680_v63 = vld [vmem:[%s6906_s15 + $0x280] sm:$0xff]  ;;  %v4424_v0 = vcombine.high %v2676_v57, %v2678_v59  ;;  %3600 = vmatprep.subr.bf16.mxu0 %v4980_v60  ;;  %v4423_v2 = vcombine.low %v2676_v57, %v2678_v59  ;;  %v2641_v39 = vld [vmem:[%s6906_s15 + $0x8] sm:$0xff] }
 0xc76   : >> { %3057 = vmatprep.subr.bf16.mxu1 %v4408_v8  ;;  %v2682_v56 = vld [vmem:[%s6906_s15 + $0x2a0] sm:$0xff]  ;;  %v2643_v8 = vld [vmem:[%s6906_s15 + $0x28] sm:$0xff] }
 0xc77   : >> { %v4985_v1 = vld [vmem:[%s6925_s19 + $0x40] ss:$8 sps:$4 sm:$0xff]   ;;  %v4428_v12 = vcombine.high %v2680_v63, %v2682_v56  ;;  %v4427_v14 = vcombine.low %v2680_v63, %v2682_v56  ;;  %v4989_v17 = vld [vmem:[%s6925_s19 + $0x64] ss:$8 sps:$4 sm:$0xff]   ;;  %v4390_v41 = vcombine.high %v2641_v39, %v2643_v8 }
 0xc78   : >> { %v2684_v3 = vld [vmem:[%s6906_s15 + $0x2c0] sm:$0xff]  ;;  %3601 = vmatpush1.bf16.msra.mxu0 %v4982_v61  ;;  %v2663_v59 = vld [vmem:[%s6906_s15 + $0x168] sm:$0xff] }
 0xc79   : >> { %3058 = vmatpush1.bf16.msra.mxu1 %v4407_v42  ;;  %v2686_v7 = vld [vmem:[%s6906_s15 + $0x2e0] sm:$0xff]  ;;  %3602 = vmatprep.subr.bf16.mxu0 %v4983_v55  ;;  %v2645_v42 = vld [vmem:[%s6906_s15 + $0x48] sm:$0xff]  ;;  %v4410_v61 = vcombine.high %v2661_v49, %v2663_v59  ;;  %v4409_v56 = vcombine.low %v2661_v49, %v2663_v59  ;;  %v5006_v49 = vld [vmem:[%s6925_s19 + $0xb0] ss:$8 sps:$4 sm:$0xff]  }
 0xc7a   : >> { %3059 = vmatprep.subr.bf16.mxu1 %v4412_v44  ;;  %v2688_v15 = vld [vmem:[%s6906_s15 + $0x300] sm:$0xff]  ;;  %v4432_v18 = vcombine.high %v2684_v3, %v2686_v7  ;;  %v4431_v19 = vcombine.low %v2684_v3, %v2686_v7  ;;  %v4389_v44 = vcombine.low %v2641_v39, %v2643_v8  ;;  %v4394_v45 = vcombine.high %v2645_v42, %v2647_v43  ;;  %v2667_v63 = vld [vmem:[%s6906_s15 + $0x1a8] sm:$0xff] }
 0xc7b   : >> { %v2690_v16 = vld [vmem:[%s6906_s15 + $0x320] sm:$0xff]  ;;  %v4393_v46 = vcombine.low %v2645_v42, %v2647_v43  ;;  %v2673_v7 = vld [vmem:[%s6906_s15 + $0x208] sm:$0xff] }
 0xc7c   : >> { %3603 = vmatpush1.bf16.msra.mxu0 %v4985_v1  ;;  %v2692_v20 = vld [vmem:[%s6906_s15 + $0x340] sm:$0xff]  ;;  %v4436_v23 = vcombine.high %v2688_v15, %v2690_v16  ;;  %v4435_v25 = vcombine.low %v2688_v15, %v2690_v16  ;;  %v2671_v1 = vld [vmem:[%s6906_s15 + $0x1e8] sm:$0xff] }
 0xc7d   : >> { %3060 = vmatpush1.bf16.msra.mxu1 %v4411_v47  ;;  %3604 = vmatprep.subr.bf16.mxu0 %v4986_v9  ;;  %v2694_v22 = vld [vmem:[%s6906_s15 + $0x360] sm:$0xff]  ;;  %v4398_v47 = vcombine.high %v2649_v32, %v2651_v33  ;;  %v2675_v9 = vld [vmem:[%s6906_s15 + $0x228] sm:$0xff] }
 0xc7e   : >> { %3061 = vmatprep.subr.bf16.mxu1 %v4416_v51  ;;  %v4440_v28 = vcombine.high %v2692_v20, %v2694_v22  ;;  %v2696_v4 = vld [vmem:[%s6906_s15 + $0x380] sm:$0xff]  ;;  %v4439_v30 = vcombine.low %v2692_v20, %v2694_v22  ;;  %v2655_v51 = vld [vmem:[%s6906_s15 + $0xe8] sm:$0xff]  ;;  %v4421_v16 = vcombine.low %v2673_v7, %v2675_v9 }
 0xc7f   : >> { %v2698_v29 = vld [vmem:[%s6906_s15 + $0x3a0] sm:$0xff]  ;;  %v4402_v50 = vcombine.high %v2653_v48, %v2655_v51  ;;  %v4401_v57 = vcombine.low %v2653_v48, %v2655_v51  ;;  %v2679_v15 = vld [vmem:[%s6906_s15 + $0x268] sm:$0xff]  ;;  %v4994_v48 = vld [vmem:[%s6925_s19 + $0x70] ss:$8 sps:$4 sm:$0xff]  }
 0xc80   : >> { %3605 = vmatpush1.bf16.msra.mxu0 %v4988_v13  ;;  %v4444_v5 = vcombine.high %v2696_v4, %v2698_v29  ;;  %v2700_v31 = vld [vmem:[%s6906_s15 + $0x3c0] sm:$0xff]  ;;  %v4443_v6 = vcombine.low %v2696_v4, %v2698_v29  ;;  %v4422_v13 = vcombine.high %v2673_v7, %v2675_v9  ;;  %v2689_v29 = vld [vmem:[%s6906_s15 + $0x308] sm:$0xff] }
 0xc81   : >> { %3062 = vmatpush1.bf16.msra.mxu1 %v4415_v54  ;;  %3606 = vmatprep.subr.bf16.mxu0 %v4989_v17  ;;  %v2702_v34 = vld [vmem:[%s6906_s15 + $0x3e0] sm:$0xff]  ;;  %v2659_v54 = vld [vmem:[%s6906_s15 + $0x128] sm:$0xff] }
 0xc82   : >> { %3063 = vmatprep.subr.bf16.mxu1 %v4420_v58  ;;  %v4448_v35 = vcombine.high %v2700_v31, %v2702_v34  ;;  %v4447_v40 = vcombine.low %v2700_v31, %v2702_v34  ;;  %v4406_v58 = vcombine.high %v2657_v53, %v2659_v54  ;;  %v4405_v60 = vcombine.low %v2657_v53, %v2659_v54  ;;  %v2693_v34 = vld [vmem:[%s6906_s15 + $0x348] sm:$0xff]  ;;  %v5000_v53 = vld [vmem:[%s6925_s19 + $0x90] ss:$8 sps:$4 sm:$0xff]  }
 0xc83   : >> { %v2697_v8 = vld [vmem:[%s6906_s15 + $0x388] sm:$0xff] }
 0xc84   : >> { %v2701_v43 = vld [vmem:[%s6906_s15 + $0x3c8] sm:$0xff] }
 0xc85   : >> { %3064 = vmatpush1.bf16.msra.mxu1 %v4419_v62  ;;  %v2665_v62 = vld [vmem:[%s6906_s15 + $0x188] sm:$0xff] }
 0xc86   : >> { %3065 = vmatprep.subr.bf16.mxu1 %v4424_v0  ;;  %v4414_v55 = vcombine.high %v2665_v62, %v2667_v63  ;;  %v2669_v0 = vld [vmem:[%s6906_s15 + $0x1c8] sm:$0xff] }
 0xc87   : >> { %v4418_v3 = vcombine.high %v2669_v0, %v2671_v1  ;;  %v4995_v51 = vld [vmem:[%s6925_s19 + $0x84] ss:$8 sps:$4 sm:$0xff]  }
 0xc88   : >> { %v5001_v54 = vld [vmem:[%s6925_s19 + $0xa4] ss:$8 sps:$4 sm:$0xff]  }
 0xc89   : >> { %3066 = vmatpush1.bf16.msra.mxu1 %v4423_v2  ;;  %v4413_v2 = vcombine.low %v2665_v62, %v2667_v63  ;;  %v5007_v59 = vld [vmem:[%s6925_s19 + $0xc4] ss:$8 sps:$4 sm:$0xff]   ;;  %v5012_v62 = vld [vmem:[%s6925_s19 + $0xd0] ss:$8 sps:$4 sm:$0xff]  }
 0xc8a   : >> { %3067 = vmatprep.subr.bf16.mxu1 %v4428_v12  ;;  %v4417_v12 = vcombine.low %v2669_v0, %v2671_v1  ;;  %v5013_v63 = vld [vmem:[%s6925_s19 + $0xe4] ss:$8 sps:$4 sm:$0xff]   ;;  %v5018_v0 = vld [vmem:[%s6925_s19 + $0xf0] ss:$8 sps:$4 sm:$0xff]  }
 0xc8b   : >> { %v5021_v1 = vld [vmem:[%s6925_s19 + $0x104] ss:$8 sps:$4 sm:$0xff]  }
 0xc8d   : >> { %3068 = vmatpush1.bf16.msra.mxu1 %v4427_v14  ;;  %v2677_v14 = vld [vmem:[%s6906_s15 + $0x248] sm:$0xff] }
 0xc8e   : >> { %3069 = vmatprep.subr.bf16.mxu1 %v4432_v18  ;;  %v4426_v17 = vcombine.high %v2677_v14, %v2679_v15  ;;  %v2681_v18 = vld [vmem:[%s6906_s15 + $0x288] sm:$0xff]  ;;  %v4425_v20 = vcombine.low %v2677_v14, %v2679_v15 }
 0xc91   : >> { %3070 = vmatpush1.bf16.msra.mxu1 %v4431_v19  ;;  %v2683_v19 = vld [vmem:[%s6906_s15 + $0x2a8] sm:$0xff] }
 0xc92   : >> { %3071 = vmatprep.subr.bf16.mxu1 %v4436_v23  ;;  %v4430_v22 = vcombine.high %v2681_v18, %v2683_v19  ;;  %v2685_v23 = vld [vmem:[%s6906_s15 + $0x2c8] sm:$0xff] }
 0xc95   : >> { %3072 = vmatpush1.bf16.msra.mxu1 %v4435_v25  ;;  %v2687_v25 = vld [vmem:[%s6906_s15 + $0x2e8] sm:$0xff] }
 0xc96   : >> { %3073 = vmatprep.subr.bf16.mxu1 %v4440_v28  ;;  %v4429_v28 = vcombine.low %v2681_v18, %v2683_v19  ;;  %v4434_v4 = vcombine.high %v2685_v23, %v2687_v25 }
 0xc99   : >> { %3074 = vmatpush1.bf16.msra.mxu1 %v4439_v30  ;;  %v2691_v30 = vld [vmem:[%s6906_s15 + $0x328] sm:$0xff] }
 0xc9a   : >> { %3075 = vmatprep.subr.bf16.mxu1 %v4444_v5  ;;  %v4433_v5 = vcombine.low %v2685_v23, %v2687_v25  ;;  %v4438_v31 = vcombine.high %v2689_v29, %v2691_v30 }
 0xc9d   : >> { %3076 = vmatpush1.bf16.msra.mxu1 %v4443_v6  ;;  %v2695_v6 = vld [vmem:[%s6906_s15 + $0x368] sm:$0xff] }
 0xc9e   : >> { %3077 = vmatprep.subr.bf16.mxu1 %v4448_v35  ;;  %v4437_v35 = vcombine.low %v2689_v29, %v2691_v30  ;;  %v4442_v39 = vcombine.high %v2693_v34, %v2695_v6 }
 0xca1   : >> { %3078 = vmatpush1.bf16.msra.mxu1 %v4447_v40  ;;  %v2699_v40 = vld [vmem:[%s6906_s15 + $0x3a8] sm:$0xff] }
 0xca2   : >> { %3090 = vmatprep.subr.bf16.mxu1 %v4390_v41  ;;  %v4441_v41 = vcombine.low %v2693_v34, %v2695_v6  ;;  %v4446_v42 = vcombine.high %v2697_v8, %v2699_v40 }
 0xca4   : >> { %3080 = vmatmul.mubr.bf16.vlgmr.msra.gmra.mrb[0].mxu1 %v6889_v10 }
 0xca5   : >> { %3091 = vmatpush1.bf16.msra.mxu1 %v4389_v44  ;;  %3122 = vmatprep.mubr.bf16.mxu1 %v6891_v11  ;;  %v2703_v44 = vld [vmem:[%s6906_s15 + $0x3e8] sm:$0xff] }
 0xca6   : >> { %3092 = vmatprep.subr.bf16.mxu1 %v4394_v45  ;;  %v4445_v45 = vcombine.low %v2697_v8, %v2699_v40  ;;  %v4450_v32 = vcombine.high %v2701_v43, %v2703_v44  ;;  %v4449_v33 = vcombine.low %v2701_v43, %v2703_v44 }
 0xca9   : >> { %3093 = vmatpush1.bf16.msra.mxu1 %v4393_v46  ;;  %v4991_v46 = vld [vmem:[%s6925_s19 + $0x60] ss:$8 sps:$4 sm:$0xff]  }
 0xcaa   : >> { %3094 = vmatprep.subr.bf16.mxu1 %v4398_v47  ;;  %3607 = vmatpush1.bf16.msra.mxu0 %v4991_v46  ;;  %v4992_v47 = vld [vmem:[%s6925_s19 + $0x74] ss:$8 sps:$4 sm:$0xff]  }
 0xcab   : >> { %3608 = vmatprep.subr.bf16.mxu0 %v4992_v47 }
 0xcad   : >> { %3095 = vmatpush1.bf16.msra.mxu1 %v4397_v52  ;;  %v4997_v52 = vld [vmem:[%s6925_s19 + $0x80] ss:$8 sps:$4 sm:$0xff]  }
 0xcae   : >> { %3096 = vmatprep.subr.bf16.mxu1 %v4402_v50  ;;  %3609 = vmatpush1.bf16.msra.mxu0 %v4994_v48  ;;  %v4998_v50 = vld [vmem:[%s6925_s19 + $0x94] ss:$8 sps:$4 sm:$0xff]   ;;  %v5019_v48 = vld [vmem:[%s6925_s19 + $0x100] ss:$8 sps:$4 sm:$0xff]  }
 0xcaf   : >> { %3610 = vmatprep.subr.bf16.mxu0 %v4995_v51  ;;  %v5024_v51 = vld [vmem:[%s6925_s19 + $0x114] ss:$8 sps:$4 sm:$0xff]  }
 0xcb1   : >> { %3097 = vmatpush1.bf16.msra.mxu1 %v4401_v57  ;;  %v5003_v57 = vld [vmem:[%s6925_s19 + $0xa0] ss:$8 sps:$4 sm:$0xff]  }
 0xcb2   : >> { %3098 = vmatprep.subr.bf16.mxu1 %v4406_v58  ;;  %3611 = vmatpush1.bf16.msra.mxu0 %v4997_v52  ;;  %v5004_v58 = vld [vmem:[%s6925_s19 + $0xb4] ss:$8 sps:$4 sm:$0xff]   ;;  %v5022_v52 = vld [vmem:[%s6925_s19 + $0x110] ss:$8 sps:$4 sm:$0xff]  }
 0xcb3   : >> { %3612 = vmatprep.subr.bf16.mxu0 %v4998_v50  ;;  %v5027_v50 = vld [vmem:[%s6925_s19 + $0x124] ss:$8 sps:$4 sm:$0xff]  }
 0xcb5   : >> { %3099 = vmatpush1.bf16.msra.mxu1 %v4405_v60  ;;  %v5009_v60 = vld [vmem:[%s6925_s19 + $0xc0] ss:$8 sps:$4 sm:$0xff]  }
 0xcb6   : >> { %3100 = vmatprep.subr.bf16.mxu1 %v4410_v61  ;;  %3613 = vmatpush1.bf16.msra.mxu0 %v5000_v53  ;;  %v5010_v61 = vld [vmem:[%s6925_s19 + $0xd4] ss:$8 sps:$4 sm:$0xff]   ;;  %v5025_v53 = vld [vmem:[%s6925_s19 + $0x120] ss:$8 sps:$4 sm:$0xff]  }
 0xcb7   : >> { %3614 = vmatprep.subr.bf16.mxu0 %v5001_v54  ;;  %v5030_v54 = vld [vmem:[%s6925_s19 + $0x134] ss:$8 sps:$4 sm:$0xff]  }
 0xcb9   : >> { %3101 = vmatpush1.bf16.msra.mxu1 %v4409_v56  ;;  %v5015_v56 = vld [vmem:[%s6925_s19 + $0xe0] ss:$8 sps:$4 sm:$0xff]  }
 0xcba   : >> { %3102 = vmatprep.subr.bf16.mxu1 %v4414_v55  ;;  %3615 = vmatpush1.bf16.msra.mxu0 %v5003_v57  ;;  %v5016_v55 = vld [vmem:[%s6925_s19 + $0xf4] ss:$8 sps:$4 sm:$0xff]   ;;  %v5028_v57 = vld [vmem:[%s6925_s19 + $0x130] ss:$8 sps:$4 sm:$0xff]  }
 0xcbb   : >> { %3616 = vmatprep.subr.bf16.mxu0 %v5004_v58  ;;  %v5033_v58 = vld [vmem:[%s6925_s19 + $0x144] ss:$8 sps:$4 sm:$0xff]  }
 0xcbd   : >> { %3103 = vmatpush1.bf16.msra.mxu1 %v4413_v2  ;;  %v7015_v2 = vld [vmem:[%s2704_s20] sm:$0xf] }
 0xcbe   : >> { %3104 = vmatprep.subr.bf16.mxu1 %v4418_v3  ;;  %3617 = vmatpush1.bf16.msra.mxu0 %v5006_v49  ;;  %v2710_v3 = vrot.slane %v7015_v2, %v6709_v38  ;;  %v2714_v7 = vrot.slane %v7015_v2, %v6706_v37  ;;  %v5031_v49 = vld [vmem:[%s6925_s19 + $0x140] ss:$8 sps:$4 sm:$0xff]  }
 0xcbf   : >> { %3618 = vmatprep.subr.bf16.mxu0 %v5007_v59  ;;  %v5036_v59 = vld [vmem:[%s6925_s19 + $0x154] ss:$8 sps:$4 sm:$0xff]  }
 0xcc1   : >> { %3105 = vmatpush1.bf16.msra.mxu1 %v4417_v12 }
 0xcc2   : >> { %3106 = vmatprep.subr.bf16.mxu1 %v4422_v13  ;;  %3619 = vmatpush1.bf16.msra.mxu0 %v5009_v60  ;;  %v5034_v60 = vld [vmem:[%s6925_s19 + $0x150] ss:$8 sps:$4 sm:$0xff]  }
 0xcc3   : >> { %3620 = vmatprep.subr.bf16.mxu0 %v5010_v61  ;;  %v5039_v61 = vld [vmem:[%s6925_s19 + $0x164] ss:$8 sps:$4 sm:$0xff]  }
 0xcc5   : >> { %3107 = vmatpush1.bf16.msra.mxu1 %v4421_v16 }
 0xcc6   : >> { %3108 = vmatprep.subr.bf16.mxu1 %v4426_v17  ;;  %3621 = vmatpush1.bf16.msra.mxu0 %v5012_v62  ;;  %v2717_v62 = vsub.s32 2, %v6703_v36 }
 0xcc7   : >> { %3622 = vmatprep.subr.bf16.mxu0 %v5013_v63  ;;  %v2721_v63 = vsub.s32 3, %v6703_v36 }
 0xcc9   : >> { %3109 = vmatpush1.bf16.msra.mxu1 %v4425_v20 }
 0xcca   : >> { %3110 = vmatprep.subr.bf16.mxu1 %v4430_v22  ;;  %3623 = vmatpush1.bf16.msra.mxu0 %v5015_v56  ;;  %v5037_v56 = vld [vmem:[%s6925_s19 + $0x160] ss:$8 sps:$4 sm:$0xff]  }
 0xccb   : >> { %3624 = vmatprep.subr.bf16.mxu0 %v5016_v55  ;;  %v2718_v55 = vrot.slane %v7015_v2, %v2717_v62 }
 0xccd   : >> { %3111 = vmatpush1.bf16.msra.mxu1 %v4429_v28 }
 0xcce   : >> { %3112 = vmatprep.subr.bf16.mxu1 %v4434_v4  ;;  %3625 = vmatpush1.bf16.msra.mxu0 %v5018_v0  ;;  %v5042_v0 = vld [vmem:[%s6925_s19 + $0x174] ss:$8 sps:$4 sm:$0xff]  }
 0xccf   : >> { %3637 = vmatprep.subr.bf16.mxu0 %v5021_v1  ;;  %v2722_v1 = vrot.slane %v7015_v2, %v2721_v63 }
 0xcd1   : >> { %3113 = vmatpush1.bf16.msra.mxu1 %v4433_v5 }
 0xcd2   : >> { %3114 = vmatprep.subr.bf16.mxu1 %v4438_v31 }
 0xcd5   : >> { %3115 = vmatpush1.bf16.msra.mxu1 %v4437_v35 }
 0xcd6   : >> { %3116 = vmatprep.subr.bf16.mxu1 %v4442_v39 }
 0xcd9   : >> { %3117 = vmatpush1.bf16.msra.mxu1 %v4441_v41 }
 0xcda   : >> { %3118 = vmatprep.subr.bf16.mxu1 %v4446_v42 }
 0xcdd   : >> { %3119 = vmatpush1.bf16.msra.mxu1 %v4445_v45 }
 0xcde   : >> { %3120 = vmatprep.subr.bf16.mxu1 %v4450_v32 }
 0xce1   : >> { %3121 = vmatpush1.bf16.msra.mxu1 %v4449_v33 }
 0xce4   : >> { %3123 = vmatmul.mubr.bf16.vlgmr.msra.gmra.mrb[4].mxu1 %v6889_v10 }
 0xd77   : >> { %v3081_v9 = vpop.f32.mrb[0].mxu1 }
 0xd78   : >> { %v3082_v12 = vadd.f32 %v3081_v9, %v2710_v3  ;;  %v3083_v13 = vpop.f32.mrb[1].mxu1 }
 0xd79   : >> { %v3084_v14 = vadd.f32 %v3083_v13, %v2714_v7  ;;  %v3085_v15 = vpop.f32.mrb[2].mxu1  ;;  %v5045_v13 = vld [vmem:[%s6925_s19 + $0x184] ss:$8 sps:$4 sm:$0xff]  }
 0xd7a   : >> { %v4451_v16 = vmul.f32 -1.702, %v3082_v12  ;;  %v3086_v17 = vadd.f32 %v3085_v15, %v2710_v3  ;;  %v3087_v18 = vpop.f32.mrb[3].mxu1 }
 0xd7b   : >> { %v4452_v19 = vmul.f32 -1.702, %v3084_v14  ;;  %v3088_v20 = vadd.f32 %v3087_v18, %v2714_v7  ;;  %v5040_v7 = vld [vmem:[%s6925_s19 + $0x170] ss:$8 sps:$4 sm:$0xff]  }
 0xd7c   : >> { %v3149_v22 = vmul.f32 1.442695, %v4451_v16  ;;  %v4455_v23 = vmul.f32 -1.702, %v3086_v17 }
 0xd7d   : >> { %v3151_v25 = vmul.f32 1.442695, %v4452_v19  ;;  %v4456_v28 = vmul.f32 -1.702, %v3088_v20 }
 0xd7e   : >> { %5067 = vpow2.f32 %v3149_v22  ;;  %v3157_v4 = vmul.f32 1.442695, %v4455_v23 }
 0xd7f   : >> { %5069 = vpow2.f32 %v3151_v25  ;;  %v3159_v29 = vmul.f32 1.442695, %v4456_v28  ;;  %v5048_v25 = vld [vmem:[%s6925_s19 + $0x194] ss:$8 sps:$4 sm:$0xff]  }
 0xd80   : >> { %5071 = vpow2.f32 %v3157_v4 }
 0xd81   : >> { %5073 = vpow2.f32 %v3159_v29 }
 0xd88   : >> { %v5068_v30 = vpop.eup %5067 }
 0xd89   : >> { %v5070_v5 = vpop.eup %5069  ;;  %v3165_v31 = vadd.f32 1.0, %v5068_v30 }
 0xd8a   : >> { %v5072_v34 = vpop.eup %5071  ;;  %v3166_v6 = vadd.f32 1.0, %v5070_v5  ;;  %v5046_v5 = vld [vmem:[%s6925_s19 + $0x190] ss:$8 sps:$4 sm:$0xff]  }
 0xd8b   : >> { %v5074_v35 = vpop.eup %5073  ;;  %5075 = vrcp.f32 %v3165_v31  ;;  %v3169_v39 = vadd.f32 1.0, %v5072_v34  ;;  %v5051_v31 = vld [vmem:[%s6925_s19 + $0x1a4] ss:$8 sps:$4 sm:$0xff]   ;;  %v5049_v34 = vld [vmem:[%s6925_s19 + $0x1a0] ss:$8 sps:$4 sm:$0xff]  }
 0xd8c   : >> { %5077 = vrcp.f32 %v3166_v6  ;;  %v3170_v8 = vadd.f32 1.0, %v5074_v35  ;;  %v5054_v6 = vld [vmem:[%s6925_s19 + $0x1b4] ss:$8 sps:$4 sm:$0xff]   ;;  %v5052_v35 = vld [vmem:[%s6925_s19 + $0x1b0] ss:$8 sps:$4 sm:$0xff]  }
 0xd8d   : >> { %5079 = vrcp.f32 %v3169_v39 }
 0xd8e   : >> { %5081 = vrcp.f32 %v3170_v8  ;;  %v5057_v8 = vld [vmem:[%s6925_s19 + $0x1c4] ss:$8 sps:$4 sm:$0xff]  }
 0xd95   : >> { %v5076_v40 = vpop.eup %5075 }
 0xd96   : >> { %v5078_v41 = vpop.eup %5077  ;;  %v3189_v44 = vmul.f32 %v5076_v40, %v3082_v12 }
 0xd97   : >> { %v5080_v42 = vpop.eup %5079  ;;  %v3190_v32 = vmul.f32 %v5078_v41, %v3084_v14 }
 0xd98   : >> { %v5082_v43 = vpop.eup %5081  ;;  %v3193_v45 = vmul.f32 %v5080_v42, %v3086_v17 }
 0xd99   : >> { %v3194_v33 = vmul.f32 %v5082_v43, %v3088_v20  ;;  %v5043_v20 = vld [vmem:[%s6925_s19 + $0x180] ss:$8 sps:$4 sm:$0xff]  }
 0xd9a   : >> { %v3201_v46 = vpack.c.bf16 %v3193_v45, %v3189_v44 }
 0xd9b   : >> { %v3202_v47 = vpack.c.bf16 %v3194_v33, %v3190_v32  ;;  %v5055_v32 = vld [vmem:[%s6925_s19 + $0x1c0] ss:$8 sps:$4 sm:$0xff]  }
 0xd9d   : >> { %3626 = vmatprep.mubr.bf16.mxu0 %v3202_v47  ;;  %v5058_v47 = vld [vmem:[%s6925_s19 + $0x1d0] ss:$8 sps:$4 sm:$0xff]  }
 0xd9e   : >> { %3627 = vmatmul.mubr.bf16.vlgmr.msra.gmra.mrb[0].mxu0 %v3201_v46  ;;  %v5060_v46 = vld [vmem:[%s6925_s19 + $0x1d4] ss:$8 sps:$4 sm:$0xff]  }
 0xd9f   : >> { %3638 = vmatpush1.bf16.msra.mxu0 %v5019_v48  ;;  %v5063_v48 = vld [vmem:[%s6925_s19 + $0x1e4] ss:$8 sps:$4 sm:$0xff]  }
 0xda0   : >> { %3639 = vmatprep.subr.bf16.mxu0 %v5024_v51  ;;  %v5061_v51 = vld [vmem:[%s6925_s19 + $0x1e0] ss:$8 sps:$4 sm:$0xff]  }
 0xda3   : >> { %3640 = vmatpush1.bf16.msra.mxu0 %v5022_v52  ;;  %v5066_v52 = vld [vmem:[%s6925_s19 + $0x1f4] ss:$8 sps:$4 sm:$0xff]  }
 0xda4   : >> { %3641 = vmatprep.subr.bf16.mxu0 %v5027_v50 }
 0xda7   : >> { %3642 = vmatpush1.bf16.msra.mxu0 %v5025_v53 }
 0xda8   : >> { %3643 = vmatprep.subr.bf16.mxu0 %v5030_v54 }
 0xdab   : >> { %3644 = vmatpush1.bf16.msra.mxu0 %v5028_v57  ;;  %v5064_v57 = vld [vmem:[%s6925_s19 + $0x1f0] ss:$8 sps:$4 sm:$0xff]  }
 0xdac   : >> { %3645 = vmatprep.subr.bf16.mxu0 %v5033_v58 }
 0xdaf   : >> { %3646 = vmatpush1.bf16.msra.mxu0 %v5031_v49 }
 0xdb0   : >> { %3647 = vmatprep.subr.bf16.mxu0 %v5036_v59 }
 0xdb3   : >> { %3648 = vmatpush1.bf16.msra.mxu0 %v5034_v60 }
 0xdb4   : >> { %3649 = vmatprep.subr.bf16.mxu0 %v5039_v61 }
 0xdb7   : >> { %v3124_v3 = vpop.f32.mrb[4].mxu1  ;;  %3650 = vmatpush1.bf16.msra.mxu0 %v5037_v56  ;;  %v3197_v56 = vld [vmem:[#allocation7] sm:$0xff] }
 0xdb8   : >> { %v7040_v9 = vadd.f32 %v3124_v3, %v2718_v55  ;;  %v3126_v12 = vpop.f32.mrb[5].mxu1  ;;  %3651 = vmatprep.subr.bf16.mxu0 %v5042_v0 }
 0xdb9   : >> { %v7043_v14 = vadd.f32 %v3126_v12, %v2722_v1  ;;  %v3128_v15 = vpop.f32.mrb[6].mxu1  ;;  %v3200_v12 = vld [vmem:[#allocation7 + $0x18] sm:$0xff] }
 0xdba   : >> { %v4453_v16 = vmul.f32 -1.702, %v7040_v9  ;;  %v3129_v17 = vadd.f32 %v3128_v15, %v2718_v55  ;;  %v3130_v18 = vpop.f32.mrb[7].mxu1  ;;  %v3198_v55 = vld [vmem:[#allocation7 + $0x8] sm:$0xff] }
 0xdbb   : >> { %v4454_v2 = vmul.f32 -1.702, %v7043_v14  ;;  %v3131_v19 = vadd.f32 %v3130_v18, %v2722_v1  ;;  %3652 = vmatpush1.bf16.msra.mxu0 %v5040_v7  ;;  %v3199_v1 = vld [vmem:[#allocation7 + $0x10] sm:$0xff]  ;;  %v3696_v18 = vld [vmem:[%s1060_s25] sm:$0x3] (%p2631_p0)  ;;  %s7297_s25 = sld [smem:[#allocation37_spill]] (%p2631_p0) }
 0xdbc   : >> { %v3153_v22 = vmul.f32 1.442695, %v4453_v16  ;;  %v4457_v23 = vmul.f32 -1.702, %v3129_v17  ;;  %3653 = vmatprep.subr.bf16.mxu0 %v5045_v13 }
 0xdbd   : >> { %v3155_v28 = vmul.f32 1.442695, %v4454_v2  ;;  %v4458_v4 = vmul.f32 -1.702, %v3131_v19 }
 0xdbe   : >> { %5083 = vpow2.f32 %v3153_v22  ;;  %v3161_v29 = vmul.f32 1.442695, %v4457_v23  ;;  %v3705_v23 = vrot.slane (%p2631_p0), %v3696_v18, %v6706_v37 }
 0xdbf   : >> { %5085 = vpow2.f32 %v3155_v28  ;;  %v3163_v30 = vmul.f32 1.442695, %v4458_v4  ;;  %3654 = vmatpush1.bf16.msra.mxu0 %v5043_v20  ;;  %v3701_v20 = vrot.slane (%p2631_p0), %v3696_v18, %v6709_v38 }
 0xdc0   : >> { %5087 = vpow2.f32 %v3161_v29  ;;  %3655 = vmatprep.subr.bf16.mxu0 %v5048_v25 }
 0xdc1   : >> { %5089 = vpow2.f32 %v3163_v30  ;;  %s7300_s6 = sand.u32 (%p2631_p0), 1, %s7297_s25  }
 0xdc2   : > { %s7090_s9 = scalar_lea.sflag (%p2631_p0), [#allocation10], %s7300_s6 }
 0xdc3   : >> { %3656 = vmatpush1.bf16.msra.mxu0 %v5046_v5 }
 0xdc4   : >> { %3657 = vmatprep.subr.bf16.mxu0 %v5051_v31 }
 0xdc7   : >> { %3658 = vmatpush1.bf16.msra.mxu0 %v5049_v34 }
 0xdc8   : >> { %v5084_v39 = vpop.eup %5083  ;;  %3659 = vmatprep.subr.bf16.mxu0 %v5054_v6 }
 0xdc9   : >> { %v5086_v40 = vpop.eup %5085  ;;  %v3167_v41 = vadd.f32 1.0, %v5084_v39 }
 0xdca   : >> { %v5088_v42 = vpop.eup %5087  ;;  %v3168_v43 = vadd.f32 1.0, %v5086_v40 }
 0xdcb   : >> { %v5090_v44 = vpop.eup %5089  ;;  %5091 = vrcp.f32 %v3167_v41  ;;  %v3171_v45 = vadd.f32 1.0, %v5088_v42  ;;  %3660 = vmatpush1.bf16.msra.mxu0 %v5052_v35 }
 0xdcc   : >> { %5093 = vrcp.f32 %v3168_v43  ;;  %v3172_v33 = vadd.f32 1.0, %v5090_v44  ;;  %3661 = vmatprep.subr.bf16.mxu0 %v5057_v8 }
 0xdcd   : >> { %5095 = vrcp.f32 %v3171_v45 }
 0xdce   : >> { %5097 = vrcp.f32 %v3172_v33 }
 0xdcf   : >> { %3662 = vmatpush1.bf16.msra.mxu0 %v5055_v32 }
 0xdd0   : >> { %3663 = vmatprep.subr.bf16.mxu0 %v5060_v46 }
 0xdd3   : >> { %3664 = vmatpush1.bf16.msra.mxu0 %v5058_v47 }
 0xdd4   : >> { %3665 = vmatprep.subr.bf16.mxu0 %v5063_v48 }
 0xdd5   : >> { %v5092_v50 = vpop.eup %5091 }
 0xdd6   : >> { %v5094_v53 = vpop.eup %5093  ;;  %v3191_v49 = vmul.f32 %v5092_v50, %v7040_v9 }
 0xdd7   : >> { %v5096_v54 = vpop.eup %5095  ;;  %3666 = vmatpush1.bf16.msra.mxu0 %v5061_v51  ;;  %v3192_v60 = vmul.f32 %v5094_v53, %v7043_v14 }
 0xdd8   : >> { %v5098_v58 = vpop.eup %5097  ;;  %v3195_v59 = vmul.f32 %v5096_v54, %v3129_v17  ;;  %3667 = vmatprep.subr.bf16.mxu0 %v5066_v52 }
 0xdd9   : >> { %v3196_v61 = vmul.f32 %v5098_v58, %v3131_v19 }
 0xdda   : >> { %v3203_v62 = vpack.c.bf16 %v3195_v59, %v3191_v49 }
 0xddb   : >> { %3668 = vmatpush1.bf16.msra.mxu0 %v5064_v57  ;;  %v3204_v63 = vpack.c.bf16 %v3196_v61, %v3192_v60 }
 0xddd   : >> { %3669 = vmatprep.mubr.bf16.mxu0 %v3204_v63 }
 0xdde   : >> { %3670 = vmatmul.mubr.bf16.vlgmr.msra.gmra.mrb[0].mxu0 %v3203_v62 }
 0xeb1   : >> { %v3671_v0 = vpop.f32.mrb[0].mxu0  ;;  %2633 = sbr.rel (!%p2631_p0) target bundleno = 3164 (0xc5c), region = 353 }
 0xeb2   : >> { %v3680_v3 = vadd.f32 %v3671_v0, %v3197_v56  ;;  %v3673_v7 = vpop.f32.mrb[1].mxu0 }
 0xeb3   : >> { %v3681_v13 = vadd.f32 %v3673_v7, %v3198_v55  ;;  %v3675_v15 = vpop.f32.mrb[2].mxu0 }
 0xeb4   : >> { %3684 = vst [vmem:[#allocation7] sm:$0xff] %v3680_v3  ;;  %v3682_v9 = vadd.f32 %v3675_v15, %v3199_v1  ;;  %v3677_v16 = vpop.f32.mrb[3].mxu0 }
 0xeb5   : >> { %3685 = vst [vmem:[#allocation7 + $0x8] sm:$0xff] %v3681_v13  ;;  %v3683_v14 = vadd.f32 %v3677_v16, %v3200_v12 }
 0xeb6   : >> { %3686 = vst [vmem:[#allocation7 + $0x10] sm:$0xff] %v3682_v9 }
 0xeb7   : >> { %3687 = vst [vmem:[#allocation7 + $0x18] sm:$0xff] %v3683_v14 }
 0xebb   : > { %v3688_v17 = vld [vmem:[#allocation7] sm:$0xff] }
 0xebc   : > { %v3689_v2 = vld [vmem:[#allocation7 + $0x8] sm:$0xff]  ;;  %v3692_v19 = vadd.f32 %v3688_v17, %v6862_v21 }
 0xebd   : > { %v3693_v22 = vadd.f32 %v3689_v2, %v6865_v24  ;;  %v3690_v25 = vld [vmem:[#allocation7 + $0x10] sm:$0xff] }
 0xebe   : > { %v3691_v36 = vld [vmem:[#allocation7 + $0x18] sm:$0xff]  ;;  %v3694_v10 = vadd.f32 %v3690_v25, %v6868_v26  ;;  %v3708_v28 = vadd.f32 %v3701_v20, %v3692_v19 }
 0xebf   : > { %v3695_v11 = vadd.f32 %v3691_v36, %v6871_v27  ;;  %v3709_v4 = vadd.f32 %v3705_v23, %v3693_v22 }
 0xec0   : > { %v3710_v37 = vadd.f32 %v3701_v20, %v3694_v10  ;;  %3716 = vst [vmem:[%s6599_s14] sm:$0xff] %v3708_v28  ;;  %3712 = vst [vmem:[#allocation2] sm:$0xff] %v3708_v28 }
 0xec1   : > { %v3711_v38 = vadd.f32 %v3705_v23, %v3695_v11  ;;  %3717 = vst [vmem:[%s6599_s14 + $0x8] sm:$0xff] %v3709_v4  ;;  %3713 = vst [vmem:[#allocation2 + $0x8] sm:$0xff] %v3709_v4 }
 0xec2   : > { %3718 = vst [vmem:[%s6599_s14 + $0x10] sm:$0xff] %v3710_v37  ;;  %3714 = vst [vmem:[#allocation2 + $0x10] sm:$0xff] %v3710_v37 }
 0xec3   : > { %3719 = vst [vmem:[%s6599_s14 + $0x18] sm:$0xff] %v3711_v38  ;;  %3715 = vst [vmem:[#allocation2 + $0x18] sm:$0xff] %v3711_v38 }
 0xec4   : > { %5616 = shalt.err (!%p5613_p9)
}
 0xec5   : > { %s5617_s14 = scalar_lea.hbm %s7080_s5, 512  ;;  %s5621_s22 = scalar_lea.hbm %s7298_s26, 1024 }
 0xec6   : > { %p5618_p13 = scmp.ne.s32.totalorder %s7080_s5, %s5617_s14  ;;  %p5622_p12 = scmp.lt.u32.totalorder %s7080_s5, %s7298_s26 }
 0xec7   : > { %p5623_p10 = scmp.lt.u32.totalorder %s5621_s22, %s5617_s14  ;;  %p5625_p2 = scmp.lt.u32.totalorder %s5617_s14, %s7080_s5 }
 0xec8   : > { %p5619_p6 = pnand %p5618_p13, %p7301_p7 }
 0xec9   : > { %p5624_p0 = por %p5623_p10, %p5622_p12 }
 0xeca   : > { %p5620_p4 = pneg %p5619_p6 }
 0xecb   : > { %p5626_p1 = por %p5625_p2, %p5624_p0 }
 0xecd   : > { %p5627_p11 = pnand %p5626_p1, %p5620_p4 }
 0xecf   : > { %5630 = shalt.err (!%p5627_p11)
}
 0xed0   : > { %s5782_s20 = smov 256   ;;  %s5783_s29 = smov 16  }
 0xed1   : > { %4623 = dma.vmem_to_hbm [thread:$0]  (%p7301_p7), %s7082_s27, 512, %s7080_s5, %s7090_s9, %s5782_s20, %s5782_s20, %s5783_s29  }
 0xed2 PF: > { %s7302_s1 = sld [smem:[#allocation36_spill]]  ;;  %s7303_s25 = sld [smem:[#allocation50_spill]] }
 0xed3   : > { %p4635_p5 = scmp.ge.s32.totalorder %s5741_s2, 2 }
 0xed8   : > { %s3749_s13 = sand.u32 1, %s7302_s1   ;;  %p7304_p3 = scmp.ne.s32.totalorder %s7303_s25, 0 }
 0xed9   : > { %s3750_s18 = scalar_lea.sflag [#allocation10], %s3749_s13 }
 0xeda   : > { %p4630_p8 = pnand %p4635_p5, %p7304_p3 }
 0xedc   : > { %5696 = dma.done.wait (!%p4630_p8), %s3750_s18, 512  }
 0xedd   : > { %5698 = vsyncadd (!%p4630_p8), %s3750_s18, 4294966784  ;;  %s35_s2 = sadd.s32 1, %s5741_s2   ;;  %s7305_s27 = sld [smem:[#allocation34_spill]] }
 0xede   : > { %p32_p9 = scmp.ge.s32.totalorder %s35_s2, 6   ;;  %s7306_s28 = sld [smem:[#allocation35_spill]] }
 0xedf   : > { %s7307_s29 = sld [smem:[#allocation46_spill]]  ;;  %s7308_s30 = sld [smem:[#allocation37_spill]] }
 0xee0   : > { %s7309_s0 = sld [smem:[#allocation38_spill]]  ;;  %s7310_s19 = sld [smem:[#allocation47_spill]] }
 0xee1   : > { %s7311_s20 = sld [smem:[#allocation41_spill]]  ;;  %s7312_s7 = sld [smem:[#allocation43_spill]] }
 0xee2   : > { %s7313_s22 = sld [smem:[#allocation44_spill]]  ;;  %s7314_s1 = smov %s5733_s21 }
 0xee3   :  { %34 = sbr.rel (!%p32_p9) target bundleno = 28 (0x1c), region = 364 }
 0xee7   : > { %s7315_s21 = smov %s7312_s7 }
 0xeea   :  { %3755 = vsyncpa [#allocation9], 1 }
 0xeeb   :  { %3757 = vsyncpa [#allocation9 + $0x1], 1 }
 0xeec   :  { %3758 = vsyncpa [#allocation12], 1 }
 0xeed   :  { %3759 = vsyncpa [#allocation10], 1 }
 0xeee   :  { %3761 = vsyncpa [#allocation10 + $0x1], 1 }

</bundles_post_ra>
